<compile_context>
chip_gen: v5e
topology: v5e:2x2
jax: 0.10.0
libtpu: 0.0.40
codegen_flags: <defaults>
</compile_context>

<pallas_src>
import functools
import math

import jax
import jax.numpy as jnp
from jax import lax
from jax.experimental import pallas as pl
from jax.experimental.pallas import tpu as pltpu


_VMEM_LIMIT = 32 * 1024 * 1024


def _cp(sems):
    return pltpu.CompilerParams(dimension_semantics=sems, vmem_limit_bytes=_VMEM_LIMIT)


def _round_up(n, m):
    return ((n + m - 1) // m) * m


def _pick_lane_tile(n, pref=2048):
    """Tile along a lane-mapped axis: full dim if small (always legal), else a
    128-multiple tile (partial edge blocks handled by Pallas)."""
    return n if n <= pref else pref


# ----------------------------------------------------------------------------
# Pallas kernel 1: lane-dense matmul + bias (+ optional ReLU) -- conv hot path
# ----------------------------------------------------------------------------
def _mm_kernel(w_ref, x_ref, b_ref, o_ref, *, relu):
    acc = jnp.dot(w_ref[...], x_ref[...], preferred_element_type=jnp.float32)
    acc = acc + b_ref[...]                       # (Cout,1) broadcast over lanes
    if relu:
        acc = jnp.maximum(acc, 0.0)
    o_ref[...] = acc.astype(o_ref.dtype)


def matmul_bias_act(wmat, colT, bias, *, relu=False, tn_pref=512):
    """wmat: (Cout, K) bf16; colT: (K, M) bf16; bias: (Cout, 1) f32 -> (Cout, M) f32."""
    Cout, K = wmat.shape
    _, M = colT.shape
    tn = M if M <= tn_pref else tn_pref          # full dim, or 512 (multiple of 128)
    return pl.pallas_call(
        functools.partial(_mm_kernel, relu=relu),
        out_shape=jax.ShapeDtypeStruct((Cout, M), jnp.float32),
        grid=(pl.cdiv(M, tn),),
        in_specs=[
            pl.BlockSpec((Cout, K), lambda i: (0, 0)),
            pl.BlockSpec((K, tn), lambda i: (0, i)),
            pl.BlockSpec((Cout, 1), lambda i: (0, 0)),
        ],
        out_specs=pl.BlockSpec((Cout, tn), lambda i: (0, i)),
        compiler_params=_cp(("parallel",)),
    )(wmat, colT, bias)


def conv2d_cnhw(x, w, b, *, stride=1, padding=1, relu=False):
    """x: (Cin, N, H, W) CNHW; w: (Cout, Cin, kh, kw); b: (Cout,) -> (Cout, N, Ho, Wo).
    Channel-major layout: col^T (K, M) and the (Cout, M) output are plain reshapes."""
    Cin, N, H, W = x.shape
    Cout, _, kh, kw = w.shape
    Ho = (H + 2 * padding - kh) // stride + 1
    Wo = (W + 2 * padding - kw) // stride + 1
    xp = jnp.pad(x, ((0, 0), (0, 0), (padding, padding), (padding, padding)))
    xp = xp.astype(jnp.bfloat16)
    # TODO(synk): col^T is still materialized once in HBM (kh*kw x input size); a fully
    # fused tap-accumulating kernel needs strided element windows for the stride-2
    # layers, which BlockSpec cannot express cleanly.
    taps = [xp[:, :, i:i + stride * Ho:stride, j:j + stride * Wo:stride]
            for i in range(kh) for j in range(kw)]
    K = Cin * kh * kw
    M = N * Ho * Wo
    colT = jnp.stack(taps, axis=1).reshape(K, M)       # K order = (ci, ky, kx), matches w
    wmat = w.reshape(Cout, K).astype(jnp.bfloat16)
    Kp = _round_up(K, 16)                              # bf16 sublane alignment (exact: zero rows)
    if Kp != K:
        colT = jnp.pad(colT, ((0, Kp - K), (0, 0)))
        wmat = jnp.pad(wmat, ((0, 0), (0, Kp - K)))
    out = matmul_bias_act(wmat, colT, b.reshape(Cout, 1).astype(jnp.float32), relu=relu)
    return out.reshape(Cout, N, Ho, Wo)


def conv_transpose2d_cnhw(x, w, b, *, stride=2, padding=1, output_padding=1, relu=False):
    """PyTorch ConvTranspose2d semantics; w: (Cin, Cout, kh, kw); x/out in CNHW.
    Zero-dilation + flipped-kernel conv via the same Pallas matmul path."""
    # TODO(synk): split-kernel (sub-pixel) formulation would avoid the ~4x zero work.
    Cin, N, H, W = x.shape
    _, Cout, kh, kw = w.shape
    Hd, Wd = (H - 1) * stride + 1, (W - 1) * stride + 1
    xd = jnp.zeros((Cin, N, Hd, Wd), x.dtype).at[:, :, ::stride, ::stride].set(x)
    pbh, pah = kh - 1 - padding, kh - 1 - padding + output_padding
    pbw, paw = kw - 1 - padding, kw - 1 - padding + output_padding
    xp = jnp.pad(xd, ((0, 0), (0, 0), (pbh, pah), (pbw, paw)))
    weq = jnp.flip(w, axis=(2, 3)).transpose(1, 0, 2, 3)       # (Cout, Cin, kh, kw)
    return conv2d_cnhw(xp, weq, b, stride=1, padding=0, relu=relu)


# ----------------------------------------------------------------------------
# Pallas kernel 2: group-wise correlation (+ view averaging), HW-tiled
# ----------------------------------------------------------------------------
def _gwc_kernel(ref_ref, war_ref, out_ref, *, scale):
    ref = ref_ref[0, 0]                         # (Cg, hwt)
    war = war_ref[0, 0]                         # (Cg, D, hwt)
    out_ref[0, 0] = jnp.sum(war * ref[:, None, :], axis=0) * scale


def group_correlation_pallas(ref_g, war_g, V):
    """ref_g: (B, G, Cg, HW); war_g: (B, G, Cg, D, HW) (summed over source views).
    Returns similarity_sum / V with shape (B, G, D, HW)."""
    B, G, Cg, HW = ref_g.shape
    D = war_g.shape[3]
    hwt = _pick_lane_tile(HW)
    scale = 1.0 / (Cg * V)
    return pl.pallas_call(
        functools.partial(_gwc_kernel, scale=scale),
        out_shape=jax.ShapeDtypeStruct((B, G, D, HW), jnp.float32),
        grid=(B, G, pl.cdiv(HW, hwt)),
        in_specs=[
            pl.BlockSpec((1, 1, Cg, hwt), lambda b, g, t: (b, g, 0, t)),
            pl.BlockSpec((1, 1, Cg, D, hwt), lambda b, g, t: (b, g, 0, 0, t)),
        ],
        out_specs=pl.BlockSpec((1, 1, D, hwt), lambda b, g, t: (b, g, 0, t)),
        compiler_params=_cp(("parallel", "parallel", "parallel")),
    )(ref_g, war_g)


# ----------------------------------------------------------------------------
# Pallas kernel 3: softmax over D + depth regression + confidence, HW-tiled
# ----------------------------------------------------------------------------
def _depth_kernel(reg_ref, dv_ref, depth_ref, conf_ref):
    s = reg_ref[0]                                            # (D, hwt)
    m = jnp.max(s, axis=0, keepdims=True)
    e = jnp.exp(s - m)
    p = e / jnp.sum(e, axis=0, keepdims=True)                 # softmax over D

    dv2 = dv_ref[0]                                           # (2, D): [depth_values; arange(D)]
    r2 = jnp.dot(dv2, p, preferred_element_type=jnp.float32)  # fused regression: (2, hwt)
    depth = r2[0:1, :]
    idx = r2[1:2, :].astype(jnp.int32)                        # trunc, like torch .long()

    # photometric confidence = sum of p over the 4-wide band [idx-1, idx+2]
    # (== gather of 4*avg_pool3d(pad(p,(1,2)),(4,1,1)) at idx), as a banded-mask reduce.
    rows = lax.broadcasted_iota(jnp.int32, p.shape, 0)
    band = ((rows >= idx - 1) & (rows <= idx + 2)).astype(jnp.float32)
    conf = jnp.sum(p * band, axis=0, keepdims=True)

    depth_ref[0] = depth
    conf_ref[0] = conf


def softmax_depth_conf_pallas(similarity_reg, depth_values):
    """similarity_reg: (B, D, H, W); depth_values: (B, D) -> depth, conf: (B, H, W)."""
    B, D, H, W = similarity_reg.shape
    HW = H * W
    reg = similarity_reg.reshape(B, D, HW)
    dv2 = jnp.stack(
        [depth_values.astype(jnp.float32),
         jnp.broadcast_to(jnp.arange(D, dtype=jnp.float32), (B, D))], axis=1)   # (B, 2, D)
    hwt = _pick_lane_tile(HW)
    depth, conf = pl.pallas_call(
        _depth_kernel,
        out_shape=(jax.ShapeDtypeStruct((B, 1, HW), jnp.float32),
                   jax.ShapeDtypeStruct((B, 1, HW), jnp.float32)),
        grid=(B, pl.cdiv(HW, hwt)),
        in_specs=[
            pl.BlockSpec((1, D, hwt), lambda b, t: (b, 0, t)),
            pl.BlockSpec((1, 2, D), lambda b, t: (b, 0, 0)),
        ],
        out_specs=(pl.BlockSpec((1, 1, hwt), lambda b, t: (b, 0, t)),
                   pl.BlockSpec((1, 1, hwt), lambda b, t: (b, 0, t))),
        compiler_params=_cp(("parallel", "parallel")),
    )(reg, dv2)
    return depth.reshape(B, H, W), conf.reshape(B, H, W)


# ----------------------------------------------------------------------------
# Sub-networks (conv compute dispatched to the Pallas matmul kernel)
# ----------------------------------------------------------------------------
# FeatureNet (standard MVSNet): (cout, cin, k, stride, pad, relu)
_FEAT_SPECS = [
    (8, 3, 3, 1, 1, True), (8, 8, 3, 1, 1, True), (16, 8, 5, 2, 2, True),
    (16, 16, 3, 1, 1, True), (16, 16, 3, 1, 1, True), (32, 16, 5, 2, 2, True),
    (32, 32, 3, 1, 1, True), (32, 32, 3, 1, 1, False),
]


def feature_net(feat_params, x):
    # x: (3, B, H, W) CNHW.  BatchNorm (eval, default running stats) folded to identity.
    for (w, b), (_, _, _, stride, pad, relu) in zip(feat_params, _FEAT_SPECS):
        x = conv2d_cnhw(x, w, b, stride=stride, padding=pad, relu=relu)
    return x  # (32, B, H/4, W/4)


def reg_net(p, S, H, W):
    """SimlarityRegNet: S (B, G, D, H*W) -> (B, D, H, W)."""
    B, G, D, HW = S.shape
    x = S.transpose(1, 0, 2, 3).reshape(G, B * D, H, W)       # CNHW with batch = B*D
    c0 = conv2d_cnhw(x, p["w0"], p["b0"], stride=1, padding=1, relu=True)
    c1 = conv2d_cnhw(c0, p["w1"], p["b1"], stride=2, padding=1, relu=True)
    c2 = conv2d_cnhw(c1, p["w2"], p["b2"], stride=2, padding=1, relu=True)
    c3 = jnp.maximum(conv_transpose2d_cnhw(c2, p["w3t"], p["b3t"]) + c1, 0.0)
    c4 = jnp.maximum(conv_transpose2d_cnhw(c3, p["w4t"], p["b4t"]) + c0, 0.0)
    out = conv2d_cnhw(c4, p["w5"], p["b5"], stride=1, padding=1, relu=False)    # (1, B*D, H, W)
    return out.reshape(B, D, H, W)


# ----------------------------------------------------------------------------
# Warping (homography + bilinear sampling) -- plain JAX glue
# TODO(synk): grid_sample-style bilinear gather has data-dependent per-pixel
#             indices; kept in plain JAX rather than a Pallas gather kernel.
# ----------------------------------------------------------------------------
def warping(src_fea, src_proj, ref_proj, depth_values):
    """src_fea: (C, B, H, W) CNHW -> warped (B, C, D, H*W)."""
    C, B, H, W = src_fea.shape
    D = depth_values.shape[1]
    proj = src_proj @ jnp.linalg.inv(ref_proj)
    rot = proj[:, :3, :3]
    trans = proj[:, :3, 3]
    ys, xs = jnp.meshgrid(jnp.arange(H, dtype=jnp.float32),
                          jnp.arange(W, dtype=jnp.float32), indexing="ij")
    xyz = jnp.stack([xs.ravel(), ys.ravel(), jnp.ones(H * W, jnp.float32)], 0)   # (3, HW)
    rot_xyz = jnp.einsum("bij,jk->bik", rot, xyz)                                # (B, 3, HW)
    pxyz = (rot_xyz[:, :, None, :] * depth_values[:, None, :, None]
            + trans[:, :, None, None])                                           # (B, 3, D, HW)
    z = pxyz[:, 2]
    px = pxyz[:, 0] / z
    py = pxyz[:, 1] / z                                                          # (B, D, HW)

    fea_flat = src_fea.reshape(C, B, H * W)

    def sample(xi, yi):
        valid = ((xi >= 0) & (xi <= W - 1) & (yi >= 0) & (yi <= H - 1)).astype(jnp.float32)
        xc = jnp.clip(xi, 0, W - 1).astype(jnp.int32)
        yc = jnp.clip(yi, 0, H - 1).astype(jnp.int32)
        idx = (yc * W + xc).reshape(B, D * H * W)
        g = jax.vmap(lambda f, i: jnp.take(f, i, axis=1), in_axes=(1, 0))(fea_flat, idx)
        return g.reshape(B, C, D, H * W) * valid.reshape(B, 1, D, H * W)

    x0, y0 = jnp.floor(px), jnp.floor(py)
    wx1, wy1 = px - x0, py - y0
    wx0, wy0 = 1.0 - wx1, 1.0 - wy1
    out = (sample(x0, y0) * (wx0 * wy0)[:, None]
           + sample(x0 + 1, y0) * (wx1 * wy0)[:, None]
           + sample(x0, y0 + 1) * (wx0 * wy1)[:, None]
           + sample(x0 + 1, y0 + 1) * (wx1 * wy1)[:, None])
    return out


# ----------------------------------------------------------------------------
# Net.forward
# ----------------------------------------------------------------------------
def net_forward(params, imgs, proj_matrices, depth_values):
    """imgs: (B, V, 3, H, W); proj_matrices: (B, V, 4, 4); depth_values: (B, D)."""
    G = 8
    B, V = imgs.shape[0], imgs.shape[1]
    D = depth_values.shape[1]

    # Channel-major layout inside the conv stacks; transpose only at boundaries.
    features = [feature_net(params["feature"], imgs[:, v].transpose(1, 0, 2, 3))
                for v in range(V)]
    ref_feature, src_features = features[0], features[1:]
    ref_proj = proj_matrices[:, 0]
    src_projs = [proj_matrices[:, v] for v in range(1, V)]

    C, _, Hf, Wf = ref_feature.shape
    HW = Hf * Wf
    Cg = C // G

    # group_wise_correlation is linear in the warped features, so summing warped
    # features over source views first is exactly sum_v similarity_v.
    warped_sum = jnp.zeros((B, C, D, HW), jnp.float32)
    for src_fea, src_proj in zip(src_features, src_projs):
        warped_sum = warped_sum + warping(src_fea, src_proj, ref_proj, depth_values)

    ref_g = ref_feature.reshape(C, B, HW).transpose(1, 0, 2).reshape(B, G, Cg, HW)
    war_g = warped_sum.reshape(B, G, Cg, D, HW)
    similarity_sum = group_correlation_pallas(ref_g, war_g, V)            # /(Cg*V) inside
    similarity_reg = reg_net(params["reg"], similarity_sum, Hf, Wf)       # (B, D, Hf, Wf)
    depth, photometric_confidence = softmax_depth_conf_pallas(similarity_reg, depth_values)
    return {"depth": depth, "photometric_confidence": photometric_confidence}


# ----------------------------------------------------------------------------
# Deterministic parameter init
# ----------------------------------------------------------------------------
def _cw(key, cout, cin, k):
    return jax.random.normal(key, (cout, cin, k, k), jnp.float32) / math.sqrt(cin * k * k)


def init_params(key):
    kf, kr = jax.random.split(key)
    fkeys = jax.random.split(kf, len(_FEAT_SPECS))
    feat = [(_cw(k, co, ci, ks), jnp.zeros((co,), jnp.float32))
            for k, (co, ci, ks, _, _, _) in zip(fkeys, _FEAT_SPECS)]
    rk = jax.random.split(kr, 6)
    reg = {
        "w0": _cw(rk[0], 8, 8, 3), "b0": jnp.zeros((8,), jnp.float32),
        "w1": _cw(rk[1], 16, 8, 3), "b1": jnp.zeros((16,), jnp.float32),
        "w2": _cw(rk[2], 32, 16, 3), "b2": jnp.zeros((32,), jnp.float32),
        "w3t": jax.random.normal(rk[3], (32, 16, 3, 3), jnp.float32) / math.sqrt(32 * 9),
        "b3t": jnp.zeros((16,), jnp.float32),
        "w4t": jax.random.normal(rk[4], (16, 8, 3, 3), jnp.float32) / math.sqrt(16 * 9),
        "b4t": jnp.zeros((8,), jnp.float32),
        "w5": _cw(rk[5], 1, 8, 3), "b5": jnp.zeros((1,), jnp.float32),
    }
    return {"feature": feat, "reg": reg}


if __name__ == "__main__":
    key = jax.random.PRNGKey(0)
    k_img, k_param = jax.random.split(key)

    B, V, H, W, D = 2, 3, 32, 32, 8
    imgs = jax.random.normal(k_img, (B, V, 3, H, W), jnp.float32)

    # Projection matrices: reference = identity, sources = identity + small translation.
    eye = jnp.eye(4, dtype=jnp.float32)
    projs = jnp.stack([eye, eye.at[0, 3].set(0.5), eye.at[1, 3].set(-0.3)], 0)  # (V,4,4)
    proj_matrices = jnp.broadcast_to(projs, (B, V, 4, 4))

    depth_values = jnp.broadcast_to(jnp.linspace(0.5, 2.0, D, dtype=jnp.float32), (B, D))

    params = init_params(k_param)

    fwd = jax.jit(net_forward)
    out = fwd(params, imgs, proj_matrices, depth_values)
    jax.block_until_ready(out)

    assert out["depth"].shape == (B, H // 4, W // 4)
    assert out["photometric_confidence"].shape == (B, H // 4, W // 4)
    assert bool(jnp.isfinite(out["depth"]).all())
    assert bool(jnp.isfinite(out["photometric_confidence"]).all())
    print("KERNEL_OK")
</pallas_src>

<mosaic_0001>
module attributes {stable_mosaic.version = 11 : i64} {
  func.func @_mm_kernel(%arg0: i32, %arg1: memref<8x32xbf16, #tpu.memory_space<vmem>>, %arg2: memref<32x512xbf16, #tpu.memory_space<vmem>>, %arg3: memref<8x1xf32, #tpu.memory_space<vmem>>, %arg4: memref<8x512xf32, #tpu.memory_space<vmem>>) attributes {dimension_semantics = [#tpu.dimension_semantics<parallel>], iteration_bounds = array<i64: 4>, scalar_prefetch = 0 : i64, scratch_operands = 0 : i64, tpu.core_type = #tpu.core_type<tc>, window_params = [{pipeline_mode = #tpu.pipeline_mode<synchronous>, transform_indices = @transform_0, window_bounds = array<i64: 8, 32>}, {transform_indices = @transform_1, window_bounds = array<i64: 32, 512>}, {pipeline_mode = #tpu.pipeline_mode<synchronous>, transform_indices = @transform_2, window_bounds = array<i64: 8, 1>}, {transform_indices = @transform_3, window_bounds = array<i64: 8, 512>}]} {
    %c0 = arith.constant 0 : index
    %c0_0 = arith.constant 0 : index
    %0 = vector.load %arg1[%c0, %c0_0] : memref<8x32xbf16, #tpu.memory_space<vmem>>, vector<8x32xbf16>
    %c0_1 = arith.constant 0 : index
    %c0_2 = arith.constant 0 : index
    %1 = vector.load %arg2[%c0_1, %c0_2] : memref<32x512xbf16, #tpu.memory_space<vmem>>, vector<32x512xbf16>
    %cst = arith.constant dense<0.000000e+00> : vector<8x512xf32>
    %2 = tpu.matmul %0, %1, %cst {dimension_numbers = #tpu.dot_dimension_numbers<[1], [0], [0], [1], [0, 0, 1, 1], [], []>} : vector<8x32xbf16>, vector<32x512xbf16>, vector<8x512xf32> -> vector<8x512xf32>
    %c0_3 = arith.constant 0 : index
    %c0_4 = arith.constant 0 : index
    %3 = vector.load %arg3[%c0_3, %c0_4] : memref<8x1xf32, #tpu.memory_space<vmem>>, vector<8x1xf32>
    %4 = vector.broadcast %3 : vector<8x1xf32> to vector<8x512xf32>
    %5 = arith.addf %2, %4 : vector<8x512xf32>
    %cst_5 = arith.constant 0.000000e+00 : f32
    %6 = vector.broadcast %cst_5 : f32 to vector<8x512xf32>
    %7 = arith.maximumf %5, %6 : vector<8x512xf32>
    %c0_6 = arith.constant 0 : index
    %c0_7 = arith.constant 0 : index
    %8 = vector.load %arg4[%c0_6, %c0_7] : memref<8x512xf32, #tpu.memory_space<vmem>>, vector<8x512xf32>
    tpu.vector_store %arg4[%c0_6, %c0_7], %7 {strides = array<i32>} : memref<8x512xf32, #tpu.memory_space<vmem>>, vector<8x512xf32>,
    return
  }
  func.func @transform_0(%arg0: i32) -> (i32, i32) {
    %c0_i32 = arith.constant 0 : i32
    %c0_i32_0 = arith.constant 0 : i32
    %c0_i32_1 = arith.constant 0 : i32
    return %c0_i32, %c0_i32_0 : i32, i32
  }
  func.func @transform_1(%arg0: i32) -> (i32, i32) {
    %c0_i32 = arith.constant 0 : i32
    %c0_i32_0 = arith.constant 0 : i32
    return %c0_i32, %arg0 : i32, i32
  }
  func.func @transform_2(%arg0: i32) -> (i32, i32) {
    %c0_i32 = arith.constant 0 : i32
    %c0_i32_0 = arith.constant 0 : i32
    %c0_i32_1 = arith.constant 0 : i32
    return %c0_i32, %c0_i32_0 : i32, i32
  }
  func.func @transform_3(%arg0: i32) -> (i32, i32) {
    %c0_i32 = arith.constant 0 : i32
    %c0_i32_0 = arith.constant 0 : i32
    return %c0_i32, %arg0 : i32, i32
  }
}

module attributes {stable_mosaic.version = 11 : i64} {
  func.func @_mm_kernel(%arg0: i32, %arg1: memref<8x80xbf16, #tpu.memory_space<vmem>>, %arg2: memref<80x512xbf16, #tpu.memory_space<vmem>>, %arg3: memref<8x1xf32, #tpu.memory_space<vmem>>, %arg4: memref<8x512xf32, #tpu.memory_space<vmem>>) attributes {dimension_semantics = [#tpu.dimension_semantics<parallel>], iteration_bounds = array<i64: 4>, scalar_prefetch = 0 : i64, scratch_operands = 0 : i64, tpu.core_type = #tpu.core_type<tc>, window_params = [{pipeline_mode = #tpu.pipeline_mode<synchronous>, transform_indices = @transform_0, window_bounds = array<i64: 8, 80>}, {transform_indices = @transform_1, window_bounds = array<i64: 80, 512>}, {pipeline_mode = #tpu.pipeline_mode<synchronous>, transform_indices = @transform_2, window_bounds = array<i64: 8, 1>}, {transform_indices = @transform_3, window_bounds = array<i64: 8, 512>}]} {
    %c0 = arith.constant 0 : index
    %c0_0 = arith.constant 0 : index
    %0 = vector.load %arg1[%c0, %c0_0] : memref<8x80xbf16, #tpu.memory_space<vmem>>, vector<8x80xbf16>
    %c0_1 = arith.constant 0 : index
    %c0_2 = arith.constant 0 : index
    %1 = vector.load %arg2[%c0_1, %c0_2] : memref<80x512xbf16, #tpu.memory_space<vmem>>, vector<80x512xbf16>
    %cst = arith.constant dense<0.000000e+00> : vector<8x512xf32>
    %2 = tpu.matmul %0, %1, %cst {dimension_numbers = #tpu.dot_dimension_numbers<[1], [0], [0], [1], [0, 0, 1, 1], [], []>} : vector<8x80xbf16>, vector<80x512xbf16>, vector<8x512xf32> -> vector<8x512xf32>
    %c0_3 = arith.constant 0 : index
    %c0_4 = arith.constant 0 : index
    %3 = vector.load %arg3[%c0_3, %c0_4] : memref<8x1xf32, #tpu.memory_space<vmem>>, vector<8x1xf32>
    %4 = vector.broadcast %3 : vector<8x1xf32> to vector<8x512xf32>
    %5 = arith.addf %2, %4 : vector<8x512xf32>
    %cst_5 = arith.constant 0.000000e+00 : f32
    %6 = vector.broadcast %cst_5 : f32 to vector<8x512xf32>
    %7 = arith.maximumf %5, %6 : vector<8x512xf32>
    %c0_6 = arith.constant 0 : index
    %c0_7 = arith.constant 0 : index
    %8 = vector.load %arg4[%c0_6, %c0_7] : memref<8x512xf32, #tpu.memory_space<vmem>>, vector<8x512xf32>
    tpu.vector_store %arg4[%c0_6, %c0_7], %7 {strides = array<i32>} : memref<8x512xf32, #tpu.memory_space<vmem>>, vector<8x512xf32>,
    return
  }
  func.func @transform_0(%arg0: i32) -> (i32, i32) {
    %c0_i32 = arith.constant 0 : i32
    %c0_i32_0 = arith.constant 0 : i32
    %c0_i32_1 = arith.constant 0 : i32
    return %c0_i32, %c0_i32_0 : i32, i32
  }
  func.func @transform_1(%arg0: i32) -> (i32, i32) {
    %c0_i32 = arith.constant 0 : i32
    %c0_i32_0 = arith.constant 0 : i32
    return %c0_i32, %arg0 : i32, i32
  }
  func.func @transform_2(%arg0: i32) -> (i32, i32) {
    %c0_i32 = arith.constant 0 : i32
    %c0_i32_0 = arith.constant 0 : i32
    %c0_i32_1 = arith.constant 0 : i32
    return %c0_i32, %c0_i32_0 : i32, i32
  }
  func.func @transform_3(%arg0: i32) -> (i32, i32) {
    %c0_i32 = arith.constant 0 : i32
    %c0_i32_0 = arith.constant 0 : i32
    return %c0_i32, %arg0 : i32, i32
  }
}

module attributes {stable_mosaic.version = 11 : i64} {
  func.func @_mm_kernel(%arg0: i32, %arg1: memref<16x208xbf16, #tpu.memory_space<vmem>>, %arg2: memref<208x512xbf16, #tpu.memory_space<vmem>>, %arg3: memref<16x1xf32, #tpu.memory_space<vmem>>, %arg4: memref<16x512xf32, #tpu.memory_space<vmem>>) attributes {dimension_semantics = [#tpu.dimension_semantics<parallel>], iteration_bounds = array<i64: 1>, scalar_prefetch = 0 : i64, scratch_operands = 0 : i64, tpu.core_type = #tpu.core_type<tc>, window_params = [{pipeline_mode = #tpu.pipeline_mode<synchronous>, transform_indices = @transform_0, window_bounds = array<i64: 16, 208>}, {transform_indices = @transform_1, window_bounds = array<i64: 208, 512>}, {pipeline_mode = #tpu.pipeline_mode<synchronous>, transform_indices = @transform_2, window_bounds = array<i64: 16, 1>}, {transform_indices = @transform_3, window_bounds = array<i64: 16, 512>}]} {
    %c0 = arith.constant 0 : index
    %c0_0 = arith.constant 0 : index
    %0 = vector.load %arg1[%c0, %c0_0] : memref<16x208xbf16, #tpu.memory_space<vmem>>, vector<16x208xbf16>
    %c0_1 = arith.constant 0 : index
    %c0_2 = arith.constant 0 : index
    %1 = vector.load %arg2[%c0_1, %c0_2] : memref<208x512xbf16, #tpu.memory_space<vmem>>, vector<208x512xbf16>
    %cst = arith.constant dense<0.000000e+00> : vector<16x512xf32>
    %2 = tpu.matmul %0, %1, %cst {dimension_numbers = #tpu.dot_dimension_numbers<[1], [0], [0], [1], [0, 0, 1, 1], [], []>} : vector<16x208xbf16>, vector<208x512xbf16>, vector<16x512xf32> -> vector<16x512xf32>
    %c0_3 = arith.constant 0 : index
    %c0_4 = arith.constant 0 : index
    %3 = vector.load %arg3[%c0_3, %c0_4] : memref<16x1xf32, #tpu.memory_space<vmem>>, vector<16x1xf32>
    %4 = vector.broadcast %3 : vector<16x1xf32> to vector<16x512xf32>
    %5 = arith.addf %2, %4 : vector<16x512xf32>
    %cst_5 = arith.constant 0.000000e+00 : f32
    %6 = vector.broadcast %cst_5 : f32 to vector<16x512xf32>
    %7 = arith.maximumf %5, %6 : vector<16x512xf32>
    %c0_6 = arith.constant 0 : index
    %c0_7 = arith.constant 0 : index
    %8 = vector.load %arg4[%c0_6, %c0_7] : memref<16x512xf32, #tpu.memory_space<vmem>>, vector<16x512xf32>
    tpu.vector_store %arg4[%c0_6, %c0_7], %7 {strides = array<i32>} : memref<16x512xf32, #tpu.memory_space<vmem>>, vector<16x512xf32>,
    return
  }
  func.func @transform_0(%arg0: i32) -> (i32, i32) {
    %c0_i32 = arith.constant 0 : i32
    %c0_i32_0 = arith.constant 0 : i32
    %c0_i32_1 = arith.constant 0 : i32
    return %c0_i32, %c0_i32_0 : i32, i32
  }
  func.func @transform_1(%arg0: i32) -> (i32, i32) {
    %c0_i32 = arith.constant 0 : i32
    %c0_i32_0 = arith.constant 0 : i32
    return %c0_i32, %arg0 : i32, i32
  }
  func.func @transform_2(%arg0: i32) -> (i32, i32) {
    %c0_i32 = arith.constant 0 : i32
    %c0_i32_0 = arith.constant 0 : i32
    %c0_i32_1 = arith.constant 0 : i32
    return %c0_i32, %c0_i32_0 : i32, i32
  }
  func.func @transform_3(%arg0: i32) -> (i32, i32) {
    %c0_i32 = arith.constant 0 : i32
    %c0_i32_0 = arith.constant 0 : i32
    return %c0_i32, %arg0 : i32, i32
  }
}

module attributes {stable_mosaic.version = 11 : i64} {
  func.func @_mm_kernel(%arg0: i32, %arg1: memref<16x144xbf16, #tpu.memory_space<vmem>>, %arg2: memref<144x512xbf16, #tpu.memory_space<vmem>>, %arg3: memref<16x1xf32, #tpu.memory_space<vmem>>, %arg4: memref<16x512xf32, #tpu.memory_space<vmem>>) attributes {dimension_semantics = [#tpu.dimension_semantics<parallel>], iteration_bounds = array<i64: 1>, scalar_prefetch = 0 : i64, scratch_operands = 0 : i64, tpu.core_type = #tpu.core_type<tc>, window_params = [{pipeline_mode = #tpu.pipeline_mode<synchronous>, transform_indices = @transform_0, window_bounds = array<i64: 16, 144>}, {transform_indices = @transform_1, window_bounds = array<i64: 144, 512>}, {pipeline_mode = #tpu.pipeline_mode<synchronous>, transform_indices = @transform_2, window_bounds = array<i64: 16, 1>}, {transform_indices = @transform_3, window_bounds = array<i64: 16, 512>}]} {
    %c0 = arith.constant 0 : index
    %c0_0 = arith.constant 0 : index
    %0 = vector.load %arg1[%c0, %c0_0] : memref<16x144xbf16, #tpu.memory_space<vmem>>, vector<16x144xbf16>
    %c0_1 = arith.constant 0 : index
    %c0_2 = arith.constant 0 : index
    %1 = vector.load %arg2[%c0_1, %c0_2] : memref<144x512xbf16, #tpu.memory_space<vmem>>, vector<144x512xbf16>
    %cst = arith.constant dense<0.000000e+00> : vector<16x512xf32>
    %2 = tpu.matmul %0, %1, %cst {dimension_numbers = #tpu.dot_dimension_numbers<[1], [0], [0], [1], [0, 0, 1, 1], [], []>} : vector<16x144xbf16>, vector<144x512xbf16>, vector<16x512xf32> -> vector<16x512xf32>
    %c0_3 = arith.constant 0 : index
    %c0_4 = arith.constant 0 : index
    %3 = vector.load %arg3[%c0_3, %c0_4] : memref<16x1xf32, #tpu.memory_space<vmem>>, vector<16x1xf32>
    %4 = vector.broadcast %3 : vector<16x1xf32> to vector<16x512xf32>
    %5 = arith.addf %2, %4 : vector<16x512xf32>
    %cst_5 = arith.constant 0.000000e+00 : f32
    %6 = vector.broadcast %cst_5 : f32 to vector<16x512xf32>
    %7 = arith.maximumf %5, %6 : vector<16x512xf32>
    %c0_6 = arith.constant 0 : index
    %c0_7 = arith.constant 0 : index
    %8 = vector.load %arg4[%c0_6, %c0_7] : memref<16x512xf32, #tpu.memory_space<vmem>>, vector<16x512xf32>
    tpu.vector_store %arg4[%c0_6, %c0_7], %7 {strides = array<i32>} : memref<16x512xf32, #tpu.memory_space<vmem>>, vector<16x512xf32>,
    return
  }
  func.func @transform_0(%arg0: i32) -> (i32, i32) {
    %c0_i32 = arith.constant 0 : i32
    %c0_i32_0 = arith.constant 0 : i32
    %c0_i32_1 = arith.constant 0 : i32
    return %c0_i32, %c0_i32_0 : i32, i32
  }
  func.func @transform_1(%arg0: i32) -> (i32, i32) {
    %c0_i32 = arith.constant 0 : i32
    %c0_i32_0 = arith.constant 0 : i32
    return %c0_i32, %arg0 : i32, i32
  }
  func.func @transform_2(%arg0: i32) -> (i32, i32) {
    %c0_i32 = arith.constant 0 : i32
    %c0_i32_0 = arith.constant 0 : i32
    %c0_i32_1 = arith.constant 0 : i32
    return %c0_i32, %c0_i32_0 : i32, i32
  }
  func.func @transform_3(%arg0: i32) -> (i32, i32) {
    %c0_i32 = arith.constant 0 : i32
    %c0_i32_0 = arith.constant 0 : i32
    return %c0_i32, %arg0 : i32, i32
  }
}

module attributes {stable_mosaic.version = 11 : i64} {
  func.func @_mm_kernel(%arg0: i32, %arg1: memref<32x400xbf16, #tpu.memory_space<vmem>>, %arg2: memref<400x128xbf16, #tpu.memory_space<vmem>>, %arg3: memref<32x1xf32, #tpu.memory_space<vmem>>, %arg4: memref<32x128xf32, #tpu.memory_space<vmem>>) attributes {dimension_semantics = [#tpu.dimension_semantics<parallel>], iteration_bounds = array<i64: 1>, scalar_prefetch = 0 : i64, scratch_operands = 0 : i64, tpu.core_type = #tpu.core_type<tc>, window_params = [{pipeline_mode = #tpu.pipeline_mode<synchronous>, transform_indices = @transform_0, window_bounds = array<i64: 32, 400>}, {transform_indices = @transform_1, window_bounds = array<i64: 400, 128>}, {pipeline_mode = #tpu.pipeline_mode<synchronous>, transform_indices = @transform_2, window_bounds = array<i64: 32, 1>}, {transform_indices = @transform_3, window_bounds = array<i64: 32, 128>}]} {
    %c0 = arith.constant 0 : index
    %c0_0 = arith.constant 0 : index
    %0 = vector.load %arg1[%c0, %c0_0] : memref<32x400xbf16, #tpu.memory_space<vmem>>, vector<32x400xbf16>
    %c0_1 = arith.constant 0 : index
    %c0_2 = arith.constant 0 : index
    %1 = vector.load %arg2[%c0_1, %c0_2] : memref<400x128xbf16, #tpu.memory_space<vmem>>, vector<400x128xbf16>
    %cst = arith.constant dense<0.000000e+00> : vector<32x128xf32>
    %2 = tpu.matmul %0, %1, %cst {dimension_numbers = #tpu.dot_dimension_numbers<[1], [0], [0], [1], [0, 0, 1, 1], [], []>} : vector<32x400xbf16>, vector<400x128xbf16>, vector<32x128xf32> -> vector<32x128xf32>
    %c0_3 = arith.constant 0 : index
    %c0_4 = arith.constant 0 : index
    %3 = vector.load %arg3[%c0_3, %c0_4] : memref<32x1xf32, #tpu.memory_space<vmem>>, vector<32x1xf32>
    %4 = vector.broadcast %3 : vector<32x1xf32> to vector<32x128xf32>
    %5 = arith.addf %2, %4 : vector<32x128xf32>
    %cst_5 = arith.constant 0.000000e+00 : f32
    %6 = vector.broadcast %cst_5 : f32 to vector<32x128xf32>
    %7 = arith.maximumf %5, %6 : vector<32x128xf32>
    %c0_6 = arith.constant 0 : index
    %c0_7 = arith.constant 0 : index
    %8 = vector.load %arg4[%c0_6, %c0_7] : memref<32x128xf32, #tpu.memory_space<vmem>>, vector<32x128xf32>
    tpu.vector_store %arg4[%c0_6, %c0_7], %7 {strides = array<i32>} : memref<32x128xf32, #tpu.memory_space<vmem>>, vector<32x128xf32>,
    return
  }
  func.func @transform_0(%arg0: i32) -> (i32, i32) {
    %c0_i32 = arith.constant 0 : i32
    %c0_i32_0 = arith.constant 0 : i32
    %c0_i32_1 = arith.constant 0 : i32
    return %c0_i32, %c0_i32_0 : i32, i32
  }
  func.func @transform_1(%arg0: i32) -> (i32, i32) {
    %c0_i32 = arith.constant 0 : i32
    %c0_i32_0 = arith.constant 0 : i32
    return %c0_i32, %arg0 : i32, i32
  }
  func.func @transform_2(%arg0: i32) -> (i32, i32) {
    %c0_i32 = arith.constant 0 : i32
    %c0_i32_0 = arith.constant 0 : i32
    %c0_i32_1 = arith.constant 0 : i32
    return %c0_i32, %c0_i32_0 : i32, i32
  }
  func.func @transform_3(%arg0: i32) -> (i32, i32) {
    %c0_i32 = arith.constant 0 : i32
    %c0_i32_0 = arith.constant 0 : i32
    return %c0_i32, %arg0 : i32, i32
  }
}

module attributes {stable_mosaic.version = 11 : i64} {
  func.func @_mm_kernel(%arg0: i32, %arg1: memref<32x288xbf16, #tpu.memory_space<vmem>>, %arg2: memref<288x128xbf16, #tpu.memory_space<vmem>>, %arg3: memref<32x1xf32, #tpu.memory_space<vmem>>, %arg4: memref<32x128xf32, #tpu.memory_space<vmem>>) attributes {dimension_semantics = [#tpu.dimension_semantics<parallel>], iteration_bounds = array<i64: 1>, scalar_prefetch = 0 : i64, scratch_operands = 0 : i64, tpu.core_type = #tpu.core_type<tc>, window_params = [{pipeline_mode = #tpu.pipeline_mode<synchronous>, transform_indices = @transform_0, window_bounds = array<i64: 32, 288>}, {transform_indices = @transform_1, window_bounds = array<i64: 288, 128>}, {pipeline_mode = #tpu.pipeline_mode<synchronous>, transform_indices = @transform_2, window_bounds = array<i64: 32, 1>}, {transform_indices = @transform_3, window_bounds = array<i64: 32, 128>}]} {
    %c0 = arith.constant 0 : index
    %c0_0 = arith.constant 0 : index
    %0 = vector.load %arg1[%c0, %c0_0] : memref<32x288xbf16, #tpu.memory_space<vmem>>, vector<32x288xbf16>
    %c0_1 = arith.constant 0 : index
    %c0_2 = arith.constant 0 : index
    %1 = vector.load %arg2[%c0_1, %c0_2] : memref<288x128xbf16, #tpu.memory_space<vmem>>, vector<288x128xbf16>
    %cst = arith.constant dense<0.000000e+00> : vector<32x128xf32>
    %2 = tpu.matmul %0, %1, %cst {dimension_numbers = #tpu.dot_dimension_numbers<[1], [0], [0], [1], [0, 0, 1, 1], [], []>} : vector<32x288xbf16>, vector<288x128xbf16>, vector<32x128xf32> -> vector<32x128xf32>
    %c0_3 = arith.constant 0 : index
    %c0_4 = arith.constant 0 : index
    %3 = vector.load %arg3[%c0_3, %c0_4] : memref<32x1xf32, #tpu.memory_space<vmem>>, vector<32x1xf32>
    %4 = vector.broadcast %3 : vector<32x1xf32> to vector<32x128xf32>
    %5 = arith.addf %2, %4 : vector<32x128xf32>
    %cst_5 = arith.constant 0.000000e+00 : f32
    %6 = vector.broadcast %cst_5 : f32 to vector<32x128xf32>
    %7 = arith.maximumf %5, %6 : vector<32x128xf32>
    %c0_6 = arith.constant 0 : index
    %c0_7 = arith.constant 0 : index
    %8 = vector.load %arg4[%c0_6, %c0_7] : memref<32x128xf32, #tpu.memory_space<vmem>>, vector<32x128xf32>
    tpu.vector_store %arg4[%c0_6, %c0_7], %7 {strides = array<i32>} : memref<32x128xf32, #tpu.memory_space<vmem>>, vector<32x128xf32>,
    return
  }
  func.func @transform_0(%arg0: i32) -> (i32, i32) {
    %c0_i32 = arith.constant 0 : i32
    %c0_i32_0 = arith.constant 0 : i32
    %c0_i32_1 = arith.constant 0 : i32
    return %c0_i32, %c0_i32_0 : i32, i32
  }
  func.func @transform_1(%arg0: i32) -> (i32, i32) {
    %c0_i32 = arith.constant 0 : i32
    %c0_i32_0 = arith.constant 0 : i32
    return %c0_i32, %arg0 : i32, i32
  }
  func.func @transform_2(%arg0: i32) -> (i32, i32) {
    %c0_i32 = arith.constant 0 : i32
    %c0_i32_0 = arith.constant 0 : i32
    %c0_i32_1 = arith.constant 0 : i32
    return %c0_i32, %c0_i32_0 : i32, i32
  }
  func.func @transform_3(%arg0: i32) -> (i32, i32) {
    %c0_i32 = arith.constant 0 : i32
    %c0_i32_0 = arith.constant 0 : i32
    return %c0_i32, %arg0 : i32, i32
  }
}

module attributes {stable_mosaic.version = 11 : i64} {
  func.func @_mm_kernel(%arg0: i32, %arg1: memref<32x288xbf16, #tpu.memory_space<vmem>>, %arg2: memref<288x128xbf16, #tpu.memory_space<vmem>>, %arg3: memref<32x1xf32, #tpu.memory_space<vmem>>, %arg4: memref<32x128xf32, #tpu.memory_space<vmem>>) attributes {dimension_semantics = [#tpu.dimension_semantics<parallel>], iteration_bounds = array<i64: 1>, scalar_prefetch = 0 : i64, scratch_operands = 0 : i64, tpu.core_type = #tpu.core_type<tc>, window_params = [{pipeline_mode = #tpu.pipeline_mode<synchronous>, transform_indices = @transform_0, window_bounds = array<i64: 32, 288>}, {transform_indices = @transform_1, window_bounds = array<i64: 288, 128>}, {pipeline_mode = #tpu.pipeline_mode<synchronous>, transform_indices = @transform_2, window_bounds = array<i64: 32, 1>}, {transform_indices = @transform_3, window_bounds = array<i64: 32, 128>}]} {
    %c0 = arith.constant 0 : index
    %c0_0 = arith.constant 0 : index
    %0 = vector.load %arg1[%c0, %c0_0] : memref<32x288xbf16, #tpu.memory_space<vmem>>, vector<32x288xbf16>
    %c0_1 = arith.constant 0 : index
    %c0_2 = arith.constant 0 : index
    %1 = vector.load %arg2[%c0_1, %c0_2] : memref<288x128xbf16, #tpu.memory_space<vmem>>, vector<288x128xbf16>
    %cst = arith.constant dense<0.000000e+00> : vector<32x128xf32>
    %2 = tpu.matmul %0, %1, %cst {dimension_numbers = #tpu.dot_dimension_numbers<[1], [0], [0], [1], [0, 0, 1, 1], [], []>} : vector<32x288xbf16>, vector<288x128xbf16>, vector<32x128xf32> -> vector<32x128xf32>
    %c0_3 = arith.constant 0 : index
    %c0_4 = arith.constant 0 : index
    %3 = vector.load %arg3[%c0_3, %c0_4] : memref<32x1xf32, #tpu.memory_space<vmem>>, vector<32x1xf32>
    %4 = vector.broadcast %3 : vector<32x1xf32> to vector<32x128xf32>
    %5 = arith.addf %2, %4 : vector<32x128xf32>
    %c0_5 = arith.constant 0 : index
    %c0_6 = arith.constant 0 : index
    %6 = vector.load %arg4[%c0_5, %c0_6] : memref<32x128xf32, #tpu.memory_space<vmem>>, vector<32x128xf32>
    tpu.vector_store %arg4[%c0_5, %c0_6], %5 {strides = array<i32>} : memref<32x128xf32, #tpu.memory_space<vmem>>, vector<32x128xf32>,
    return
  }
  func.func @transform_0(%arg0: i32) -> (i32, i32) {
    %c0_i32 = arith.constant 0 : i32
    %c0_i32_0 = arith.constant 0 : i32
    %c0_i32_1 = arith.constant 0 : i32
    return %c0_i32, %c0_i32_0 : i32, i32
  }
  func.func @transform_1(%arg0: i32) -> (i32, i32) {
    %c0_i32 = arith.constant 0 : i32
    %c0_i32_0 = arith.constant 0 : i32
    return %c0_i32, %arg0 : i32, i32
  }
  func.func @transform_2(%arg0: i32) -> (i32, i32) {
    %c0_i32 = arith.constant 0 : i32
    %c0_i32_0 = arith.constant 0 : i32
    %c0_i32_1 = arith.constant 0 : i32
    return %c0_i32, %c0_i32_0 : i32, i32
  }
  func.func @transform_3(%arg0: i32) -> (i32, i32) {
    %c0_i32 = arith.constant 0 : i32
    %c0_i32_0 = arith.constant 0 : i32
    return %c0_i32, %arg0 : i32, i32
  }
}

module attributes {stable_mosaic.version = 11 : i64} {
  func.func @_gwc_kernel(%arg0: i32, %arg1: i32, %arg2: i32, %arg3: memref<1x1x4x64xf32, #tpu.memory_space<vmem>>, %arg4: memref<1x1x4x8x64xf32, #tpu.memory_space<vmem>>, %arg5: memref<1x1x8x64xf32, #tpu.memory_space<vmem>>) attributes {dimension_semantics = [#tpu.dimension_semantics<parallel>, #tpu.dimension_semantics<parallel>, #tpu.dimension_semantics<parallel>], iteration_bounds = array<i64: 2, 8, 1>, scalar_prefetch = 0 : i64, scratch_operands = 0 : i64, tpu.core_type = #tpu.core_type<tc>, window_params = [{transform_indices = @transform_0, window_bounds = array<i64: 1, 1, 4, 64>}, {transform_indices = @transform_1, window_bounds = array<i64: 1, 1, 4, 8, 64>}, {transform_indices = @transform_2, window_bounds = array<i64: 1, 1, 8, 64>}]} {
    %c0 = arith.constant 0 : index
    %c0_0 = arith.constant 0 : index
    %c0_1 = arith.constant 0 : index
    %c0_2 = arith.constant 0 : index
    %0 = vector.load %arg3[%c0, %c0_0, %c0_1, %c0_2] : memref<1x1x4x64xf32, #tpu.memory_space<vmem>>, vector<1x1x4x64xf32>
    %1 = vector.shape_cast %0 : vector<1x1x4x64xf32> to vector<4x64xf32>
    %c0_3 = arith.constant 0 : index
    %c0_4 = arith.constant 0 : index
    %c0_5 = arith.constant 0 : index
    %c0_6 = arith.constant 0 : index
    %c0_7 = arith.constant 0 : index
    %2 = vector.load %arg4[%c0_3, %c0_4, %c0_5, %c0_6, %c0_7] : memref<1x1x4x8x64xf32, #tpu.memory_space<vmem>>, vector<1x1x4x8x64xf32>
    %3 = vector.shape_cast %2 : vector<1x1x4x8x64xf32> to vector<4x8x64xf32>
    %4 = vector.shape_cast %1 : vector<4x64xf32> to vector<4x1x64xf32>
    %5 = vector.broadcast %4 : vector<4x1x64xf32> to vector<4x8x64xf32>
    %6 = arith.mulf %3, %5 : vector<4x8x64xf32>
    %cst = arith.constant dense<0.000000e+00> : vector<8x64xf32>
    %7 = vector.multi_reduction <add>, %6, %cst [0] : vector<4x8x64xf32> to vector<8x64xf32>
    %cst_8 = arith.constant 0.0833333358 : f32
    %8 = vector.broadcast %cst_8 : f32 to vector<8x64xf32>
    %9 = arith.mulf %7, %8 : vector<8x64xf32>
    %c0_9 = arith.constant 0 : index
    %c0_10 = arith.constant 0 : index
    %c0_11 = arith.constant 0 : index
    %c0_12 = arith.constant 0 : index
    %10 = vector.load %arg5[%c0_9, %c0_10, %c0_11, %c0_12] : memref<1x1x8x64xf32, #tpu.memory_space<vmem>>, vector<1x1x8x64xf32>
    %11 = vector.shape_cast %10 : vector<1x1x8x64xf32> to vector<8x64xf32>
    %12 = vector.shape_cast %9 : vector<8x64xf32> to vector<1x1x8x64xf32>
    tpu.vector_store %arg5[%c0_9, %c0_10, %c0_11, %c0_12], %12 {strides = array<i32>} : memref<1x1x8x64xf32, #tpu.memory_space<vmem>>, vector<1x1x8x64xf32>,
    return
  }
  func.func @transform_0(%arg0: i32, %arg1: i32, %arg2: i32) -> (i32, i32, i32, i32) {
    %c0_i32 = arith.constant 0 : i32
    %c0_i32_0 = arith.constant 0 : i32
    return %arg0, %arg1, %c0_i32, %arg2 : i32, i32, i32, i32
  }
  func.func @transform_1(%arg0: i32, %arg1: i32, %arg2: i32) -> (i32, i32, i32, i32, i32) {
    %c0_i32 = arith.constant 0 : i32
    %c0_i32_0 = arith.constant 0 : i32
    %c0_i32_1 = arith.constant 0 : i32
    return %arg0, %arg1, %c0_i32, %c0_i32_0, %arg2 : i32, i32, i32, i32, i32
  }
  func.func @transform_2(%arg0: i32, %arg1: i32, %arg2: i32) -> (i32, i32, i32, i32) {
    %c0_i32 = arith.constant 0 : i32
    %c0_i32_0 = arith.constant 0 : i32
    return %arg0, %arg1, %c0_i32, %arg2 : i32, i32, i32, i32
  }
}

module attributes {stable_mosaic.version = 11 : i64} {
  func.func @_mm_kernel(%arg0: i32, %arg1: memref<8x80xbf16, #tpu.memory_space<vmem>>, %arg2: memref<80x512xbf16, #tpu.memory_space<vmem>>, %arg3: memref<8x1xf32, #tpu.memory_space<vmem>>, %arg4: memref<8x512xf32, #tpu.memory_space<vmem>>) attributes {dimension_semantics = [#tpu.dimension_semantics<parallel>], iteration_bounds = array<i64: 2>, scalar_prefetch = 0 : i64, scratch_operands = 0 : i64, tpu.core_type = #tpu.core_type<tc>, window_params = [{pipeline_mode = #tpu.pipeline_mode<synchronous>, transform_indices = @transform_0, window_bounds = array<i64: 8, 80>}, {transform_indices = @transform_1, window_bounds = array<i64: 80, 512>}, {pipeline_mode = #tpu.pipeline_mode<synchronous>, transform_indices = @transform_2, window_bounds = array<i64: 8, 1>}, {transform_indices = @transform_3, window_bounds = array<i64: 8, 512>}]} {
    %c0 = arith.constant 0 : index
    %c0_0 = arith.constant 0 : index
    %0 = vector.load %arg1[%c0, %c0_0] : memref<8x80xbf16, #tpu.memory_space<vmem>>, vector<8x80xbf16>
    %c0_1 = arith.constant 0 : index
    %c0_2 = arith.constant 0 : index
    %1 = vector.load %arg2[%c0_1, %c0_2] : memref<80x512xbf16, #tpu.memory_space<vmem>>, vector<80x512xbf16>
    %cst = arith.constant dense<0.000000e+00> : vector<8x512xf32>
    %2 = tpu.matmul %0, %1, %cst {dimension_numbers = #tpu.dot_dimension_numbers<[1], [0], [0], [1], [0, 0, 1, 1], [], []>} : vector<8x80xbf16>, vector<80x512xbf16>, vector<8x512xf32> -> vector<8x512xf32>
    %c0_3 = arith.constant 0 : index
    %c0_4 = arith.constant 0 : index
    %3 = vector.load %arg3[%c0_3, %c0_4] : memref<8x1xf32, #tpu.memory_space<vmem>>, vector<8x1xf32>
    %4 = vector.broadcast %3 : vector<8x1xf32> to vector<8x512xf32>
    %5 = arith.addf %2, %4 : vector<8x512xf32>
    %cst_5 = arith.constant 0.000000e+00 : f32
    %6 = vector.broadcast %cst_5 : f32 to vector<8x512xf32>
    %7 = arith.maximumf %5, %6 : vector<8x512xf32>
    %c0_6 = arith.constant 0 : index
    %c0_7 = arith.constant 0 : index
    %8 = vector.load %arg4[%c0_6, %c0_7] : memref<8x512xf32, #tpu.memory_space<vmem>>, vector<8x512xf32>
    tpu.vector_store %arg4[%c0_6, %c0_7], %7 {strides = array<i32>} : memref<8x512xf32, #tpu.memory_space<vmem>>, vector<8x512xf32>,
    return
  }
  func.func @transform_0(%arg0: i32) -> (i32, i32) {
    %c0_i32 = arith.constant 0 : i32
    %c0_i32_0 = arith.constant 0 : i32
    %c0_i32_1 = arith.constant 0 : i32
    return %c0_i32, %c0_i32_0 : i32, i32
  }
  func.func @transform_1(%arg0: i32) -> (i32, i32) {
    %c0_i32 = arith.constant 0 : i32
    %c0_i32_0 = arith.constant 0 : i32
    return %c0_i32, %arg0 : i32, i32
  }
  func.func @transform_2(%arg0: i32) -> (i32, i32) {
    %c0_i32 = arith.constant 0 : i32
    %c0_i32_0 = arith.constant 0 : i32
    %c0_i32_1 = arith.constant 0 : i32
    return %c0_i32, %c0_i32_0 : i32, i32
  }
  func.func @transform_3(%arg0: i32) -> (i32, i32) {
    %c0_i32 = arith.constant 0 : i32
    %c0_i32_0 = arith.constant 0 : i32
    return %c0_i32, %arg0 : i32, i32
  }
}

module attributes {stable_mosaic.version = 11 : i64} {
  func.func @_mm_kernel(%arg0: i32, %arg1: memref<16x80xbf16, #tpu.memory_space<vmem>>, %arg2: memref<80x256xbf16, #tpu.memory_space<vmem>>, %arg3: memref<16x1xf32, #tpu.memory_space<vmem>>, %arg4: memref<16x256xf32, #tpu.memory_space<vmem>>) attributes {dimension_semantics = [#tpu.dimension_semantics<parallel>], iteration_bounds = array<i64: 1>, scalar_prefetch = 0 : i64, scratch_operands = 0 : i64, tpu.core_type = #tpu.core_type<tc>, window_params = [{pipeline_mode = #tpu.pipeline_mode<synchronous>, transform_indices = @transform_0, window_bounds = array<i64: 16, 80>}, {transform_indices = @transform_1, window_bounds = array<i64: 80, 256>}, {pipeline_mode = #tpu.pipeline_mode<synchronous>, transform_indices = @transform_2, window_bounds = array<i64: 16, 1>}, {transform_indices = @transform_3, window_bounds = array<i64: 16, 256>}]} {
    %c0 = arith.constant 0 : index
    %c0_0 = arith.constant 0 : index
    %0 = vector.load %arg1[%c0, %c0_0] : memref<16x80xbf16, #tpu.memory_space<vmem>>, vector<16x80xbf16>
    %c0_1 = arith.constant 0 : index
    %c0_2 = arith.constant 0 : index
    %1 = vector.load %arg2[%c0_1, %c0_2] : memref<80x256xbf16, #tpu.memory_space<vmem>>, vector<80x256xbf16>
    %cst = arith.constant dense<0.000000e+00> : vector<16x256xf32>
    %2 = tpu.matmul %0, %1, %cst {dimension_numbers = #tpu.dot_dimension_numbers<[1], [0], [0], [1], [0, 0, 1, 1], [], []>} : vector<16x80xbf16>, vector<80x256xbf16>, vector<16x256xf32> -> vector<16x256xf32>
    %c0_3 = arith.constant 0 : index
    %c0_4 = arith.constant 0 : index
    %3 = vector.load %arg3[%c0_3, %c0_4] : memref<16x1xf32, #tpu.memory_space<vmem>>, vector<16x1xf32>
    %4 = vector.broadcast %3 : vector<16x1xf32> to vector<16x256xf32>
    %5 = arith.addf %2, %4 : vector<16x256xf32>
    %cst_5 = arith.constant 0.000000e+00 : f32
    %6 = vector.broadcast %cst_5 : f32 to vector<16x256xf32>
    %7 = arith.maximumf %5, %6 : vector<16x256xf32>
    %c0_6 = arith.constant 0 : index
    %c0_7 = arith.constant 0 : index
    %8 = vector.load %arg4[%c0_6, %c0_7] : memref<16x256xf32, #tpu.memory_space<vmem>>, vector<16x256xf32>
    tpu.vector_store %arg4[%c0_6, %c0_7], %7 {strides = array<i32>} : memref<16x256xf32, #tpu.memory_space<vmem>>, vector<16x256xf32>,
    return
  }
  func.func @transform_0(%arg0: i32) -> (i32, i32) {
    %c0_i32 = arith.constant 0 : i32
    %c0_i32_0 = arith.constant 0 : i32
    %c0_i32_1 = arith.constant 0 : i32
    return %c0_i32, %c0_i32_0 : i32, i32
  }
  func.func @transform_1(%arg0: i32) -> (i32, i32) {
    %c0_i32 = arith.constant 0 : i32
    %c0_i32_0 = arith.constant 0 : i32
    return %c0_i32, %arg0 : i32, i32
  }
  func.func @transform_2(%arg0: i32) -> (i32, i32) {
    %c0_i32 = arith.constant 0 : i32
    %c0_i32_0 = arith.constant 0 : i32
    %c0_i32_1 = arith.constant 0 : i32
    return %c0_i32, %c0_i32_0 : i32, i32
  }
  func.func @transform_3(%arg0: i32) -> (i32, i32) {
    %c0_i32 = arith.constant 0 : i32
    %c0_i32_0 = arith.constant 0 : i32
    return %c0_i32, %arg0 : i32, i32
  }
}

module attributes {stable_mosaic.version = 11 : i64} {
  func.func @_mm_kernel(%arg0: i32, %arg1: memref<32x144xbf16, #tpu.memory_space<vmem>>, %arg2: memref<144x64xbf16, #tpu.memory_space<vmem>>, %arg3: memref<32x1xf32, #tpu.memory_space<vmem>>, %arg4: memref<32x64xf32, #tpu.memory_space<vmem>>) attributes {dimension_semantics = [#tpu.dimension_semantics<parallel>], iteration_bounds = array<i64: 1>, scalar_prefetch = 0 : i64, scratch_operands = 0 : i64, tpu.core_type = #tpu.core_type<tc>, window_params = [{pipeline_mode = #tpu.pipeline_mode<synchronous>, transform_indices = @transform_0, window_bounds = array<i64: 32, 144>}, {transform_indices = @transform_1, window_bounds = array<i64: 144, 64>}, {pipeline_mode = #tpu.pipeline_mode<synchronous>, transform_indices = @transform_2, window_bounds = array<i64: 32, 1>}, {transform_indices = @transform_3, window_bounds = array<i64: 32, 64>}]} {
    %c0 = arith.constant 0 : index
    %c0_0 = arith.constant 0 : index
    %0 = vector.load %arg1[%c0, %c0_0] : memref<32x144xbf16, #tpu.memory_space<vmem>>, vector<32x144xbf16>
    %c0_1 = arith.constant 0 : index
    %c0_2 = arith.constant 0 : index
    %1 = vector.load %arg2[%c0_1, %c0_2] : memref<144x64xbf16, #tpu.memory_space<vmem>>, vector<144x64xbf16>
    %cst = arith.constant dense<0.000000e+00> : vector<32x64xf32>
    %2 = tpu.matmul %0, %1, %cst {dimension_numbers = #tpu.dot_dimension_numbers<[1], [0], [0], [1], [0, 0, 1, 1], [], []>} : vector<32x144xbf16>, vector<144x64xbf16>, vector<32x64xf32> -> vector<32x64xf32>
    %c0_3 = arith.constant 0 : index
    %c0_4 = arith.constant 0 : index
    %3 = vector.load %arg3[%c0_3, %c0_4] : memref<32x1xf32, #tpu.memory_space<vmem>>, vector<32x1xf32>
    %4 = vector.broadcast %3 : vector<32x1xf32> to vector<32x64xf32>
    %5 = arith.addf %2, %4 : vector<32x64xf32>
    %cst_5 = arith.constant 0.000000e+00 : f32
    %6 = vector.broadcast %cst_5 : f32 to vector<32x64xf32>
    %7 = arith.maximumf %5, %6 : vector<32x64xf32>
    %c0_6 = arith.constant 0 : index
    %c0_7 = arith.constant 0 : index
    %8 = vector.load %arg4[%c0_6, %c0_7] : memref<32x64xf32, #tpu.memory_space<vmem>>, vector<32x64xf32>
    tpu.vector_store %arg4[%c0_6, %c0_7], %7 {strides = array<i32>} : memref<32x64xf32, #tpu.memory_space<vmem>>, vector<32x64xf32>,
    return
  }
  func.func @transform_0(%arg0: i32) -> (i32, i32) {
    %c0_i32 = arith.constant 0 : i32
    %c0_i32_0 = arith.constant 0 : i32
    %c0_i32_1 = arith.constant 0 : i32
    return %c0_i32, %c0_i32_0 : i32, i32
  }
  func.func @transform_1(%arg0: i32) -> (i32, i32) {
    %c0_i32 = arith.constant 0 : i32
    %c0_i32_0 = arith.constant 0 : i32
    return %c0_i32, %arg0 : i32, i32
  }
  func.func @transform_2(%arg0: i32) -> (i32, i32) {
    %c0_i32 = arith.constant 0 : i32
    %c0_i32_0 = arith.constant 0 : i32
    %c0_i32_1 = arith.constant 0 : i32
    return %c0_i32, %c0_i32_0 : i32, i32
  }
  func.func @transform_3(%arg0: i32) -> (i32, i32) {
    %c0_i32 = arith.constant 0 : i32
    %c0_i32_0 = arith.constant 0 : i32
    return %c0_i32, %arg0 : i32, i32
  }
}

module attributes {stable_mosaic.version = 11 : i64} {
  func.func @_mm_kernel(%arg0: i32, %arg1: memref<16x288xbf16, #tpu.memory_space<vmem>>, %arg2: memref<288x256xbf16, #tpu.memory_space<vmem>>, %arg3: memref<16x1xf32, #tpu.memory_space<vmem>>, %arg4: memref<16x256xf32, #tpu.memory_space<vmem>>) attributes {dimension_semantics = [#tpu.dimension_semantics<parallel>], iteration_bounds = array<i64: 1>, scalar_prefetch = 0 : i64, scratch_operands = 0 : i64, tpu.core_type = #tpu.core_type<tc>, window_params = [{pipeline_mode = #tpu.pipeline_mode<synchronous>, transform_indices = @transform_0, window_bounds = array<i64: 16, 288>}, {transform_indices = @transform_1, window_bounds = array<i64: 288, 256>}, {pipeline_mode = #tpu.pipeline_mode<synchronous>, transform_indices = @transform_2, window_bounds = array<i64: 16, 1>}, {transform_indices = @transform_3, window_bounds = array<i64: 16, 256>}]} {
    %c0 = arith.constant 0 : index
    %c0_0 = arith.constant 0 : index
    %0 = vector.load %arg1[%c0, %c0_0] : memref<16x288xbf16, #tpu.memory_space<vmem>>, vector<16x288xbf16>
    %c0_1 = arith.constant 0 : index
    %c0_2 = arith.constant 0 : index
    %1 = vector.load %arg2[%c0_1, %c0_2] : memref<288x256xbf16, #tpu.memory_space<vmem>>, vector<288x256xbf16>
    %cst = arith.constant dense<0.000000e+00> : vector<16x256xf32>
    %2 = tpu.matmul %0, %1, %cst {dimension_numbers = #tpu.dot_dimension_numbers<[1], [0], [0], [1], [0, 0, 1, 1], [], []>} : vector<16x288xbf16>, vector<288x256xbf16>, vector<16x256xf32> -> vector<16x256xf32>
    %c0_3 = arith.constant 0 : index
    %c0_4 = arith.constant 0 : index
    %3 = vector.load %arg3[%c0_3, %c0_4] : memref<16x1xf32, #tpu.memory_space<vmem>>, vector<16x1xf32>
    %4 = vector.broadcast %3 : vector<16x1xf32> to vector<16x256xf32>
    %5 = arith.addf %2, %4 : vector<16x256xf32>
    %c0_5 = arith.constant 0 : index
    %c0_6 = arith.constant 0 : index
    %6 = vector.load %arg4[%c0_5, %c0_6] : memref<16x256xf32, #tpu.memory_space<vmem>>, vector<16x256xf32>
    tpu.vector_store %arg4[%c0_5, %c0_6], %5 {strides = array<i32>} : memref<16x256xf32, #tpu.memory_space<vmem>>, vector<16x256xf32>,
    return
  }
  func.func @transform_0(%arg0: i32) -> (i32, i32) {
    %c0_i32 = arith.constant 0 : i32
    %c0_i32_0 = arith.constant 0 : i32
    %c0_i32_1 = arith.constant 0 : i32
    return %c0_i32, %c0_i32_0 : i32, i32
  }
  func.func @transform_1(%arg0: i32) -> (i32, i32) {
    %c0_i32 = arith.constant 0 : i32
    %c0_i32_0 = arith.constant 0 : i32
    return %c0_i32, %arg0 : i32, i32
  }
  func.func @transform_2(%arg0: i32) -> (i32, i32) {
    %c0_i32 = arith.constant 0 : i32
    %c0_i32_0 = arith.constant 0 : i32
    %c0_i32_1 = arith.constant 0 : i32
    return %c0_i32, %c0_i32_0 : i32, i32
  }
  func.func @transform_3(%arg0: i32) -> (i32, i32) {
    %c0_i32 = arith.constant 0 : i32
    %c0_i32_0 = arith.constant 0 : i32
    return %c0_i32, %arg0 : i32, i32
  }
}

module attributes {stable_mosaic.version = 11 : i64} {
  func.func @_mm_kernel(%arg0: i32, %arg1: memref<8x144xbf16, #tpu.memory_space<vmem>>, %arg2: memref<144x512xbf16, #tpu.memory_space<vmem>>, %arg3: memref<8x1xf32, #tpu.memory_space<vmem>>, %arg4: memref<8x512xf32, #tpu.memory_space<vmem>>) attributes {dimension_semantics = [#tpu.dimension_semantics<parallel>], iteration_bounds = array<i64: 2>, scalar_prefetch = 0 : i64, scratch_operands = 0 : i64, tpu.core_type = #tpu.core_type<tc>, window_params = [{pipeline_mode = #tpu.pipeline_mode<synchronous>, transform_indices = @transform_0, window_bounds = array<i64: 8, 144>}, {transform_indices = @transform_1, window_bounds = array<i64: 144, 512>}, {pipeline_mode = #tpu.pipeline_mode<synchronous>, transform_indices = @transform_2, window_bounds = array<i64: 8, 1>}, {transform_indices = @transform_3, window_bounds = array<i64: 8, 512>}]} {
    %c0 = arith.constant 0 : index
    %c0_0 = arith.constant 0 : index
    %0 = vector.load %arg1[%c0, %c0_0] : memref<8x144xbf16, #tpu.memory_space<vmem>>, vector<8x144xbf16>
    %c0_1 = arith.constant 0 : index
    %c0_2 = arith.constant 0 : index
    %1 = vector.load %arg2[%c0_1, %c0_2] : memref<144x512xbf16, #tpu.memory_space<vmem>>, vector<144x512xbf16>
    %cst = arith.constant dense<0.000000e+00> : vector<8x512xf32>
    %2 = tpu.matmul %0, %1, %cst {dimension_numbers = #tpu.dot_dimension_numbers<[1], [0], [0], [1], [0, 0, 1, 1], [], []>} : vector<8x144xbf16>, vector<144x512xbf16>, vector<8x512xf32> -> vector<8x512xf32>
    %c0_3 = arith.constant 0 : index
    %c0_4 = arith.constant 0 : index
    %3 = vector.load %arg3[%c0_3, %c0_4] : memref<8x1xf32, #tpu.memory_space<vmem>>, vector<8x1xf32>
    %4 = vector.broadcast %3 : vector<8x1xf32> to vector<8x512xf32>
    %5 = arith.addf %2, %4 : vector<8x512xf32>
    %c0_5 = arith.constant 0 : index
    %c0_6 = arith.constant 0 : index
    %6 = vector.load %arg4[%c0_5, %c0_6] : memref<8x512xf32, #tpu.memory_space<vmem>>, vector<8x512xf32>
    tpu.vector_store %arg4[%c0_5, %c0_6], %5 {strides = array<i32>} : memref<8x512xf32, #tpu.memory_space<vmem>>, vector<8x512xf32>,
    return
  }
  func.func @transform_0(%arg0: i32) -> (i32, i32) {
    %c0_i32 = arith.constant 0 : i32
    %c0_i32_0 = arith.constant 0 : i32
    %c0_i32_1 = arith.constant 0 : i32
    return %c0_i32, %c0_i32_0 : i32, i32
  }
  func.func @transform_1(%arg0: i32) -> (i32, i32) {
    %c0_i32 = arith.constant 0 : i32
    %c0_i32_0 = arith.constant 0 : i32
    return %c0_i32, %arg0 : i32, i32
  }
  func.func @transform_2(%arg0: i32) -> (i32, i32) {
    %c0_i32 = arith.constant 0 : i32
    %c0_i32_0 = arith.constant 0 : i32
    %c0_i32_1 = arith.constant 0 : i32
    return %c0_i32, %c0_i32_0 : i32, i32
  }
  func.func @transform_3(%arg0: i32) -> (i32, i32) {
    %c0_i32 = arith.constant 0 : i32
    %c0_i32_0 = arith.constant 0 : i32
    return %c0_i32, %arg0 : i32, i32
  }
}

module attributes {stable_mosaic.version = 11 : i64} {
  func.func @_mm_kernel(%arg0: i32, %arg1: memref<1x80xbf16, #tpu.memory_space<vmem>>, %arg2: memref<80x512xbf16, #tpu.memory_space<vmem>>, %arg3: memref<1x1xf32, #tpu.memory_space<vmem>>, %arg4: memref<1x512xf32, #tpu.memory_space<vmem>>) attributes {dimension_semantics = [#tpu.dimension_semantics<parallel>], iteration_bounds = array<i64: 2>, scalar_prefetch = 0 : i64, scratch_operands = 0 : i64, tpu.core_type = #tpu.core_type<tc>, window_params = [{pipeline_mode = #tpu.pipeline_mode<synchronous>, transform_indices = @transform_0, window_bounds = array<i64: 1, 80>}, {transform_indices = @transform_1, window_bounds = array<i64: 80, 512>}, {pipeline_mode = #tpu.pipeline_mode<synchronous>, transform_indices = @transform_2, window_bounds = array<i64: 1, 1>}, {transform_indices = @transform_3, window_bounds = array<i64: 1, 512>}]} {
    %c0 = arith.constant 0 : index
    %c0_0 = arith.constant 0 : index
    %0 = vector.load %arg1[%c0, %c0_0] : memref<1x80xbf16, #tpu.memory_space<vmem>>, vector<1x80xbf16>
    %c0_1 = arith.constant 0 : index
    %c0_2 = arith.constant 0 : index
    %1 = vector.load %arg2[%c0_1, %c0_2] : memref<80x512xbf16, #tpu.memory_space<vmem>>, vector<80x512xbf16>
    %cst = arith.constant dense<0.000000e+00> : vector<1x512xf32>
    %2 = tpu.matmul %0, %1, %cst {dimension_numbers = #tpu.dot_dimension_numbers<[1], [0], [0], [1], [0, 0, 1, 1], [], []>} : vector<1x80xbf16>, vector<80x512xbf16>, vector<1x512xf32> -> vector<1x512xf32>
    %c0_3 = arith.constant 0 : index
    %c0_4 = arith.constant 0 : index
    %3 = vector.load %arg3[%c0_3, %c0_4] : memref<1x1xf32, #tpu.memory_space<vmem>>, vector<1x1xf32>
    %4 = vector.broadcast %3 : vector<1x1xf32> to vector<1x512xf32>
    %5 = arith.addf %2, %4 : vector<1x512xf32>
    %c0_5 = arith.constant 0 : index
    %c0_6 = arith.constant 0 : index
    %6 = vector.load %arg4[%c0_5, %c0_6] : memref<1x512xf32, #tpu.memory_space<vmem>>, vector<1x512xf32>
    tpu.vector_store %arg4[%c0_5, %c0_6], %5 {strides = array<i32>} : memref<1x512xf32, #tpu.memory_space<vmem>>, vector<1x512xf32>,
    return
  }
  func.func @transform_0(%arg0: i32) -> (i32, i32) {
    %c0_i32 = arith.constant 0 : i32
    %c0_i32_0 = arith.constant 0 : i32
    %c0_i32_1 = arith.constant 0 : i32
    return %c0_i32, %c0_i32_0 : i32, i32
  }
  func.func @transform_1(%arg0: i32) -> (i32, i32) {
    %c0_i32 = arith.constant 0 : i32
    %c0_i32_0 = arith.constant 0 : i32
    return %c0_i32, %arg0 : i32, i32
  }
  func.func @transform_2(%arg0: i32) -> (i32, i32) {
    %c0_i32 = arith.constant 0 : i32
    %c0_i32_0 = arith.constant 0 : i32
    %c0_i32_1 = arith.constant 0 : i32
    return %c0_i32, %c0_i32_0 : i32, i32
  }
  func.func @transform_3(%arg0: i32) -> (i32, i32) {
    %c0_i32 = arith.constant 0 : i32
    %c0_i32_0 = arith.constant 0 : i32
    return %c0_i32, %arg0 : i32, i32
  }
}

module attributes {stable_mosaic.version = 11 : i64} {
  func.func @_depth_kernel(%arg0: i32, %arg1: i32, %arg2: memref<1x8x64xf32, #tpu.memory_space<vmem>>, %arg3: memref<1x2x8xf32, #tpu.memory_space<vmem>>, %arg4: memref<1x1x64xf32, #tpu.memory_space<vmem>>, %arg5: memref<1x1x64xf32, #tpu.memory_space<vmem>>) attributes {dimension_semantics = [#tpu.dimension_semantics<parallel>, #tpu.dimension_semantics<parallel>], iteration_bounds = array<i64: 2, 1>, scalar_prefetch = 0 : i64, scratch_operands = 0 : i64, tpu.core_type = #tpu.core_type<tc>, window_params = [{transform_indices = @transform_0, window_bounds = array<i64: 1, 8, 64>}, {transform_indices = @transform_1, window_bounds = array<i64: 1, 2, 8>}, {transform_indices = @transform_2, window_bounds = array<i64: 1, 1, 64>}, {transform_indices = @transform_3, window_bounds = array<i64: 1, 1, 64>}]} {
    %c0 = arith.constant 0 : index
    %c0_0 = arith.constant 0 : index
    %c0_1 = arith.constant 0 : index
    %0 = vector.load %arg2[%c0, %c0_0, %c0_1] : memref<1x8x64xf32, #tpu.memory_space<vmem>>, vector<1x8x64xf32>
    %1 = vector.shape_cast %0 : vector<1x8x64xf32> to vector<8x64xf32>
    %cst = arith.constant dense<0xFF800000> : vector<64xf32>
    %2 = vector.multi_reduction <maximumf>, %1, %cst [0] : vector<8x64xf32> to vector<64xf32>
    %3 = vector.shape_cast %2 : vector<64xf32> to vector<1x64xf32>
    %4 = vector.broadcast %3 : vector<1x64xf32> to vector<8x64xf32>
    %5 = arith.subf %1, %4 : vector<8x64xf32>
    %6 = math.exp %5 : vector<8x64xf32>
    %cst_2 = arith.constant dense<0.000000e+00> : vector<64xf32>
    %7 = vector.multi_reduction <add>, %6, %cst_2 [0] : vector<8x64xf32> to vector<64xf32>
    %8 = vector.shape_cast %7 : vector<64xf32> to vector<1x64xf32>
    %9 = vector.broadcast %8 : vector<1x64xf32> to vector<8x64xf32>
    %10 = arith.divf %6, %9 : vector<8x64xf32>
    %c0_3 = arith.constant 0 : index
    %c0_4 = arith.constant 0 : index
    %c0_5 = arith.constant 0 : index
    %11 = vector.load %arg3[%c0_3, %c0_4, %c0_5] : memref<1x2x8xf32, #tpu.memory_space<vmem>>, vector<1x2x8xf32>
    %12 = vector.shape_cast %11 : vector<1x2x8xf32> to vector<2x8xf32>
    %cst_6 = arith.constant dense<0.000000e+00> : vector<2x64xf32>
    %13 = tpu.matmul %12, %10, %cst_6 {dimension_numbers = #tpu.dot_dimension_numbers<[1], [0], [0], [1], [0, 0, 1, 1], [], []>} : vector<2x8xf32>, vector<8x64xf32>, vector<2x64xf32> -> vector<2x64xf32>
    %14 = vector.extract_strided_slice %13 {offsets = [0, 0], sizes = [1, 64], strides = [1, 1]} : vector<2x64xf32> to vector<1x64xf32>
    %15 = vector.extract_strided_slice %13 {offsets = [1, 0], sizes = [1, 64], strides = [1, 1]} : vector<2x64xf32> to vector<1x64xf32>
    %16 = arith.fptosi %15 : vector<1x64xf32> to vector<1x64xi32>
    %17 = tpu.iota {dimensions = array<i32: 0>} : vector<8x64xi32>
    %c1_i32 = arith.constant 1 : i32
    %18 = vector.broadcast %c1_i32 : i32 to vector<1x64xi32>
    %19 = arith.subi %16, %18 : vector<1x64xi32>
    %20 = vector.broadcast %19 : vector<1x64xi32> to vector<8x64xi32>
    %21 = arith.cmpi sge, %17, %20 : vector<8x64xi32>
    %c2_i32 = arith.constant 2 : i32
    %22 = vector.broadcast %c2_i32 : i32 to vector<1x64xi32>
    %23 = arith.addi %16, %22 : vector<1x64xi32>
    %24 = vector.broadcast %23 : vector<1x64xi32> to vector<8x64xi32>
    %25 = arith.cmpi sle, %17, %24 : vector<8x64xi32>
    %26 = arith.andi %21, %25 : vector<8x64xi1>
    %27 = arith.extui %26 : vector<8x64xi1> to vector<8x64xi32>
    %28 = arith.sitofp %27 : vector<8x64xi32> to vector<8x64xf32>
    %29 = arith.mulf %10, %28 : vector<8x64xf32>
    %cst_7 = arith.constant dense<0.000000e+00> : vector<64xf32>
    %30 = vector.multi_reduction <add>, %29, %cst_7 [0] : vector<8x64xf32> to vector<64xf32>
    %31 = vector.shape_cast %30 : vector<64xf32> to vector<1x64xf32>
    %c0_8 = arith.constant 0 : index
    %c0_9 = arith.constant 0 : index
    %c0_10 = arith.constant 0 : index
    %32 = vector.load %arg4[%c0_8, %c0_9, %c0_10] : memref<1x1x64xf32, #tpu.memory_space<vmem>>, vector<1x1x64xf32>
    %33 = vector.shape_cast %32 : vector<1x1x64xf32> to vector<1x64xf32>
    %34 = vector.shape_cast %14 : vector<1x64xf32> to vector<1x1x64xf32>
    tpu.vector_store %arg4[%c0_8, %c0_9, %c0_10], %34 {strides = array<i32>} : memref<1x1x64xf32, #tpu.memory_space<vmem>>, vector<1x1x64xf32>,
    %c0_11 = arith.constant 0 : index
    %c0_12 = arith.constant 0 : index
    %c0_13 = arith.constant 0 : index
    %35 = vector.load %arg5[%c0_11, %c0_12, %c0_13] : memref<1x1x64xf32, #tpu.memory_space<vmem>>, vector<1x1x64xf32>
    %36 = vector.shape_cast %35 : vector<1x1x64xf32> to vector<1x64xf32>
    %37 = vector.shape_cast %31 : vector<1x64xf32> to vector<1x1x64xf32>
    tpu.vector_store %arg5[%c0_11, %c0_12, %c0_13], %37 {strides = array<i32>} : memref<1x1x64xf32, #tpu.memory_space<vmem>>, vector<1x1x64xf32>,
    return
  }
  func.func @transform_0(%arg0: i32, %arg1: i32) -> (i32, i32, i32) {
    %c0_i32 = arith.constant 0 : i32
    %c0_i32_0 = arith.constant 0 : i32
    return %arg0, %c0_i32, %arg1 : i32, i32, i32
  }
  func.func @transform_1(%arg0: i32, %arg1: i32) -> (i32, i32, i32) {
    %c0_i32 = arith.constant 0 : i32
    %c0_i32_0 = arith.constant 0 : i32
    %c0_i32_1 = arith.constant 0 : i32
    return %arg0, %c0_i32, %c0_i32_0 : i32, i32, i32
  }
  func.func @transform_2(%arg0: i32, %arg1: i32) -> (i32, i32, i32) {
    %c0_i32 = arith.constant 0 : i32
    %c0_i32_0 = arith.constant 0 : i32
    return %arg0, %c0_i32, %arg1 : i32, i32, i32
  }
  func.func @transform_3(%arg0: i32, %arg1: i32) -> (i32, i32, i32) {
    %c0_i32 = arith.constant 0 : i32
    %c0_i32_0 = arith.constant 0 : i32
    return %arg0, %c0_i32, %arg1 : i32, i32, i32
  }
}

</mosaic_0001>

<bundles_post_ra>
// kernel: net_forward.40
= control target key start
LH: loop header
LB: loop body
LE: loop exit
PB: predicated region body
PF: predicated region fallthrough
CT: control target
= control target key end

     0   :  { %s518_s12 = smov 0   ;;  %s520_s13 = smov 0   ;;  %s576_s0 = inlined_call_operand.vmem [shape: bf16[8,32], index: 0, kind: input, shape index: {}]   ;;  %s577_s1 = inlined_call_operand.vmem [shape: bf16[32,2048], index: 1, kind: input, shape index: {}]   ;;  %s578_s2 = inlined_call_operand.vmem [shape: f32[8,1], index: 2, kind: input, shape index: {}]   ;;  %s579_s3 = inlined_call_operand.vmem [shape: f32[8,2048], index: 3, kind: output, shape index: {}]  }
   0x1   :  { %s522_s14 = smov 0  }
   0x2 LB: > { %s389_s15 = sadd.s32 4294967295, %s495_s14   ;;  %s535_s16 = sadd.s32 1, %s495_s14   ;;  %s495_s14 = sphi %s522_s14, %s582_s14   ;;  %s491_s13 = sphi %s520_s13, %s581_s13   ;;  %s487_s12 = sphi %s518_s12, %s580_s12  }
   0x3   : > { %s38_s17 = ssub.s32 %s495_s14, %s535_s16  ;;  %s41_s18 = sadd.s32 1, %s491_s13 }
   0x4   : > { %p39_p0 = scmp.eq.s32.totalorder %s38_s17, 0  ;;  %p48_p1 = scmp.ne.s32.totalorder %s491_s13, %s487_s12 }
   0x5   : > { %p49_p2 = scmp.eq.s32.totalorder %s495_s14, 0  ;;  %p392_p4 = scmp.ge.s32.totalorder %s495_s14, 4 }
   0x6   : > { %s544_s19 = scalar_select %p39_p0, %s491_s13, %s41_s18  }
   0x7   : > { %p50_p3 = por %p49_p2, %p48_p1  ;;  %127 = sbr.rel (%p392_p4) target bundleno = 24 (0x18), region = 24 }
   0xc   : > { %130 = sbr.rel (!%p50_p3) target bundleno = 24 (0x18), region = 28  ;;  %s132_s20 = sand.u32 (%p50_p3), 1, %s491_s13  }
   0xd   : > { %s438_s21 = sshll.u32 (%p50_p3), %s495_s14, 4  ;;  %s393_s22 = sshll.u32 (%p50_p3), %s132_s20, 6 }
   0xe   : > { %s137_s25 = scalar_lea.vmem (%p50_p3), %s577_s1, %s438_s21  ;;  %s134_s26 = scalar_lea.vmem (%p50_p3), [#allocation2], %s393_s22 }
   0xf   : > { %v150_v0 = vld [vmem:[%s137_s25] sm:$0xff] (%p50_p3)  ;;  %v152_v1 = vld [vmem:[%s137_s25 + $0x8] sm:$0xff] (%p50_p3) }
  0x10   : > { %v154_v2 = vld [vmem:[%s137_s25 + $0x40] sm:$0xff] (%p50_p3)  ;;  %151 = vst [vmem:[%s134_s26] sm:$0xff] (%p50_p3), %v150_v0  ;;  %v156_v3 = vld [vmem:[%s137_s25 + $0x48] sm:$0xff] (%p50_p3) }
  0x11   : > { %153 = vst [vmem:[%s134_s26 + $0x8] sm:$0xff] %v152_v1  ;;  %v158_v4 = vld [vmem:[%s137_s25 + $0x80] sm:$0xff]  ;;  %v160_v5 = vld [vmem:[%s137_s25 + $0x88] sm:$0xff] }
  0x12   : > { %155 = vst [vmem:[%s134_s26 + $0x10] sm:$0xff] %v154_v2  ;;  %v162_v6 = vld [vmem:[%s137_s25 + $0xc0] sm:$0xff]  ;;  %v164_v7 = vld [vmem:[%s137_s25 + $0xc8] sm:$0xff] }
  0x13   : > { %157 = vst [vmem:[%s134_s26 + $0x18] sm:$0xff] %v156_v3 }
  0x14   : > { %159 = vst [vmem:[%s134_s26 + $0x20] sm:$0xff] %v158_v4 }
  0x15   : > { %161 = vst [vmem:[%s134_s26 + $0x28] sm:$0xff] %v160_v5 }
  0x16   : > { %163 = vst [vmem:[%s134_s26 + $0x30] sm:$0xff] %v162_v6 }
  0x17   : > { %165 = vst [vmem:[%s134_s26 + $0x38] sm:$0xff] %v164_v7 }
  0x18 PF: > { %p396_p5 = scmp.ge.s32.totalorder %s495_s14, 1  ;;  %p170_p6 = scmp.lt.s32.totalorder %s495_s14, 5 }
  0x1a   : > { %p171_p7 = pnand %p396_p5, %p170_p6 }
  0x1b   : > { %s177_s27 = sand.u32 (!%p171_p7), 1, %s487_s12   ;;  %s398_s7 = sshll.u32 (!%p171_p7), %s389_s15, 2 }
  0x1c   : > { %174 = sbr.rel (%p171_p7) target bundleno = 185 (0xb9), region = 51  ;;  %s397_s30 = sshll.u32 (!%p171_p7), %s177_s27, 6 }
  0x1d   : > { %s179_s4 = scalar_lea.vmem (!%p171_p7), [#allocation2], %s397_s30  ;;  %p202_p8 = scmp.lt.s32.totalorder (!%p171_p7), %s398_s7, 15 }
  0x21   : > { %v217_v8 = vld [vmem:[%s578_s2] sm:$0xff]  ;;  %v497_v9 = vmov 0   ;;  %v445_v11 = vld [vmem:[%s179_s4 + $0x2c] sm:$0xf0]  ;;  %v420_v14 = vld [vmem:[%s179_s4 + $0x30] sm:$0xf0] }
  0x22   : > { %472 = vset.pattern.permute.xlu0 %v497_v9  ;;  %v418_v10 = vld [vmem:[%s179_s4 + $0x20] sm:$0xf]  ;;  %v443_v12 = vld [vmem:[%s179_s4 + $0x24] sm:$0xf]  ;;  %v426_v15 = vld [vmem:[%s179_s4 + $0x28] sm:$0xf] }
  0x23   : > { %220 = vperm.xlu0 %472, %v217_v8   ;;  %v419_v13 = vor.u32 %v445_v11, %v418_v10  ;;  %v446_v16 = vld [vmem:[%s179_s4 + $0x34] sm:$0xf0]  ;;  %v423_v17 = vor.u32 %v443_v12, %v420_v14  ;;  %v444_v19 = vld [vmem:[%s179_s4 + $0x2c] sm:$0xf]  ;;  %v428_v20 = vld [vmem:[%s179_s4 + $0x38] sm:$0xf0] }
  0x24   : > { %v427_v18 = vor.u32 %v446_v16, %v426_v15  ;;  %v402_v21 = vld [vmem:[%s179_s4] sm:$0xf]  ;;  %v431_v22 = vor.u32 %v444_v19, %v428_v20  ;;  %v441_v23 = vld [vmem:[%s179_s4 + $0xc] sm:$0xf0]  ;;  %v439_v24 = vld [vmem:[%s179_s4 + $0x4] sm:$0xf] }
  0x25   : > { %273 = vmatpush.bf16.msra.mxu0 %v419_v13  ;;  %v404_v25 = vld [vmem:[%s179_s4 + $0x10] sm:$0xf0]  ;;  %286 = vmatpush.bf16.msra.mxu1 %v423_v17  ;;  %v403_v26 = vor.u32 %v441_v23, %v402_v21  ;;  %v410_v28 = vld [vmem:[%s179_s4 + $0x8] sm:$0xf]  ;;  %v442_v29 = vld [vmem:[%s179_s4 + $0x14] sm:$0xf0] }
  0x26   : > { %299 = vmatpush.bf16.msra.mxu2 %v427_v18  ;;  %v407_v27 = vor.u32 %v439_v24, %v404_v25  ;;  %v440_v30 = vld [vmem:[%s179_s4 + $0xc] sm:$0xf]  ;;  %312 = vmatpush.bf16.msra.mxu3 %v431_v22  ;;  %v411_v31 = vor.u32 %v442_v29, %v410_v28  ;;  %v412_v32 = vld [vmem:[%s179_s4 + $0x18] sm:$0xf0]  ;;  %v208_v34 = vld [vmem:[%s576_s0] sm:$0xf] }
  0x27   : > { %v415_v33 = vor.u32 %v440_v30, %v412_v32  ;;  %vm263_vm0 = vcmask 261120   ;;  %s584_s7 = smov (!%p202_p8, %s398_s7), 15 }
  0x28   : > { %s399_s8 = sshll.u32 %s584_s7, 3 }
  0x29   : > { %274 = vmatpush.bf16.msra.mxu0 %v403_v26  ;;  %287 = vmatpush.bf16.msra.mxu1 %v407_v27  ;;  %s205_s11 = scalar_lea.vmem %s579_s3, %s399_s8 }
  0x2a   : > { %300 = vmatpush.bf16.msra.mxu2 %v411_v31  ;;  %313 = vmatpush.bf16.msra.mxu3 %v415_v33 }
  0x2c   : > { %432 = vmatmul.msk.bf16.vlgmr.msra.gmra.mxu0 %vm263_vm0, %v208_v34  ;;  %433 = vmatmul.msk.bf16.vlgmr.msra.gmra.mxu1 %vm263_vm0, %v208_v34 }
  0x2d   : > { %434 = vmatmul.msk.bf16.vlgmr.msra.gmra.mxu2 %vm263_vm0, %v208_v34  ;;  %435 = vmatmul.msk.bf16.vlgmr.msra.gmra.mxu3 %vm263_vm0, %v208_v34 }
  0x95   : > { %v221_v35 = vpop.permute.xlu0 %220 }
  0xa9   : > { %v276_v36 = vpop.f32.mrf.mxu0  ;;  %v289_v37 = vpop.f32.mrf.mxu1 }
  0xaa   : > { %v277_v38 = vadd.f32 %v276_v36, %v221_v35  ;;  %v290_v39 = vadd.f32 %v289_v37, %v221_v35 }
  0xac   : > { %v319_v40 = vmax.f32 %v277_v38, 0.0  ;;  %v320_v41 = vmax.f32 %v290_v39, 0.0 }
  0xae   : > { %323 = vst [vmem:[%s205_s11] sm:$0xff] %v319_v40 }
  0xaf   : > { %324 = vst [vmem:[%s205_s11 + $0x8] sm:$0xff] %v320_v41 }
  0xb0   : > { %v302_v42 = vpop.f32.mrf.mxu2  ;;  %v315_v44 = vpop.f32.mrf.mxu3 }
  0xb1   : > { %v303_v43 = vadd.f32 %v302_v42, %v221_v35  ;;  %v278_v45 = vpop.f32.mrf.mxu0  ;;  %v316_v46 = vadd.f32 %v315_v44, %v221_v35  ;;  %v291_v47 = vpop.f32.mrf.mxu1 }
  0xb3   : > { %v321_v48 = vmax.f32 %v303_v43, 0.0  ;;  %v322_v49 = vmax.f32 %v316_v46, 0.0 }
  0xb5   : > { %325 = vst [vmem:[%s205_s11 + $0x10] sm:$0xff] %v321_v48 }
  0xb6   : > { %326 = vst [vmem:[%s205_s11 + $0x18] sm:$0xff] %v322_v49 }
  0xb8   : > { %v304_v50 = vpop.f32.mrf.mxu2  ;;  %v317_v51 = vpop.f32.mrf.mxu3 }
  0xb9 PF: > { %p10_p9 = scmp.ge.s32.totalorder %s535_s16, 6   ;;  %s580_s12 = smov %s491_s13 }
  0xba   : > { %s581_s13 = smov %s544_s19  ;;  %s582_s14 = smov %s535_s16 }
  0xbb   :  { %12 = sbr.rel (!%p10_p9) target bundleno = 2 (0x2), region = 90 }

// kernel: net_forward.41
= control target key start
LH: loop header
LB: loop body
LE: loop exit
PB: predicated region body
PF: predicated region fallthrough
CT: control target
= control target key end

     0   :  { %s674_s12 = smov 0   ;;  %s676_s13 = smov 0   ;;  %s818_s0 = inlined_call_operand.vmem [shape: bf16[8,80], index: 0, kind: input, shape index: {}]   ;;  %s819_s1 = inlined_call_operand.vmem [shape: bf16[80,2048], index: 1, kind: input, shape index: {}]   ;;  %s820_s2 = inlined_call_operand.vmem [shape: f32[8,1], index: 2, kind: input, shape index: {}]   ;;  %s821_s3 = inlined_call_operand.vmem [shape: f32[8,2048], index: 3, kind: output, shape index: {}]  }
   0x1   :  { %s678_s14 = smov 0  }
   0x2 LB: > { %s485_s15 = sadd.s32 4294967295, %s651_s14   ;;  %s691_s16 = sadd.s32 1, %s651_s14   ;;  %s651_s14 = sphi %s678_s14, %s824_s14   ;;  %s647_s13 = sphi %s676_s13, %s823_s13   ;;  %s643_s12 = sphi %s674_s12, %s822_s12  }
   0x3   : > { %s38_s17 = ssub.s32 %s651_s14, %s691_s16  ;;  %s41_s18 = sadd.s32 1, %s647_s13 }
   0x4   : > { %p39_p0 = scmp.eq.s32.totalorder %s38_s17, 0  ;;  %p48_p1 = scmp.ne.s32.totalorder %s647_s13, %s643_s12 }
   0x5   : > { %p49_p2 = scmp.eq.s32.totalorder %s651_s14, 0  ;;  %p488_p4 = scmp.ge.s32.totalorder %s651_s14, 4 }
   0x6   : > { %s700_s19 = scalar_select %p39_p0, %s647_s13, %s41_s18  }
   0x7   : > { %p50_p3 = por %p49_p2, %p48_p1  ;;  %127 = sbr.rel (%p488_p4) target bundleno = 36 (0x24), region = 24 }
   0xc   : > { %130 = sbr.rel (!%p50_p3) target bundleno = 36 (0x24), region = 28  ;;  %s132_s20 = sand.u32 (%p50_p3), 1, %s647_s13  }
   0xd   : > { %s580_s21 = sshll.u32 (%p50_p3), %s651_s14, 4  ;;  %s601_s22 = smul.u32 (%p50_p3), 160, %s132_s20 }
   0xe   : > { %s708_s25 = scalar_lea.vmem (%p50_p3), %s819_s1, %s580_s21 }
   0xf   : > { %v150_v0 = vld [vmem:[%s708_s25] sm:$0xff] (%p50_p3)  ;;  %v152_v1 = vld [vmem:[%s708_s25 + $0x8] sm:$0xff] (%p50_p3)  ;;  %s713_s26 = scalar_lea.vmem (%p50_p3), [#allocation2], %s601_s22 }
  0x10   : > { %v154_v2 = vld [vmem:[%s708_s25 + $0x40] sm:$0xff] (%p50_p3)  ;;  %151 = vst [vmem:[%s713_s26] sm:$0xff] (%p50_p3), %v150_v0  ;;  %v156_v3 = vld [vmem:[%s708_s25 + $0x48] sm:$0xff] (%p50_p3) }
  0x11   : > { %153 = vst [vmem:[%s713_s26 + $0x8] sm:$0xff] %v152_v1  ;;  %v158_v4 = vld [vmem:[%s708_s25 + $0x80] sm:$0xff]  ;;  %v160_v5 = vld [vmem:[%s708_s25 + $0x88] sm:$0xff] }
  0x12   : > { %155 = vst [vmem:[%s713_s26 + $0x10] sm:$0xff] %v154_v2  ;;  %v162_v6 = vld [vmem:[%s708_s25 + $0xc0] sm:$0xff]  ;;  %v164_v7 = vld [vmem:[%s708_s25 + $0xc8] sm:$0xff] }
  0x13   : > { %157 = vst [vmem:[%s713_s26 + $0x18] sm:$0xff] %v156_v3  ;;  %v166_v8 = vld [vmem:[%s708_s25 + $0x100] sm:$0xff]  ;;  %v168_v9 = vld [vmem:[%s708_s25 + $0x108] sm:$0xff] }
  0x14   : > { %159 = vst [vmem:[%s713_s26 + $0x20] sm:$0xff] %v158_v4  ;;  %v170_v10 = vld [vmem:[%s708_s25 + $0x140] sm:$0xff]  ;;  %v172_v11 = vld [vmem:[%s708_s25 + $0x148] sm:$0xff] }
  0x15   : > { %161 = vst [vmem:[%s713_s26 + $0x28] sm:$0xff] %v160_v5  ;;  %v174_v12 = vld [vmem:[%s708_s25 + $0x180] sm:$0xff]  ;;  %v176_v13 = vld [vmem:[%s708_s25 + $0x188] sm:$0xff] }
  0x16   : > { %163 = vst [vmem:[%s713_s26 + $0x30] sm:$0xff] %v162_v6  ;;  %v178_v14 = vld [vmem:[%s708_s25 + $0x1c0] sm:$0xff]  ;;  %v180_v15 = vld [vmem:[%s708_s25 + $0x1c8] sm:$0xff] }
  0x17   : > { %165 = vst [vmem:[%s713_s26 + $0x38] sm:$0xff] %v164_v7  ;;  %v182_v16 = vld [vmem:[%s708_s25 + $0x200] sm:$0xff]  ;;  %v184_v17 = vld [vmem:[%s708_s25 + $0x208] sm:$0xff] }
  0x18   : > { %167 = vst [vmem:[%s713_s26 + $0x40] sm:$0xff] %v166_v8  ;;  %v186_v18 = vld [vmem:[%s708_s25 + $0x240] sm:$0xff]  ;;  %v188_v19 = vld [vmem:[%s708_s25 + $0x248] sm:$0xff] }
  0x19   : > { %169 = vst [vmem:[%s713_s26 + $0x48] sm:$0xff] %v168_v9 }
  0x1a   : > { %171 = vst [vmem:[%s713_s26 + $0x50] sm:$0xff] %v170_v10 }
  0x1b   : > { %173 = vst [vmem:[%s713_s26 + $0x58] sm:$0xff] %v172_v11 }
  0x1c   : > { %175 = vst [vmem:[%s713_s26 + $0x60] sm:$0xff] %v174_v12 }
  0x1d   : > { %177 = vst [vmem:[%s713_s26 + $0x68] sm:$0xff] %v176_v13 }
  0x1e   : > { %179 = vst [vmem:[%s713_s26 + $0x70] sm:$0xff] %v178_v14 }
  0x1f   : > { %181 = vst [vmem:[%s713_s26 + $0x78] sm:$0xff] %v180_v15 }
  0x20   : > { %183 = vst [vmem:[%s713_s26 + $0x80] sm:$0xff] %v182_v16 }
  0x21   : > { %185 = vst [vmem:[%s713_s26 + $0x88] sm:$0xff] %v184_v17 }
  0x22   : > { %187 = vst [vmem:[%s713_s26 + $0x90] sm:$0xff] %v186_v18 }
  0x23   : > { %189 = vst [vmem:[%s713_s26 + $0x98] sm:$0xff] %v188_v19 }
  0x24 PF: > { %p491_p5 = scmp.ge.s32.totalorder %s651_s14, 1  ;;  %p194_p6 = scmp.lt.s32.totalorder %s651_s14, 5 }
  0x26   : > { %p195_p7 = pnand %p491_p5, %p194_p6 }
  0x27   : > { %s201_s27 = sand.u32 (!%p195_p7), 1, %s643_s12   ;;  %s492_s7 = sshll.u32 (!%p195_p7), %s485_s15, 2 }
  0x28   : > { %198 = sbr.rel (%p195_p7) target bundleno = 209 (0xd1), region = 51  ;;  %p226_p8 = scmp.lt.s32.totalorder (!%p195_p7), %s492_s7, 15 }
  0x29   : > { %s602_s30 = smul.u32 (!%p195_p7), 160, %s201_s27 }
  0x2b   : > { %s758_s4 = scalar_lea.vmem (!%p195_p7), [#allocation2], %s602_s30 }
  0x2d   : > { %v253_v20 = vld [vmem:[%s820_s2] sm:$0xff]  ;;  %v653_v21 = vmov 0   ;;  %v599_v23 = vld [vmem:[%s758_s4 + $0x8c] sm:$0xf0]  ;;  %v562_v26 = vld [vmem:[%s758_s4 + $0x90] sm:$0xf0] }
  0x2e   : > { %628 = vset.pattern.permute.xlu0 %v653_v21  ;;  %v560_v22 = vld [vmem:[%s758_s4 + $0x80] sm:$0xf]  ;;  %v597_v24 = vld [vmem:[%s758_s4 + $0x84] sm:$0xf]  ;;  %v568_v27 = vld [vmem:[%s758_s4 + $0x88] sm:$0xf] }
  0x2f   : > { %256 = vperm.xlu0 %628, %v253_v20   ;;  %v561_v25 = vor.u32 %v599_v23, %v560_v22  ;;  %v600_v28 = vld [vmem:[%s758_s4 + $0x94] sm:$0xf0]  ;;  %v565_v29 = vor.u32 %v597_v24, %v562_v26  ;;  %v598_v31 = vld [vmem:[%s758_s4 + $0x8c] sm:$0xf]  ;;  %v570_v32 = vld [vmem:[%s758_s4 + $0x98] sm:$0xf0] }
  0x30   : > { %v569_v30 = vor.u32 %v600_v28, %v568_v27  ;;  %v544_v33 = vld [vmem:[%s758_s4 + $0x60] sm:$0xf]  ;;  %v573_v34 = vor.u32 %v598_v31, %v570_v32  ;;  %v595_v35 = vld [vmem:[%s758_s4 + $0x6c] sm:$0xf0]  ;;  %v593_v36 = vld [vmem:[%s758_s4 + $0x64] sm:$0xf] }
  0x31   : > { %366 = vmatpush.bf16.msra.mxu0 %v561_v25  ;;  %v546_v37 = vld [vmem:[%s758_s4 + $0x70] sm:$0xf0]  ;;  %379 = vmatpush.bf16.msra.mxu1 %v565_v29  ;;  %v545_v38 = vor.u32 %v595_v35, %v544_v33  ;;  %v552_v40 = vld [vmem:[%s758_s4 + $0x68] sm:$0xf]  ;;  %v596_v41 = vld [vmem:[%s758_s4 + $0x74] sm:$0xf0] }
  0x32   : > { %392 = vmatpush.bf16.msra.mxu2 %v569_v30  ;;  %v549_v39 = vor.u32 %v593_v36, %v546_v37  ;;  %v594_v42 = vld [vmem:[%s758_s4 + $0x6c] sm:$0xf]  ;;  %405 = vmatpush.bf16.msra.mxu3 %v573_v34  ;;  %v553_v43 = vor.u32 %v596_v41, %v552_v40  ;;  %v554_v44 = vld [vmem:[%s758_s4 + $0x78] sm:$0xf0]  ;;  %v528_v45 = vld [vmem:[%s758_s4 + $0x40] sm:$0xf] }
  0x33   : > { %v591_v46 = vld [vmem:[%s758_s4 + $0x4c] sm:$0xf0]  ;;  %v557_v47 = vor.u32 %v594_v42, %v554_v44  ;;  %v589_v48 = vld [vmem:[%s758_s4 + $0x44] sm:$0xf]  ;;  %v530_v49 = vld [vmem:[%s758_s4 + $0x50] sm:$0xf0] }
  0x34   : > { %v536_v50 = vld [vmem:[%s758_s4 + $0x48] sm:$0xf]  ;;  %v529_v51 = vor.u32 %v591_v46, %v528_v45  ;;  %v592_v52 = vld [vmem:[%s758_s4 + $0x54] sm:$0xf0]  ;;  %v590_v53 = vld [vmem:[%s758_s4 + $0x4c] sm:$0xf]  ;;  %v533_v55 = vor.u32 %v589_v48, %v530_v49 }
  0x35   : > { %367 = vmatpush.bf16.msra.mxu0 %v545_v38  ;;  %v538_v54 = vld [vmem:[%s758_s4 + $0x58] sm:$0xf0]  ;;  %380 = vmatpush.bf16.msra.mxu1 %v549_v39  ;;  %v537_v56 = vor.u32 %v592_v52, %v536_v50  ;;  %v512_v57 = vld [vmem:[%s758_s4 + $0x20] sm:$0xf]  ;;  %v587_v58 = vld [vmem:[%s758_s4 + $0x2c] sm:$0xf0] }
  0x36   : > { %393 = vmatpush.bf16.msra.mxu2 %v553_v43  ;;  %v585_v59 = vld [vmem:[%s758_s4 + $0x24] sm:$0xf]  ;;  %406 = vmatpush.bf16.msra.mxu3 %v557_v47  ;;  %v541_v60 = vor.u32 %v590_v53, %v538_v54  ;;  %v514_v61 = vld [vmem:[%s758_s4 + $0x30] sm:$0xf0]  ;;  %v520_v62 = vld [vmem:[%s758_s4 + $0x28] sm:$0xf]  ;;  %v513_v2 = vor.u32 %v587_v58, %v512_v57 }
  0x37   : > { %v588_v63 = vld [vmem:[%s758_s4 + $0x34] sm:$0xf0]  ;;  %v586_v0 = vld [vmem:[%s758_s4 + $0x2c] sm:$0xf]  ;;  %v522_v1 = vld [vmem:[%s758_s4 + $0x38] sm:$0xf0]  ;;  %v517_v3 = vor.u32 %v585_v59, %v514_v61 }
  0x38   : > { %v521_v4 = vor.u32 %v588_v63, %v520_v62  ;;  %v496_v5 = vld [vmem:[%s758_s4] sm:$0xf]  ;;  %v583_v6 = vld [vmem:[%s758_s4 + $0xc] sm:$0xf0]  ;;  %v581_v7 = vld [vmem:[%s758_s4 + $0x4] sm:$0xf]  ;;  %v525_v8 = vor.u32 %v586_v0, %v522_v1 }
  0x39   : > { %368 = vmatpush.bf16.msra.mxu0 %v529_v51  ;;  %381 = vmatpush.bf16.msra.mxu1 %v533_v55  ;;  %v498_v9 = vld [vmem:[%s758_s4 + $0x10] sm:$0xf0]  ;;  %v504_v10 = vld [vmem:[%s758_s4 + $0x8] sm:$0xf]  ;;  %v584_v11 = vld [vmem:[%s758_s4 + $0x14] sm:$0xf0]  ;;  %v497_v14 = vor.u32 %v583_v6, %v496_v5 }
  0x3a   : > { %394 = vmatpush.bf16.msra.mxu2 %v537_v56  ;;  %407 = vmatpush.bf16.msra.mxu3 %v541_v60  ;;  %v582_v12 = vld [vmem:[%s758_s4 + $0xc] sm:$0xf]  ;;  %v506_v13 = vld [vmem:[%s758_s4 + $0x18] sm:$0xf0]  ;;  %v501_v15 = vor.u32 %v581_v7, %v498_v9  ;;  %v505_v16 = vor.u32 %v584_v11, %v504_v10  ;;  %v232_v18 = vld [vmem:[%s818_s0] sm:$0xf] }
  0x3b   : > { %v509_v17 = vor.u32 %v582_v12, %v506_v13  ;;  %vm359_vm0 = vcmask 654336   ;;  %s826_s7 = smov (!%p226_p8, %s492_s7), 15 }
  0x3c   : > { %s493_s8 = sshll.u32 %s826_s7, 3 }
  0x3d   : > { %369 = vmatpush.bf16.msra.mxu0 %v513_v2  ;;  %382 = vmatpush.bf16.msra.mxu1 %v517_v3  ;;  %s229_s11 = scalar_lea.vmem %s821_s3, %s493_s8 }
  0x3e   : > { %395 = vmatpush.bf16.msra.mxu2 %v521_v4  ;;  %408 = vmatpush.bf16.msra.mxu3 %v525_v8 }
  0x41   : > { %370 = vmatpush.bf16.msra.mxu0 %v497_v14  ;;  %383 = vmatpush.bf16.msra.mxu1 %v501_v15 }
  0x42   : > { %396 = vmatpush.bf16.msra.mxu2 %v505_v16  ;;  %409 = vmatpush.bf16.msra.mxu3 %v509_v17 }
  0x44   : > { %574 = vmatmul.msk.bf16.vlgmr.msra.gmra.mxu0 %vm359_vm0, %v232_v18  ;;  %575 = vmatmul.msk.bf16.vlgmr.msra.gmra.mxu1 %vm359_vm0, %v232_v18 }
  0x45   : > { %576 = vmatmul.msk.bf16.vlgmr.msra.gmra.mxu2 %vm359_vm0, %v232_v18  ;;  %577 = vmatmul.msk.bf16.vlgmr.msra.gmra.mxu3 %vm359_vm0, %v232_v18 }
  0xa1   : > { %v257_v19 = vpop.permute.xlu0 %256 }
  0xc1   : > { %v372_v20 = vpop.f32.mrf.mxu0  ;;  %v385_v21 = vpop.f32.mrf.mxu1 }
  0xc2   : > { %v373_v22 = vadd.f32 %v372_v20, %v257_v19  ;;  %v386_v23 = vadd.f32 %v385_v21, %v257_v19 }
  0xc4   : > { %v415_v24 = vmax.f32 %v373_v22, 0.0  ;;  %v416_v25 = vmax.f32 %v386_v23, 0.0 }
  0xc6   : > { %419 = vst [vmem:[%s229_s11] sm:$0xff] %v415_v24 }
  0xc7   : > { %420 = vst [vmem:[%s229_s11 + $0x8] sm:$0xff] %v416_v25 }
  0xc8   : > { %v398_v26 = vpop.f32.mrf.mxu2  ;;  %v411_v28 = vpop.f32.mrf.mxu3 }
  0xc9   : > { %v399_v27 = vadd.f32 %v398_v26, %v257_v19  ;;  %v374_v29 = vpop.f32.mrf.mxu0  ;;  %v412_v30 = vadd.f32 %v411_v28, %v257_v19  ;;  %v387_v31 = vpop.f32.mrf.mxu1 }
  0xcb   : > { %v417_v32 = vmax.f32 %v399_v27, 0.0  ;;  %v418_v33 = vmax.f32 %v412_v30, 0.0 }
  0xcd   : > { %421 = vst [vmem:[%s229_s11 + $0x10] sm:$0xff] %v417_v32 }
  0xce   : > { %422 = vst [vmem:[%s229_s11 + $0x18] sm:$0xff] %v418_v33 }
  0xd0   : > { %v400_v34 = vpop.f32.mrf.mxu2  ;;  %v413_v35 = vpop.f32.mrf.mxu3 }
  0xd1 PF: > { %p10_p9 = scmp.ge.s32.totalorder %s691_s16, 6   ;;  %s822_s12 = smov %s647_s13 }
  0xd2   : > { %s823_s13 = smov %s700_s19  ;;  %s824_s14 = smov %s691_s16 }
  0xd3   :  { %12 = sbr.rel (!%p10_p9) target bundleno = 2 (0x2), region = 90 }

// kernel: net_forward.42
= control target key start
LH: loop header
LB: loop body
LE: loop exit
PB: predicated region body
PF: predicated region fallthrough
CT: control target
= control target key end

     0   :  { %vm350_vm0 = vcmask 654336   ;;  %s1153_s1 = inlined_call_operand.vmem [shape: bf16[208,512], index: 1, kind: input, shape index: {}]   ;;  %s1154_s0 = inlined_call_operand.vmem [shape: bf16[16,208], index: 0, kind: input, shape index: {}]   ;;  %s1155_s2 = inlined_call_operand.vmem [shape: f32[16,1], index: 2, kind: input, shape index: {}]   ;;  %s1156_s3 = inlined_call_operand.vmem [shape: f32[16,512], index: 3, kind: output, shape index: {}]  }
   0x1   :  { %v608_v0 = vld [vmem:[%s1153_s1 + $0xe0] sm:$0xf]  ;;  %v738_v1 = vld [vmem:[%s1153_s1 + $0xec] sm:$0xf0]  ;;  %v736_v2 = vld [vmem:[%s1153_s1 + $0xe4] sm:$0xf] }
   0x2   :  { %v609_v3 = vor.u32 %v738_v1, %v608_v0  ;;  %v610_v4 = vld [vmem:[%s1153_s1 + $0xf0] sm:$0xf0]  ;;  %v592_v5 = vld [vmem:[%s1153_s1 + $0xc0] sm:$0xf]  ;;  %v734_v6 = vld [vmem:[%s1153_s1 + $0xcc] sm:$0xf0] }
   0x3   :  { %v613_v7 = vor.u32 %v736_v2, %v610_v4  ;;  %v688_v8 = vld [vmem:[%s1153_s1 + $0x180] sm:$0xf]  ;;  %v758_v9 = vld [vmem:[%s1153_s1 + $0x18c] sm:$0xf0]  ;;  %v732_v10 = vld [vmem:[%s1153_s1 + $0xc4] sm:$0xf]  ;;  %v593_v11 = vor.u32 %v734_v6, %v592_v5 }
   0x4   :  { %354 = vmatpush.bf16.msra.mxu0 %v609_v3  ;;  %v689_v12 = vor.u32 %v758_v9, %v688_v8  ;;  %v594_v13 = vld [vmem:[%s1153_s1 + $0xd0] sm:$0xf0]  ;;  %v576_v14 = vld [vmem:[%s1153_s1 + $0xa0] sm:$0xf]  ;;  %v730_v16 = vld [vmem:[%s1153_s1 + $0xac] sm:$0xf0] }
   0x5   :  { %382 = vmatpush.bf16.msra.mxu2 %v613_v7  ;;  %v597_v15 = vor.u32 %v732_v10, %v594_v13  ;;  %v672_v17 = vld [vmem:[%s1153_s1 + $0x160] sm:$0xf]  ;;  %v754_v18 = vld [vmem:[%s1153_s1 + $0x16c] sm:$0xf0]  ;;  %v728_v20 = vld [vmem:[%s1153_s1 + $0xa4] sm:$0xf]  ;;  %v577_v24 = vor.u32 %v730_v16, %v576_v14 }
   0x6   :  { %371 = vmatpush.bf16.msra.mxu1 %v689_v12  ;;  %v673_v19 = vor.u32 %v754_v18, %v672_v17  ;;  %v578_v21 = vld [vmem:[%s1153_s1 + $0xb0] sm:$0xf0]  ;;  %v656_v22 = vld [vmem:[%s1153_s1 + $0x140] sm:$0xf]  ;;  %v750_v23 = vld [vmem:[%s1153_s1 + $0x14c] sm:$0xf0] }
   0x7   :  { %v756_v25 = vld [vmem:[%s1153_s1 + $0x184] sm:$0xf]  ;;  %v690_v26 = vld [vmem:[%s1153_s1 + $0x190] sm:$0xf0]  ;;  %v581_v27 = vor.u32 %v728_v20, %v578_v21  ;;  %v560_v28 = vld [vmem:[%s1153_s1 + $0x80] sm:$0xf]  ;;  %v657_v31 = vor.u32 %v750_v23, %v656_v22 }
   0x8   :  { %355 = vmatpush.bf16.msra.mxu0 %v593_v11  ;;  %v726_v29 = vld [vmem:[%s1153_s1 + $0x8c] sm:$0xf0]  ;;  %v693_v30 = vor.u32 %v756_v25, %v690_v26  ;;  %v724_v32 = vld [vmem:[%s1153_s1 + $0x84] sm:$0xf]  ;;  %v562_v33 = vld [vmem:[%s1153_s1 + $0x90] sm:$0xf0] }
   0x9   :  { %383 = vmatpush.bf16.msra.mxu2 %v597_v15  ;;  %v640_v34 = vld [vmem:[%s1153_s1 + $0x120] sm:$0xf]  ;;  %v746_v35 = vld [vmem:[%s1153_s1 + $0x12c] sm:$0xf0]  ;;  %v752_v36 = vld [vmem:[%s1153_s1 + $0x164] sm:$0xf]  ;;  %v561_v38 = vor.u32 %v726_v29, %v560_v28  ;;  %v565_v40 = vor.u32 %v724_v32, %v562_v33 }
   0xa   :  { %372 = vmatpush.bf16.msra.mxu1 %v673_v19  ;;  %399 = vmatpush.bf16.msra.mxu3 %v693_v30  ;;  %v674_v37 = vld [vmem:[%s1153_s1 + $0x170] sm:$0xf0]  ;;  %v544_v41 = vld [vmem:[%s1153_s1 + $0x60] sm:$0xf]  ;;  %v722_v42 = vld [vmem:[%s1153_s1 + $0x6c] sm:$0xf0]  ;;  %v641_v44 = vor.u32 %v746_v35, %v640_v34 }
   0xb   :  { %v677_v39 = vor.u32 %v752_v36, %v674_v37  ;;  %v748_v43 = vld [vmem:[%s1153_s1 + $0x144] sm:$0xf]  ;;  %v546_v46 = vld [vmem:[%s1153_s1 + $0x70] sm:$0xf0]  ;;  %v624_v48 = vld [vmem:[%s1153_s1 + $0x100] sm:$0xf]  ;;  %v545_v52 = vor.u32 %v722_v42, %v544_v41 }
   0xc   :  { %356 = vmatpush.bf16.msra.mxu0 %v577_v24  ;;  %v720_v45 = vld [vmem:[%s1153_s1 + $0x64] sm:$0xf]  ;;  %v658_v47 = vld [vmem:[%s1153_s1 + $0x150] sm:$0xf0]  ;;  %v742_v49 = vld [vmem:[%s1153_s1 + $0x10c] sm:$0xf0] }
   0xd   :  { %384 = vmatpush.bf16.msra.mxu2 %v581_v27  ;;  %v661_v50 = vor.u32 %v748_v43, %v658_v47  ;;  %v616_v51 = vld [vmem:[%s1153_s1 + $0xe8] sm:$0xf]  ;;  %v739_v53 = vld [vmem:[%s1153_s1 + $0xf4] sm:$0xf0]  ;;  %v744_v54 = vld [vmem:[%s1153_s1 + $0x124] sm:$0xf]  ;;  %v549_v56 = vor.u32 %v720_v45, %v546_v46  ;;  %v625_v59 = vor.u32 %v742_v49, %v624_v48 }
   0xe   :  { %373 = vmatpush.bf16.msra.mxu1 %v657_v31  ;;  %400 = vmatpush.bf16.msra.mxu3 %v677_v39  ;;  %v642_v55 = vld [vmem:[%s1153_s1 + $0x130] sm:$0xf0]  ;;  %v528_v57 = vld [vmem:[%s1153_s1 + $0x40] sm:$0xf]  ;;  %v718_v58 = vld [vmem:[%s1153_s1 + $0x4c] sm:$0xf0]  ;;  %v617_v62 = vor.u32 %v739_v53, %v616_v51 }
   0xf   :  { %v716_v60 = vld [vmem:[%s1153_s1 + $0x44] sm:$0xf]  ;;  %v530_v61 = vld [vmem:[%s1153_s1 + $0x50] sm:$0xf0]  ;;  %v512_v63 = vld [vmem:[%s1153_s1 + $0x20] sm:$0xf]  ;;  %v645_v0 = vor.u32 %v744_v54, %v642_v55  ;;  %v529_v2 = vor.u32 %v718_v58, %v528_v57 }
  0x10   :  { %357 = vmatpush.bf16.msra.mxu0 %v561_v38  ;;  %v600_v1 = vld [vmem:[%s1153_s1 + $0xc8] sm:$0xf]  ;;  %v735_v3 = vld [vmem:[%s1153_s1 + $0xd4] sm:$0xf0]  ;;  %v740_v4 = vld [vmem:[%s1153_s1 + $0x104] sm:$0xf]  ;;  %v533_v6 = vor.u32 %v716_v60, %v530_v61 }
  0x11   :  { %385 = vmatpush.bf16.msra.mxu2 %v565_v40  ;;  %v626_v5 = vld [vmem:[%s1153_s1 + $0x110] sm:$0xf0]  ;;  %v714_v7 = vld [vmem:[%s1153_s1 + $0x2c] sm:$0xf0]  ;;  %v696_v8 = vld [vmem:[%s1153_s1 + $0x188] sm:$0xf]  ;;  %v601_v12 = vor.u32 %v735_v3, %v600_v1 }
  0x12   :  { %374 = vmatpush.bf16.msra.mxu1 %v641_v44  ;;  %401 = vmatpush.bf16.msra.mxu3 %v661_v50  ;;  %v759_v9 = vld [vmem:[%s1153_s1 + $0x194] sm:$0xf0]  ;;  %v712_v10 = vld [vmem:[%s1153_s1 + $0x24] sm:$0xf]  ;;  %v514_v11 = vld [vmem:[%s1153_s1 + $0x30] sm:$0xf0]  ;;  %v629_v15 = vor.u32 %v740_v4, %v626_v5  ;;  %v513_v18 = vor.u32 %v714_v7, %v512_v63 }
  0x13   :  { %v496_v13 = vld [vmem:[%s1153_s1] sm:$0xf]  ;;  %v710_v14 = vld [vmem:[%s1153_s1 + $0xc] sm:$0xf0]  ;;  %v706_v16 = vld [vmem:[%s1154_s0 + $0x4] sm:$0xf]  ;;  %v697_v22 = vor.u32 %v759_v9, %v696_v8  ;;  %v517_v25 = vor.u32 %v712_v10, %v514_v11 }
  0x14   :  { %358 = vmatpush.bf16.msra.mxu0 %v545_v52  ;;  %v490_v17 = vld [vmem:[%s1154_s0 + $0x8] sm:$0xf0]  ;;  %v708_v19 = vld [vmem:[%s1153_s1 + $0x4] sm:$0xf]  ;;  %v584_v20 = vld [vmem:[%s1153_s1 + $0xa8] sm:$0xf]  ;;  %v497_v34 = vor.u32 %v710_v14, %v496_v13 }
  0x15   :  { %386 = vmatpush.bf16.msra.mxu2 %v549_v56  ;;  %v731_v21 = vld [vmem:[%s1153_s1 + $0xb4] sm:$0xf0]  ;;  %v966_v23 = vor.u32 %v706_v16, %v490_v17  ;;  %v762_v24 = vmov 0   ;;  %v680_v26 = vld [vmem:[%s1153_s1 + $0x168] sm:$0xf]  ;;  %v69_v54 = vld [vmem:[%s1155_s2] sm:$0xff] }
  0x16   :  { %375 = vmatpush.bf16.msra.mxu1 %v625_v59  ;;  %402 = vmatpush.bf16.msra.mxu3 %v645_v0  ;;  %v755_v27 = vld [vmem:[%s1153_s1 + $0x174] sm:$0xf0]  ;;  %v498_v28 = vld [vmem:[%s1153_s1 + $0x10] sm:$0xf0]  ;;  %v737_v29 = vld [vmem:[%s1153_s1 + $0xec] sm:$0xf]  ;;  %v585_v31 = vor.u32 %v731_v21, %v584_v20 }
  0x17   :  { %761 = vset.pattern.permute.xlu0 %v762_v24  ;;  %v618_v30 = vld [vmem:[%s1153_s1 + $0xf8] sm:$0xf0]  ;;  %v757_v32 = vld [vmem:[%s1153_s1 + $0x18c] sm:$0xf]  ;;  %v488_v35 = vld [vmem:[%s1154_s0] sm:$0xf]  ;;  %v681_v38 = vor.u32 %v755_v27, %v680_v26  ;;  %v501_v39 = vor.u32 %v708_v19, %v498_v28 }
  0x18   :  { %359 = vmatpush.bf16.msra.mxu0 %v529_v2  ;;  %v698_v33 = vld [vmem:[%s1153_s1 + $0x198] sm:$0xf0]  ;;  %v568_v36 = vld [vmem:[%s1153_s1 + $0x88] sm:$0xf]  ;;  %v727_v37 = vld [vmem:[%s1153_s1 + $0x94] sm:$0xf0]  ;;  %v621_v40 = vor.u32 %v737_v29, %v618_v30  ;;  %73 = vperm.xlu0 %761, %v69_v54  }
  0x19   :  { %387 = vmatpush.bf16.msra.mxu2 %v533_v6  ;;  %702 = vmatmul.msk.bf16.vlgmr.msra.gmra.mxu1 %vm350_vm0, %v966_v23  ;;  %v707_v41 = vld [vmem:[%s1154_s0 + $0x4] sm:$0xf0]  ;;  %v751_v43 = vld [vmem:[%s1153_s1 + $0x154] sm:$0xf0]  ;;  %v701_v44 = vor.u32 %v757_v32, %v698_v33  ;;  %v733_v45 = vld [vmem:[%s1153_s1 + $0xcc] sm:$0xf]  ;;  %v569_v47 = vor.u32 %v727_v37, %v568_v36 }
  0x1a   :  { %410 = vmatpush.bf16.msrb.mxu1 %v617_v62  ;;  %403 = vmatpush.bf16.msra.mxu3 %v629_v15  ;;  %v664_v42 = vld [vmem:[%s1153_s1 + $0x148] sm:$0xf]  ;;  %v602_v46 = vld [vmem:[%s1153_s1 + $0xd8] sm:$0xf0]  ;;  %v753_v48 = vld [vmem:[%s1153_s1 + $0x16c] sm:$0xf]  ;;  %v1023_v50 = vor.u32 %v707_v41, %v488_v35 }
  0x1b   :  { %v682_v49 = vld [vmem:[%s1153_s1 + $0x178] sm:$0xf0]  ;;  %v552_v51 = vld [vmem:[%s1153_s1 + $0x68] sm:$0xf]  ;;  %v723_v52 = vld [vmem:[%s1153_s1 + $0x74] sm:$0xf0]  ;;  %v665_v53 = vor.u32 %v751_v43, %v664_v42  ;;  %v605_v55 = vor.u32 %v733_v45, %v602_v46 }
  0x1c   :  { %360 = vmatpush.bf16.msra.mxu0 %v513_v18  ;;  %v648_v56 = vld [vmem:[%s1153_s1 + $0x128] sm:$0xf]  ;;  %v747_v57 = vld [vmem:[%s1153_s1 + $0x134] sm:$0xf0]  ;;  %v685_v58 = vor.u32 %v753_v48, %v682_v49  ;;  %v729_v59 = vld [vmem:[%s1153_s1 + $0xac] sm:$0xf]  ;;  %v553_v61 = vor.u32 %v723_v52, %v552_v51 }
  0x1d   :  { %388 = vmatpush.bf16.msra.mxu2 %v517_v25  ;;  %703 = vmatmul.msk.bf16.vlgmr.msra.gmra.mxu3 %vm350_vm0, %v966_v23  ;;  %v586_v60 = vld [vmem:[%s1153_s1 + $0xb8] sm:$0xf0]  ;;  %v749_v62 = vld [vmem:[%s1153_s1 + $0x14c] sm:$0xf]  ;;  %v536_v0 = vld [vmem:[%s1153_s1 + $0x48] sm:$0xf]  ;;  %v649_v2 = vor.u32 %v747_v57, %v648_v56 }
  0x1e   :  { %411 = vmatpush.bf16.msrb.mxu1 %v601_v12  ;;  %427 = vmatpush.bf16.msrb.mxu3 %v697_v22  ;;  %v666_v63 = vld [vmem:[%s1153_s1 + $0x158] sm:$0xf0]  ;;  %v719_v1 = vld [vmem:[%s1153_s1 + $0x54] sm:$0xf0]  ;;  %v589_v3 = vor.u32 %v729_v59, %v586_v60  ;;  %v632_v4 = vld [vmem:[%s1153_s1 + $0x108] sm:$0xf] }
  0x1f   :  { %v743_v5 = vld [vmem:[%s1153_s1 + $0x114] sm:$0xf0]  ;;  %v669_v6 = vor.u32 %v749_v62, %v666_v63  ;;  %v725_v7 = vld [vmem:[%s1153_s1 + $0x8c] sm:$0xf]  ;;  %v570_v8 = vld [vmem:[%s1153_s1 + $0x98] sm:$0xf0]  ;;  %v537_v9 = vor.u32 %v719_v1, %v536_v0 }
  0x20   :  { %361 = vmatpush.bf16.msra.mxu0 %v497_v34  ;;  %v745_v10 = vld [vmem:[%s1153_s1 + $0x12c] sm:$0xf]  ;;  %v650_v11 = vld [vmem:[%s1153_s1 + $0x138] sm:$0xf0]  ;;  %v520_v13 = vld [vmem:[%s1153_s1 + $0x28] sm:$0xf]  ;;  %v633_v15 = vor.u32 %v743_v5, %v632_v4  ;;  %v573_v16 = vor.u32 %v725_v7, %v570_v8 }
  0x21   :  { %389 = vmatpush.bf16.msra.mxu2 %v501_v39  ;;  %v70_v12 = vld [vmem:[%s1155_s2 + $0x8] sm:$0xff]  ;;  %v715_v14 = vld [vmem:[%s1153_s1 + $0x34] sm:$0xf0]  ;;  %v653_v17 = vor.u32 %v745_v10, %v650_v11  ;;  %v554_v19 = vld [vmem:[%s1153_s1 + $0x78] sm:$0xf0] }
  0x22   :  { %412 = vmatpush.bf16.msrb.mxu1 %v585_v31  ;;  %428 = vmatpush.bf16.msrb.mxu3 %v681_v38  ;;  %v721_v18 = vld [vmem:[%s1153_s1 + $0x6c] sm:$0xf]  ;;  %v521_v20 = vor.u32 %v715_v14, %v520_v13  ;;  %v634_v22 = vld [vmem:[%s1153_s1 + $0x118] sm:$0xf0]  ;;  %v504_v24 = vld [vmem:[%s1153_s1 + $0x8] sm:$0xf] }
  0x23   :  { %362 = vmatmul.bf16.vlgmr.msra.gmra.mxu0 %v1023_v50  ;;  %78 = vperm.xlu0 %761, %v70_v12   ;;  %v741_v21 = vld [vmem:[%s1153_s1 + $0x10c] sm:$0xf]  ;;  %v711_v25 = vld [vmem:[%s1153_s1 + $0x14] sm:$0xf0]  ;;  %v557_v26 = vor.u32 %v721_v18, %v554_v19  ;;  %v538_v29 = vld [vmem:[%s1153_s1 + $0x58] sm:$0xf0] }
  0x24   :  { %438 = vmatpush.bf16.msrb.mxu0 %v621_v40  ;;  %390 = vmatmul.bf16.vlgmr.msra.gmra.mxu2 %v1023_v50  ;;  %v637_v27 = vor.u32 %v741_v21, %v634_v22  ;;  %v717_v28 = vld [vmem:[%s1153_s1 + $0x4c] sm:$0xf]  ;;  %v505_v30 = vor.u32 %v711_v25, %v504_v24  ;;  %v522_v33 = vld [vmem:[%s1153_s1 + $0x38] sm:$0xf0] }
  0x25   :  { %455 = vmatpush.bf16.msrb.mxu2 %v701_v44  ;;  %v541_v31 = vor.u32 %v717_v28, %v538_v29  ;;  %v713_v32 = vld [vmem:[%s1153_s1 + $0x2c] sm:$0xf]  ;;  %v506_v36 = vld [vmem:[%s1153_s1 + $0x18] sm:$0xf0] }
  0x26   :  { %413 = vmatpush.bf16.msrb.mxu1 %v569_v47  ;;  %429 = vmatpush.bf16.msrb.mxu3 %v665_v53  ;;  %v525_v34 = vor.u32 %v713_v32, %v522_v33  ;;  %v709_v35 = vld [vmem:[%s1153_s1 + $0xc] sm:$0xf] }
  0x27   :  { %v509_v37 = vor.u32 %v709_v35, %v506_v36 }
  0x28   :  { %439 = vmatpush.bf16.msrb.mxu0 %v605_v55 }
  0x29   :  { %456 = vmatpush.bf16.msrb.mxu2 %v685_v58 }
  0x2a   :  { %414 = vmatpush.bf16.msrb.mxu1 %v553_v61  ;;  %430 = vmatpush.bf16.msrb.mxu3 %v649_v2 }
  0x2c   :  { %440 = vmatpush.bf16.msrb.mxu0 %v589_v3 }
  0x2d   :  { %457 = vmatpush.bf16.msrb.mxu2 %v669_v6 }
  0x2e   :  { %415 = vmatpush.bf16.msrb.mxu1 %v537_v9  ;;  %431 = vmatpush.bf16.msrb.mxu3 %v633_v15 }
  0x30   :  { %441 = vmatpush.bf16.msrb.mxu0 %v573_v16 }
  0x31   :  { %458 = vmatpush.bf16.msrb.mxu2 %v653_v17  ;;  %704 = vmatmul.msk.bf16.vlgmr.msrb.gmra.mxu3 %vm350_vm0, %v966_v23 }
  0x32   :  { %416 = vmatpush.bf16.msrb.mxu1 %v521_v20 }
  0x34   :  { %442 = vmatpush.bf16.msrb.mxu0 %v557_v26 }
  0x35   :  { %459 = vmatpush.bf16.msrb.mxu2 %v637_v27 }
  0x36   :  { %417 = vmatpush.bf16.msrb.mxu1 %v505_v30 }
  0x38   :  { %705 = vmatmul.msk.bf16.vlgmr.msrb.gmra.mxu2 %vm350_vm0, %v966_v23  ;;  %443 = vmatpush.bf16.msrb.mxu0 %v541_v31 }
  0x39   :  { %418 = vmatmul.bf16.vlgmr.msrb.gmra.mxu1 %v1023_v50 }
  0x3c   :  { %444 = vmatpush.bf16.msrb.mxu0 %v525_v34 }
  0x40   :  { %445 = vmatpush.bf16.msrb.mxu0 %v509_v37 }
  0x43   :  { %446 = vmatmul.bf16.vlgmr.msrb.gmra.mxu0 %v1023_v50 }
  0x8a   :  { %v74_v38 = vpop.permute.xlu0 %73 }
  0x95   :  { %v79_v44 = vpop.permute.xlu0 %78 }
  0x96   :  { %v377_v39 = vpop.f32.mrf.mxu1 }
  0x9e   :  { %v379_v48 = vpop.f32.mrf.mxu1 }
  0xa0   :  { %v363_v23 = vpop.f32.mrf.mxu0  ;;  %v405_v41 = vpop.f32.mrf.mxu3 }
  0xa1   :  { %v364_v40 = vadd.f32 %v363_v23, %v74_v38 }
  0xa3   :  { %v378_v42 = vadd.f32 %v377_v39, %v364_v40 }
  0xa5   :  { %v466_v43 = vmax.f32 %v378_v42, 0.0 }
  0xa7   :  { %474 = vst [vmem:[%s1156_s3] sm:$0xff] %v466_v43  ;;  %v391_v45 = vpop.f32.mrf.mxu2 }
  0xa8   :  { %v392_v46 = vadd.f32 %v391_v45, %v74_v38  ;;  %v365_v47 = vpop.f32.mrf.mxu0  ;;  %v407_v51 = vpop.f32.mrf.mxu3 }
  0xa9   :  { %v366_v49 = vadd.f32 %v365_v47, %v79_v44 }
  0xaa   :  { %v406_v52 = vadd.f32 %v405_v41, %v392_v46 }
  0xab   :  { %v380_v50 = vadd.f32 %v379_v48, %v366_v49 }
  0xac   :  { %v467_v53 = vmax.f32 %v406_v52, 0.0 }
  0xad   :  { %v470_v54 = vmax.f32 %v380_v50, 0.0 }
  0xae   :  { %475 = vst [vmem:[%s1156_s3 + $0x8] sm:$0xff] %v467_v53 }
  0xaf   :  { %478 = vst [vmem:[%s1156_s3 + $0x20] sm:$0xff] %v470_v54  ;;  %v393_v55 = vpop.f32.mrf.mxu2 }
  0xb0   :  { %v394_v56 = vadd.f32 %v393_v55, %v79_v44 }
  0xb2   :  { %v408_v57 = vadd.f32 %v407_v51, %v394_v56 }
  0xb4   :  { %v433_v58 = vpop.f32.mrf.mxu3  ;;  %v471_v60 = vmax.f32 %v408_v57, 0.0 }
  0xb6   :  { %v419_v59 = vpop.f32.mrf.mxu1  ;;  %479 = vst [vmem:[%s1156_s3 + $0x28] sm:$0xff] %v471_v60 }
  0xb7   :  { %v420_v61 = vadd.f32 %v419_v59, %v74_v38 }
  0xb9   :  { %v434_v62 = vadd.f32 %v433_v58, %v420_v61 }
  0xbb   :  { %v468_v63 = vmax.f32 %v434_v62, 0.0  ;;  %v461_v3 = vpop.f32.mrf.mxu2 }
  0xbc   :  { %v435_v1 = vpop.f32.mrf.mxu3 }
  0xbd   :  { %476 = vst [vmem:[%s1156_s3 + $0x10] sm:$0xff] %v468_v63 }
  0xbe   :  { %v421_v0 = vpop.f32.mrf.mxu1 }
  0xbf   :  { %v422_v2 = vadd.f32 %v421_v0, %v79_v44 }
  0xc0   :  { %v447_v4 = vpop.f32.mrf.mxu0 }
  0xc1   :  { %v448_v5 = vadd.f32 %v447_v4, %v74_v38  ;;  %v436_v6 = vadd.f32 %v435_v1, %v422_v2 }
  0xc3   :  { %v462_v7 = vadd.f32 %v461_v3, %v448_v5  ;;  %v472_v8 = vmax.f32 %v436_v6, 0.0  ;;  %v463_v12 = vpop.f32.mrf.mxu2 }
  0xc5   :  { %v469_v9 = vmax.f32 %v462_v7, 0.0  ;;  %480 = vst [vmem:[%s1156_s3 + $0x30] sm:$0xff] %v472_v8 }
  0xc7   :  { %477 = vst [vmem:[%s1156_s3 + $0x18] sm:$0xff] %v469_v9 }
  0xc8   :  { %v449_v10 = vpop.f32.mrf.mxu0 }
  0xc9   :  { %v450_v11 = vadd.f32 %v449_v10, %v79_v44 }
  0xcb   :  { %v464_v13 = vadd.f32 %v463_v12, %v450_v11 }
  0xcd   :  { %v473_v14 = vmax.f32 %v464_v13, 0.0 }
  0xcf   :  { %481 = vst [vmem:[%s1156_s3 + $0x38] sm:$0xff] %v473_v14 }

// kernel: net_forward.43
= control target key start
LH: loop header
LB: loop body
LE: loop exit
PB: predicated region body
PF: predicated region fallthrough
CT: control target
= control target key end

     0   :  { %vm254_vm0 = vcmask 130048   ;;  %s875_s1 = inlined_call_operand.vmem [shape: bf16[144,512], index: 1, kind: input, shape index: {}]   ;;  %s876_s0 = inlined_call_operand.vmem [shape: bf16[16,144], index: 0, kind: input, shape index: {}]   ;;  %s877_s2 = inlined_call_operand.vmem [shape: f32[16,1], index: 2, kind: input, shape index: {}]   ;;  %s878_s3 = inlined_call_operand.vmem [shape: f32[16,512], index: 3, kind: output, shape index: {}]  }
   0x1   :  { %v512_v0 = vld [vmem:[%s875_s1 + $0xe0] sm:$0xf]  ;;  %v578_v1 = vld [vmem:[%s875_s1 + $0xec] sm:$0xf0]  ;;  %v576_v5 = vld [vmem:[%s875_s1 + $0xe4] sm:$0xf] }
   0x2   :  { %v528_v2 = vld [vmem:[%s875_s1 + $0x100] sm:$0xf]  ;;  %v513_v3 = vor.u32 %v578_v1, %v512_v0  ;;  %v582_v4 = vld [vmem:[%s875_s1 + $0x10c] sm:$0xf0]  ;;  %v514_v6 = vld [vmem:[%s875_s1 + $0xf0] sm:$0xf0] }
   0x3   :  { %v529_v7 = vor.u32 %v582_v4, %v528_v2  ;;  %v517_v8 = vor.u32 %v576_v5, %v514_v6  ;;  %v520_v9 = vld [vmem:[%s875_s1 + $0xe8] sm:$0xf]  ;;  %v579_v10 = vld [vmem:[%s875_s1 + $0xf4] sm:$0xf0]  ;;  %v496_v11 = vld [vmem:[%s875_s1 + $0xc0] sm:$0xf] }
   0x4   :  { %258 = vmatpush.bf16.msra.mxu0 %v513_v3  ;;  %v521_v12 = vor.u32 %v579_v10, %v520_v9  ;;  %v574_v13 = vld [vmem:[%s875_s1 + $0xcc] sm:$0xf0]  ;;  %v572_v14 = vld [vmem:[%s875_s1 + $0xc4] sm:$0xf]  ;;  %v498_v15 = vld [vmem:[%s875_s1 + $0xd0] sm:$0xf0] }
   0x5   :  { %279 = vmatpush.bf16.msra.mxu1 %v529_v7  ;;  %286 = vmatpush.bf16.msra.mxu2 %v517_v8  ;;  %v497_v16 = vor.u32 %v574_v13, %v496_v11  ;;  %v501_v17 = vor.u32 %v572_v14, %v498_v15  ;;  %v504_v18 = vld [vmem:[%s875_s1 + $0xc8] sm:$0xf]  ;;  %v575_v19 = vld [vmem:[%s875_s1 + $0xd4] sm:$0xf0]  ;;  %v577_v23 = vld [vmem:[%s875_s1 + $0xec] sm:$0xf] }
   0x6   :  { %v536_v20 = vld [vmem:[%s875_s1 + $0x108] sm:$0xf]  ;;  %v505_v21 = vor.u32 %v575_v19, %v504_v18  ;;  %v583_v22 = vld [vmem:[%s875_s1 + $0x114] sm:$0xf0]  ;;  %v522_v24 = vld [vmem:[%s875_s1 + $0xf8] sm:$0xf0] }
   0x7   :  { %v537_v25 = vor.u32 %v583_v22, %v536_v20  ;;  %v525_v26 = vor.u32 %v577_v23, %v522_v24  ;;  %v480_v27 = vld [vmem:[%s875_s1 + $0xa0] sm:$0xf]  ;;  %v570_v28 = vld [vmem:[%s875_s1 + $0xac] sm:$0xf0]  ;;  %v568_v29 = vld [vmem:[%s875_s1 + $0xa4] sm:$0xf] }
   0x8   :  { %259 = vmatpush.bf16.msra.mxu0 %v497_v16  ;;  %v481_v30 = vor.u32 %v570_v28, %v480_v27  ;;  %v482_v31 = vld [vmem:[%s875_s1 + $0xb0] sm:$0xf0]  ;;  %v488_v32 = vld [vmem:[%s875_s1 + $0xa8] sm:$0xf]  ;;  %v571_v33 = vld [vmem:[%s875_s1 + $0xb4] sm:$0xf0] }
   0x9   :  { %314 = vmatpush.bf16.msrb.mxu1 %v521_v12  ;;  %287 = vmatpush.bf16.msra.mxu2 %v501_v17  ;;  %v485_v34 = vor.u32 %v568_v29, %v482_v31  ;;  %v573_v35 = vld [vmem:[%s875_s1 + $0xcc] sm:$0xf]  ;;  %v506_v36 = vld [vmem:[%s875_s1 + $0xd8] sm:$0xf0]  ;;  %v464_v37 = vld [vmem:[%s875_s1 + $0x80] sm:$0xf]  ;;  %v489_v38 = vor.u32 %v571_v33, %v488_v32 }
   0xa   :  { %335 = vmatpush.bf16.msra.mxu3 %v537_v25  ;;  %v509_v39 = vor.u32 %v573_v35, %v506_v36  ;;  %v566_v40 = vld [vmem:[%s875_s1 + $0x8c] sm:$0xf0]  ;;  %v564_v41 = vld [vmem:[%s875_s1 + $0x84] sm:$0xf]  ;;  %v466_v42 = vld [vmem:[%s875_s1 + $0x90] sm:$0xf0] }
   0xb   :  { %v472_v43 = vld [vmem:[%s875_s1 + $0x88] sm:$0xf]  ;;  %v567_v44 = vld [vmem:[%s875_s1 + $0x94] sm:$0xf0]  ;;  %v569_v45 = vld [vmem:[%s875_s1 + $0xac] sm:$0xf]  ;;  %v465_v46 = vor.u32 %v566_v40, %v464_v37  ;;  %v469_v49 = vor.u32 %v564_v41, %v466_v42 }
   0xc   :  { %260 = vmatpush.bf16.msra.mxu0 %v481_v30  ;;  %v490_v47 = vld [vmem:[%s875_s1 + $0xb8] sm:$0xf0]  ;;  %v448_v48 = vld [vmem:[%s875_s1 + $0x60] sm:$0xf]  ;;  %v562_v50 = vld [vmem:[%s875_s1 + $0x6c] sm:$0xf0]  ;;  %v473_v53 = vor.u32 %v567_v44, %v472_v43 }
   0xd   :  { %315 = vmatpush.bf16.msrb.mxu1 %v505_v21  ;;  %288 = vmatpush.bf16.msra.mxu2 %v485_v34  ;;  %v546_v51 = vld [vmem:[%s876_s0 + $0x4] sm:$0xf]  ;;  %v394_v52 = vld [vmem:[%s876_s0 + $0x8] sm:$0xf0]  ;;  %v493_v54 = vor.u32 %v569_v45, %v490_v47  ;;  %v450_v57 = vld [vmem:[%s875_s1 + $0x70] sm:$0xf0]  ;;  %v449_v62 = vor.u32 %v562_v50, %v448_v48 }
   0xe   :  { %342 = vmatpush.bf16.msrb.mxu3 %v525_v26  ;;  %v721_v55 = vor.u32 %v546_v51, %v394_v52  ;;  %v560_v56 = vld [vmem:[%s875_s1 + $0x64] sm:$0xf]  ;;  %v456_v58 = vld [vmem:[%s875_s1 + $0x68] sm:$0xf]  ;;  %v563_v59 = vld [vmem:[%s875_s1 + $0x74] sm:$0xf0] }
   0xf   :  { %v565_v60 = vld [vmem:[%s875_s1 + $0x8c] sm:$0xf]  ;;  %v474_v61 = vld [vmem:[%s875_s1 + $0x98] sm:$0xf0]  ;;  %v453_v63 = vor.u32 %v560_v56, %v450_v57  ;;  %v432_v0 = vld [vmem:[%s875_s1 + $0x40] sm:$0xf]  ;;  %v457_v2 = vor.u32 %v563_v59, %v456_v58 }
  0x10   :  { %261 = vmatpush.bf16.msra.mxu0 %v465_v46  ;;  %542 = vmatmul.msk.bf16.vlgmr.msra.gmra.mxu1 %vm254_vm0, %v721_v55  ;;  %v558_v1 = vld [vmem:[%s875_s1 + $0x4c] sm:$0xf0]  ;;  %v477_v3 = vor.u32 %v565_v60, %v474_v61  ;;  %v556_v4 = vld [vmem:[%s875_s1 + $0x44] sm:$0xf]  ;;  %v434_v5 = vld [vmem:[%s875_s1 + $0x50] sm:$0xf0] }
  0x11   :  { %316 = vmatpush.bf16.msrb.mxu1 %v489_v38  ;;  %289 = vmatpush.bf16.msra.mxu2 %v469_v49  ;;  %v440_v6 = vld [vmem:[%s875_s1 + $0x48] sm:$0xf]  ;;  %v559_v7 = vld [vmem:[%s875_s1 + $0x54] sm:$0xf0]  ;;  %v561_v8 = vld [vmem:[%s875_s1 + $0x6c] sm:$0xf]  ;;  %v433_v10 = vor.u32 %v558_v1, %v432_v0  ;;  %v437_v11 = vor.u32 %v556_v4, %v434_v5 }
  0x12   :  { %343 = vmatpush.bf16.msrb.mxu3 %v509_v39  ;;  %v458_v9 = vld [vmem:[%s875_s1 + $0x78] sm:$0xf0]  ;;  %v416_v12 = vld [vmem:[%s875_s1 + $0x20] sm:$0xf]  ;;  %v554_v13 = vld [vmem:[%s875_s1 + $0x2c] sm:$0xf0]  ;;  %v441_v14 = vor.u32 %v559_v7, %v440_v6 }
  0x13   :  { %544 = vmatmul.msk.bf16.vlgmr.msra.gmra.mxu3 %vm254_vm0, %v721_v55  ;;  %v461_v15 = vor.u32 %v561_v8, %v458_v9  ;;  %v552_v16 = vld [vmem:[%s875_s1 + $0x24] sm:$0xf]  ;;  %v418_v17 = vld [vmem:[%s875_s1 + $0x30] sm:$0xf0]  ;;  %v424_v18 = vld [vmem:[%s875_s1 + $0x28] sm:$0xf]  ;;  %v417_v22 = vor.u32 %v554_v13, %v416_v12 }
  0x14   :  { %262 = vmatpush.bf16.msra.mxu0 %v449_v62  ;;  %v555_v19 = vld [vmem:[%s875_s1 + $0x34] sm:$0xf0]  ;;  %v557_v20 = vld [vmem:[%s875_s1 + $0x4c] sm:$0xf]  ;;  %v442_v21 = vld [vmem:[%s875_s1 + $0x58] sm:$0xf0]  ;;  %v421_v26 = vor.u32 %v552_v16, %v418_v17 }
  0x15   :  { %317 = vmatpush.bf16.msrb.mxu1 %v473_v53  ;;  %290 = vmatpush.bf16.msra.mxu2 %v453_v63  ;;  %v400_v23 = vld [vmem:[%s875_s1] sm:$0xf]  ;;  %v550_v24 = vld [vmem:[%s875_s1 + $0xc] sm:$0xf0]  ;;  %v548_v25 = vld [vmem:[%s875_s1 + $0x4] sm:$0xf]  ;;  %v425_v30 = vor.u32 %v555_v19, %v424_v18  ;;  %v445_v31 = vor.u32 %v557_v20, %v442_v21 }
  0x16   :  { %344 = vmatpush.bf16.msrb.mxu3 %v493_v54  ;;  %v402_v27 = vld [vmem:[%s875_s1 + $0x10] sm:$0xf0]  ;;  %v408_v28 = vld [vmem:[%s875_s1 + $0x8] sm:$0xf]  ;;  %v551_v29 = vld [vmem:[%s875_s1 + $0x14] sm:$0xf0]  ;;  %v401_v39 = vor.u32 %v550_v24, %v400_v23 }
  0x17   :  { %v581_v32 = vld [vmem:[%s875_s1 + $0x10c] sm:$0xf]  ;;  %v538_v33 = vld [vmem:[%s875_s1 + $0x118] sm:$0xf0]  ;;  %v53_v34 = vld [vmem:[%s877_s2] sm:$0xff]  ;;  %v586_v38 = vmov 0   ;;  %v405_v43 = vor.u32 %v548_v25, %v402_v27  ;;  %v409_v45 = vor.u32 %v551_v29, %v408_v28 }
  0x18   :  { %263 = vmatpush.bf16.msra.mxu0 %v433_v10  ;;  %v553_v35 = vld [vmem:[%s875_s1 + $0x2c] sm:$0xf]  ;;  %v426_v36 = vld [vmem:[%s875_s1 + $0x38] sm:$0xf0]  ;;  %v392_v37 = vld [vmem:[%s876_s0] sm:$0xf]  ;;  %585 = vset.pattern.permute.xlu0 %v586_v38  ;;  %v541_v44 = vor.u32 %v581_v32, %v538_v33 }
  0x19   :  { %318 = vmatpush.bf16.msrb.mxu1 %v457_v2  ;;  %291 = vmatpush.bf16.msra.mxu2 %v437_v11  ;;  %v547_v40 = vld [vmem:[%s876_s0 + $0x4] sm:$0xf0]  ;;  %v580_v41 = vld [vmem:[%s875_s1 + $0x104] sm:$0xf]  ;;  %v530_v42 = vld [vmem:[%s875_s1 + $0x110] sm:$0xf0]  ;;  %v429_v46 = vor.u32 %v553_v35, %v426_v36 }
  0x1a   :  { %345 = vmatpush.bf16.msrb.mxu3 %v477_v3  ;;  %57 = vperm.xlu0 %585, %v53_v34   ;;  %v393_v47 = vor.u32 %v547_v40, %v392_v37  ;;  %v533_v48 = vor.u32 %v580_v41, %v530_v42  ;;  %v549_v49 = vld [vmem:[%s875_s1 + $0xc] sm:$0xf]  ;;  %v410_v50 = vld [vmem:[%s875_s1 + $0x18] sm:$0xf0] }
  0x1b   :  { %v54_v51 = vld [vmem:[%s877_s2 + $0x8] sm:$0xff]  ;;  %v413_v52 = vor.u32 %v549_v49, %v410_v50 }
  0x1c   :  { %264 = vmatpush.bf16.msra.mxu0 %v417_v22 }
  0x1d   :  { %319 = vmatpush.bf16.msrb.mxu1 %v441_v14  ;;  %292 = vmatpush.bf16.msra.mxu2 %v421_v26 }
  0x1e   :  { %346 = vmatpush.bf16.msrb.mxu3 %v461_v15 }
  0x20   :  { %265 = vmatpush.bf16.msra.mxu0 %v401_v39 }
  0x21   :  { %320 = vmatpush.bf16.msrb.mxu1 %v425_v30  ;;  %293 = vmatpush.bf16.msra.mxu2 %v405_v43 }
  0x22   :  { %347 = vmatpush.bf16.msrb.mxu3 %v445_v31  ;;  %62 = vperm.xlu0 %585, %v54_v51  }
  0x23   :  { %266 = vmatmul.bf16.vlgmr.msra.gmra.mxu0 %v393_v47 }
  0x24   :  { %363 = vmatpush.bf16.msrb.mxu0 %v541_v44  ;;  %294 = vmatmul.bf16.vlgmr.msra.gmra.mxu2 %v393_v47 }
  0x25   :  { %321 = vmatpush.bf16.msrb.mxu1 %v409_v45  ;;  %307 = vmatpush.bf16.msrb.mxu2 %v533_v48 }
  0x26   :  { %348 = vmatpush.bf16.msrb.mxu3 %v429_v46 }
  0x28   :  { %322 = vmatmul.bf16.vlgmr.msrb.gmra.mxu1 %v393_v47 }
  0x2a   :  { %349 = vmatpush.bf16.msrb.mxu3 %v413_v52 }
  0x2d   :  { %350 = vmatmul.bf16.vlgmr.msrb.gmra.mxu3 %v393_v47 }
  0x33   :  { %545 = vmatmul.msk.bf16.vlgmr.msrb.gmra.mxu0 %vm254_vm0, %v721_v55 }
  0x34   :  { %543 = vmatmul.msk.bf16.vlgmr.msrb.gmra.mxu2 %vm254_vm0, %v721_v55 }
  0x8c   :  { %v58_v57 = vpop.permute.xlu0 %57 }
  0x8d   :  { %v281_v53 = vpop.f32.mrf.mxu1 }
  0x94   :  { %v63_v2 = vpop.permute.xlu0 %62 }
  0x95   :  { %v283_v54 = vpop.f32.mrf.mxu1 }
  0x96   :  { %v337_v56 = vpop.f32.mrf.mxu3 }
  0x9e   :  { %v339_v61 = vpop.f32.mrf.mxu3 }
  0xa0   :  { %v267_v58 = vpop.f32.mrf.mxu0 }
  0xa1   :  { %v268_v59 = vadd.f32 %v267_v58, %v58_v57 }
  0xa3   :  { %v282_v62 = vadd.f32 %v281_v53, %v268_v59 }
  0xa5   :  { %v323_v60 = vpop.f32.mrf.mxu1  ;;  %v370_v0 = vmax.f32 %v282_v62, 0.0 }
  0xa6   :  { %v324_v63 = vadd.f32 %v323_v60, %v58_v57 }
  0xa7   :  { %378 = vst [vmem:[%s878_s3] sm:$0xff] %v370_v0  ;;  %v295_v4 = vpop.f32.mrf.mxu2 }
  0xa8   :  { %v338_v1 = vadd.f32 %v337_v56, %v324_v63  ;;  %v269_v55 = vpop.f32.mrf.mxu0  ;;  %v296_v19 = vadd.f32 %v295_v4, %v58_v57 }
  0xa9   :  { %v270_v5 = vadd.f32 %v269_v55, %v63_v2 }
  0xaa   :  { %v372_v3 = vmax.f32 %v338_v1, 0.0 }
  0xab   :  { %v284_v7 = vadd.f32 %v283_v54, %v270_v5 }
  0xac   :  { %380 = vst [vmem:[%s878_s3 + $0x10] sm:$0xff] %v372_v3 }
  0xad   :  { %v325_v6 = vpop.f32.mrf.mxu1  ;;  %v374_v10 = vmax.f32 %v284_v7, 0.0 }
  0xae   :  { %v326_v8 = vadd.f32 %v325_v6, %v63_v2 }
  0xaf   :  { %382 = vst [vmem:[%s878_s3 + $0x20] sm:$0xff] %v374_v10  ;;  %v297_v14 = vpop.f32.mrf.mxu2 }
  0xb0   :  { %v351_v9 = vpop.f32.mrf.mxu3  ;;  %v340_v11 = vadd.f32 %v339_v61, %v326_v8  ;;  %v365_v15 = vpop.f32.mrf.mxu0  ;;  %v298_v27 = vadd.f32 %v297_v14, %v63_v2 }
  0xb1   :  { %v352_v12 = vadd.f32 %v351_v9, %v58_v57 }
  0xb2   :  { %v376_v13 = vmax.f32 %v340_v11, 0.0 }
  0xb3   :  { %v366_v16 = vadd.f32 %v365_v15, %v352_v12 }
  0xb4   :  { %384 = vst [vmem:[%s878_s3 + $0x30] sm:$0xff] %v376_v13 }
  0xb5   :  { %v373_v17 = vmax.f32 %v366_v16, 0.0 }
  0xb7   :  { %381 = vst [vmem:[%s878_s3 + $0x18] sm:$0xff] %v373_v17  ;;  %v309_v21 = vpop.f32.mrf.mxu2 }
  0xb8   :  { %v353_v18 = vpop.f32.mrf.mxu3  ;;  %v310_v22 = vadd.f32 %v309_v21, %v296_v19  ;;  %v367_v23 = vpop.f32.mrf.mxu0 }
  0xb9   :  { %v354_v20 = vadd.f32 %v353_v18, %v63_v2 }
  0xba   :  { %v371_v25 = vmax.f32 %v310_v22, 0.0 }
  0xbb   :  { %v368_v24 = vadd.f32 %v367_v23, %v354_v20 }
  0xbc   :  { %379 = vst [vmem:[%s878_s3 + $0x8] sm:$0xff] %v371_v25 }
  0xbd   :  { %v377_v26 = vmax.f32 %v368_v24, 0.0 }
  0xbf   :  { %385 = vst [vmem:[%s878_s3 + $0x38] sm:$0xff] %v377_v26  ;;  %v311_v28 = vpop.f32.mrf.mxu2 }
  0xc0   :  { %v312_v29 = vadd.f32 %v311_v28, %v298_v27 }
  0xc2   :  { %v375_v30 = vmax.f32 %v312_v29, 0.0 }
  0xc4   :  { %383 = vst [vmem:[%s878_s3 + $0x28] sm:$0xff] %v375_v30 }

// kernel: net_forward.45
= control target key start
LH: loop header
LB: loop body
LE: loop exit
PB: predicated region body
PF: predicated region fallthrough
CT: control target
= control target key end

     0   :  { %v550_v6 = vmov 0   ;;  %vm285_vm0 = vcmask 130048   ;;  %s720_s1 = inlined_call_operand.vmem [shape: bf16[400,128], index: 1, kind: input, shape index: {}]   ;;  %s721_s0 = inlined_call_operand.vmem [shape: bf16[32,400], index: 0, kind: input, shape index: {}]   ;;  %s722_s2 = inlined_call_operand.vmem [shape: f32[32,1], index: 2, kind: input, shape index: {}]   ;;  %s723_s3 = inlined_call_operand.vmem [shape: f32[32,128], index: 3, kind: output, shape index: {}]  }
   0x1   :  { %v529_v0 = vld [vmem:[%s720_s1 + $0x38] sm:$0xff]  ;;  %v528_v3 = vld [vmem:[%s720_s1 + $0x30] sm:$0xff]  ;;  %548 = vset.pattern.permute.xlu0 %v550_v6  ;;  %549 = vset.pattern.permute.xlu1 %v550_v6  ;;  %v527_v7 = vld [vmem:[%s720_s1 + $0x28] sm:$0xff] }
   0x2   :  { %v537_v1 = vld [vmem:[%s720_s1 + $0x78] sm:$0xff]  ;;  %292 = vmatpush.bf16.msra.mxu0 %v529_v0  ;;  %v536_v4 = vld [vmem:[%s720_s1 + $0x70] sm:$0xff]  ;;  %v535_v8 = vld [vmem:[%s720_s1 + $0x68] sm:$0xff] }
   0x3   :  { %v545_v2 = vld [vmem:[%s720_s1 + $0xb8] sm:$0xff]  ;;  %311 = vmatpush.bf16.msra.mxu1 %v537_v1  ;;  %v544_v5 = vld [vmem:[%s720_s1 + $0xb0] sm:$0xff]  ;;  %v546_v9 = vld [vmem:[%s720_s1 + $0xc0] sm:$0xff] }
   0x4   :  { %330 = vmatpush.bf16.msra.mxu2 %v545_v2  ;;  %v543_v10 = vld [vmem:[%s720_s1 + $0xa8] sm:$0xff]  ;;  %v392_v12 = vld [vmem:[%s721_s0 + $0x18] sm:$0xf0]  ;;  %356 = vmatpush.bf16.msra.mxu3 %v546_v9  ;;  %v526_v14 = vld [vmem:[%s720_s1 + $0x20] sm:$0xff] }
   0x5   :  { %v515_v11 = vld [vmem:[%s721_s0 + $0xc] sm:$0xf]  ;;  %v534_v15 = vld [vmem:[%s720_s1 + $0x60] sm:$0xff]  ;;  %v525_v18 = vld [vmem:[%s720_s1 + $0x18] sm:$0xff] }
   0x6   :  { %293 = vmatpush.bf16.msra.mxu0 %v528_v3  ;;  %v395_v13 = vor.u32 %v515_v11, %v392_v12  ;;  %v542_v16 = vld [vmem:[%s720_s1 + $0xa0] sm:$0xff]  ;;  %v533_v19 = vld [vmem:[%s720_s1 + $0x58] sm:$0xff]  ;;  %v524_v21 = vld [vmem:[%s720_s1 + $0x10] sm:$0xff] }
   0x7   :  { %312 = vmatpush.bf16.msra.mxu1 %v536_v4  ;;  %v73_v17 = vld [vmem:[%s722_s2] sm:$0xff]  ;;  %v541_v20 = vld [vmem:[%s720_s1 + $0x98] sm:$0xff]  ;;  %v532_v22 = vld [vmem:[%s720_s1 + $0x50] sm:$0xff] }
   0x8   :  { %331 = vmatpush.bf16.msra.mxu2 %v544_v5  ;;  %512 = vmatmul.msk.bf16.vlgmr.msra.gmra.mxu3 %vm285_vm0, %v395_v13  ;;  %v74_v23 = vld [vmem:[%s722_s2 + $0x8] sm:$0xff]  ;;  %v75_v24 = vld [vmem:[%s722_s2 + $0x10] sm:$0xff]  ;;  %v408_v27 = vld [vmem:[%s721_s0 + $0x38] sm:$0xf0] }
   0x9   :  { %79 = vperm.xlu0 %548, %v73_v17   ;;  %v540_v25 = vld [vmem:[%s720_s1 + $0x90] sm:$0xff]  ;;  %89 = vperm.xlu1 %549, %v75_v24   ;;  %v519_v26 = vld [vmem:[%s721_s0 + $0x2c] sm:$0xf]  ;;  %v522_v32 = vld [vmem:[%s720_s1] sm:$0xff] }
   0xa   :  { %294 = vmatpush.bf16.msra.mxu0 %v527_v7  ;;  %v523_v28 = vld [vmem:[%s720_s1 + $0x8] sm:$0xff]  ;;  %v411_v31 = vor.u32 %v519_v26, %v408_v27  ;;  %v530_v33 = vld [vmem:[%s720_s1 + $0x40] sm:$0xff]  ;;  %v76_v35 = vld [vmem:[%s722_s2 + $0x18] sm:$0xff] }
   0xb   :  { %313 = vmatpush.bf16.msra.mxu1 %v535_v8  ;;  %v531_v29 = vld [vmem:[%s720_s1 + $0x48] sm:$0xff]  ;;  %v382_v34 = vld [vmem:[%s721_s0] sm:$0xf]  ;;  %v516_v36 = vld [vmem:[%s721_s0 + $0xc] sm:$0xf0] }
   0xc   :  { %332 = vmatpush.bf16.msra.mxu2 %v543_v10  ;;  %v539_v30 = vld [vmem:[%s720_s1 + $0x88] sm:$0xff]  ;;  %v514_v37 = vld [vmem:[%s721_s0 + $0x4] sm:$0xf]  ;;  %v384_v38 = vld [vmem:[%s721_s0 + $0x10] sm:$0xf0]  ;;  %v383_v42 = vor.u32 %v516_v36, %v382_v34 }
   0xd   :  { %v538_v39 = vld [vmem:[%s720_s1 + $0x80] sm:$0xff]  ;;  %v390_v40 = vld [vmem:[%s721_s0 + $0x8] sm:$0xf]  ;;  %v517_v41 = vld [vmem:[%s721_s0 + $0x14] sm:$0xf0]  ;;  %v387_v43 = vor.u32 %v514_v37, %v384_v38 }
   0xe   :  { %295 = vmatpush.bf16.msra.mxu0 %v526_v14  ;;  %v391_v44 = vor.u32 %v517_v41, %v390_v40  ;;  %v398_v45 = vld [vmem:[%s721_s0 + $0x20] sm:$0xf]  ;;  %v520_v46 = vld [vmem:[%s721_s0 + $0x2c] sm:$0xf0]  ;;  %v518_v47 = vld [vmem:[%s721_s0 + $0x24] sm:$0xf] }
   0xf   :  { %314 = vmatpush.bf16.msra.mxu1 %v534_v15  ;;  %v400_v48 = vld [vmem:[%s721_s0 + $0x30] sm:$0xf0]  ;;  %v406_v49 = vld [vmem:[%s721_s0 + $0x28] sm:$0xf]  ;;  %v521_v50 = vld [vmem:[%s721_s0 + $0x34] sm:$0xf0]  ;;  %v399_v51 = vor.u32 %v520_v46, %v398_v45 }
  0x10   :  { %333 = vmatpush.bf16.msra.mxu2 %v542_v16  ;;  %v403_v52 = vor.u32 %v518_v47, %v400_v48  ;;  %v407_v53 = vor.u32 %v521_v50, %v406_v49 }
  0x11   :  { %84 = vperm.xlu0 %548, %v74_v23   ;;  %94 = vperm.xlu1 %549, %v76_v35  }
  0x12   :  { %296 = vmatpush.bf16.msra.mxu0 %v525_v18 }
  0x13   :  { %315 = vmatpush.bf16.msra.mxu1 %v533_v19 }
  0x14   :  { %334 = vmatpush.bf16.msra.mxu2 %v541_v20 }
  0x16   :  { %297 = vmatpush.bf16.msra.mxu0 %v524_v21 }
  0x17   :  { %316 = vmatpush.bf16.msra.mxu1 %v532_v22 }
  0x18   :  { %335 = vmatpush.bf16.msra.mxu2 %v540_v25  ;;  %513 = vmatmul.msk.bf16.gmra.mxu3 %vm285_vm0, %v411_v31 }
  0x1a   :  { %298 = vmatpush.bf16.msra.mxu0 %v523_v28 }
  0x1b   :  { %317 = vmatpush.bf16.msra.mxu1 %v531_v29 }
  0x1c   :  { %336 = vmatpush.bf16.msra.mxu2 %v539_v30 }
  0x1e   :  { %299 = vmatpush.bf16.msra.mxu0 %v522_v32 }
  0x1f   :  { %318 = vmatpush.bf16.msra.mxu1 %v530_v33 }
  0x20   :  { %337 = vmatpush.bf16.msra.mxu2 %v538_v39 }
  0x21   :  { %300 = vmatmul.bf16.vlgmr.msra.gmra.mxu0 %v383_v42 }
  0x22   :  { %319 = vmatmul.bf16.vlgmr.msra.gmra.mxu1 %v387_v43 }
  0x23   :  { %338 = vmatmul.bf16.vlgmr.msra.gmra.mxu2 %v391_v44 }
  0x31   :  { %305 = vmatmul.bf16.gmra.mxu0 %v399_v51 }
  0x32   :  { %324 = vmatmul.bf16.gmra.mxu1 %v403_v52 }
  0x33   :  { %343 = vmatmul.bf16.gmra.mxu2 %v407_v53 }
  0x7b   :  { %v80_v54 = vpop.permute.xlu0 %79  ;;  %v90_v6 = vpop.permute.xlu1 %89 }
  0x83   :  { %v85_v61 = vpop.permute.xlu0 %84  ;;  %v95_v19 = vpop.permute.xlu1 %94 }
  0x8b   :  { %v358_v58 = vpop.f32.mrf.mxu3 }
  0x93   :  { %v360_v4 = vpop.f32.mrf.mxu3 }
  0x9b   :  { %v363_v15 = vpop.f32.mrf.mxu3 }
  0x9e   :  { %v301_v55 = vpop.f32.mrf.mxu0 }
  0x9f   :  { %v320_v56 = vpop.f32.mrf.mxu1  ;;  %v302_v57 = vadd.f32 %v301_v55, %v80_v54 }
  0xa1   :  { %v321_v59 = vadd.f32 %v320_v56, %v302_v57 }
  0xa3   :  { %v365_v27 = vpop.f32.mrf.mxu3 }
  0xa6   :  { %v339_v60 = vpop.f32.mrf.mxu2  ;;  %v303_v63 = vpop.f32.mrf.mxu0 }
  0xa7   :  { %v340_v62 = vadd.f32 %v339_v60, %v321_v59  ;;  %v322_v0 = vpop.f32.mrf.mxu1  ;;  %v304_v2 = vadd.f32 %v303_v63, %v85_v61 }
  0xa9   :  { %v359_v1 = vadd.f32 %v358_v58, %v340_v62  ;;  %v323_v5 = vadd.f32 %v322_v0, %v304_v2 }
  0xab   :  { %v368_v3 = vmax.f32 %v359_v1, 0.0 }
  0xad   :  { %372 = vst [vmem:[%s723_s3] sm:$0xff] %v368_v3 }
  0xae   :  { %v341_v7 = vpop.f32.mrf.mxu2  ;;  %v306_v9 = vpop.f32.mrf.mxu0 }
  0xaf   :  { %v342_v8 = vadd.f32 %v341_v7, %v323_v5  ;;  %v307_v10 = vadd.f32 %v306_v9, %v90_v6  ;;  %v325_v12 = vpop.f32.mrf.mxu1 }
  0xb1   :  { %v361_v11 = vadd.f32 %v360_v4, %v342_v8  ;;  %v326_v14 = vadd.f32 %v325_v12, %v307_v10 }
  0xb3   :  { %v369_v13 = vmax.f32 %v361_v11, 0.0 }
  0xb5   :  { %373 = vst [vmem:[%s723_s3 + $0x8] sm:$0xff] %v369_v13 }
  0xb6   :  { %v344_v16 = vpop.f32.mrf.mxu2  ;;  %v308_v18 = vpop.f32.mrf.mxu0 }
  0xb7   :  { %v345_v17 = vadd.f32 %v344_v16, %v326_v14  ;;  %v309_v21 = vadd.f32 %v308_v18, %v95_v19  ;;  %v327_v23 = vpop.f32.mrf.mxu1 }
  0xb9   :  { %v364_v20 = vadd.f32 %v363_v15, %v345_v17  ;;  %v328_v24 = vadd.f32 %v327_v23, %v309_v21 }
  0xbb   :  { %v370_v22 = vmax.f32 %v364_v20, 0.0 }
  0xbd   :  { %374 = vst [vmem:[%s723_s3 + $0x10] sm:$0xff] %v370_v22 }
  0xbe   :  { %v346_v25 = vpop.f32.mrf.mxu2 }
  0xbf   :  { %v347_v26 = vadd.f32 %v346_v25, %v328_v24 }
  0xc1   :  { %v366_v28 = vadd.f32 %v365_v27, %v347_v26 }
  0xc3   :  { %v371_v29 = vmax.f32 %v366_v28, 0.0 }
  0xc5   :  { %375 = vst [vmem:[%s723_s3 + $0x18] sm:$0xff] %v371_v29 }

// kernel: net_forward.46
= control target key start
LH: loop header
LB: loop body
LE: loop exit
PB: predicated region body
PF: predicated region fallthrough
CT: control target
= control target key end

     0   :  { %v430_v5 = vmov 0   ;;  %vm221_vm0 = vcmask 261120   ;;  %s567_s1 = inlined_call_operand.vmem [shape: bf16[288,128], index: 1, kind: input, shape index: {}]   ;;  %s568_s0 = inlined_call_operand.vmem [shape: bf16[32,288], index: 0, kind: input, shape index: {}]   ;;  %s569_s2 = inlined_call_operand.vmem [shape: f32[32,1], index: 2, kind: input, shape index: {}]   ;;  %s570_s3 = inlined_call_operand.vmem [shape: f32[32,128], index: 3, kind: output, shape index: {}]  }
   0x1   :  { %v408_v0 = vld [vmem:[%s567_s1 + $0x38] sm:$0xff]  ;;  %v407_v2 = vld [vmem:[%s567_s1 + $0x30] sm:$0xff]  ;;  %v418_v3 = vld [vmem:[%s567_s1 + $0x88] sm:$0xff]  ;;  %428 = vset.pattern.permute.xlu0 %v430_v5  ;;  %429 = vset.pattern.permute.xlu1 %v430_v5 }
   0x2   :  { %v416_v1 = vld [vmem:[%s567_s1 + $0x78] sm:$0xff]  ;;  %228 = vmatpush.bf16.msra.mxu0 %v408_v0  ;;  %419 = vmatpush.bf16.msra.mxu3 %v408_v0  ;;  %v415_v4 = vld [vmem:[%s567_s1 + $0x70] sm:$0xff]  ;;  %v417_v6 = vld [vmem:[%s567_s1 + $0x80] sm:$0xff] }
   0x3   :  { %247 = vmatpush.bf16.msra.mxu1 %v416_v1  ;;  %272 = vmatpush.bf16.msra.mxu2 %v418_v3  ;;  %v307_v7 = vld [vmem:[%s568_s0 + $0x8] sm:$0xf]  ;;  %v397_v8 = vld [vmem:[%s568_s0 + $0x10] sm:$0xf0]  ;;  %v59_v12 = vld [vmem:[%s569_s2] sm:$0xff] }
   0x4   :  { %v406_v9 = vld [vmem:[%s567_s1 + $0x28] sm:$0xff]  ;;  %v308_v11 = vor.u32 %v397_v8, %v307_v7  ;;  %v405_v13 = vld [vmem:[%s567_s1 + $0x20] sm:$0xff]  ;;  %65 = vperm.xlu0 %428, %v59_v12   ;;  %v404_v15 = vld [vmem:[%s567_s1 + $0x18] sm:$0xff] }
   0x5   :  { %v414_v10 = vld [vmem:[%s567_s1 + $0x68] sm:$0xff]  ;;  %v413_v14 = vld [vmem:[%s567_s1 + $0x60] sm:$0xff]  ;;  %v412_v16 = vld [vmem:[%s567_s1 + $0x58] sm:$0xff] }
   0x6   :  { %229 = vmatpush.bf16.msra.mxu0 %v407_v2  ;;  %420 = vmatpush.bf16.msra.mxu3 %v407_v2  ;;  %v403_v17 = vld [vmem:[%s567_s1 + $0x10] sm:$0xff]  ;;  %v60_v19 = vld [vmem:[%s569_s2 + $0x8] sm:$0xff]  ;;  %v319_v21 = vld [vmem:[%s568_s0 + $0x20] sm:$0xf] }
   0x7   :  { %248 = vmatpush.bf16.msra.mxu1 %v415_v4  ;;  %273 = vmatpush.bf16.msra.mxu2 %v417_v6  ;;  %v61_v18 = vld [vmem:[%s569_s2 + $0x10] sm:$0xff]  ;;  %v400_v22 = vld [vmem:[%s568_s0 + $0x28] sm:$0xf0]  ;;  %v401_v26 = vld [vmem:[%s567_s1] sm:$0xff] }
   0x8   :  { %v411_v20 = vld [vmem:[%s567_s1 + $0x50] sm:$0xff]  ;;  %75 = vperm.xlu1 %429, %v61_v18   ;;  %v402_v23 = vld [vmem:[%s567_s1 + $0x8] sm:$0xff]  ;;  %v320_v25 = vor.u32 %v400_v22, %v319_v21  ;;  %v299_v27 = vld [vmem:[%s568_s0] sm:$0xf] }
   0x9   :  { %v410_v24 = vld [vmem:[%s567_s1 + $0x48] sm:$0xff]  ;;  %v62_v28 = vld [vmem:[%s569_s2 + $0x18] sm:$0xff]  ;;  %v399_v31 = vld [vmem:[%s568_s0 + $0x20] sm:$0xf0] }
   0xa   :  { %230 = vmatpush.bf16.msra.mxu0 %v406_v9  ;;  %421 = vmatpush.bf16.msra.mxu3 %v406_v9  ;;  %v396_v29 = vld [vmem:[%s568_s0 + $0x8] sm:$0xf0]  ;;  %v311_v30 = vld [vmem:[%s568_s0 + $0x18] sm:$0xf]  ;;  %v409_v32 = vld [vmem:[%s567_s1 + $0x40] sm:$0xff] }
   0xb   :  { %249 = vmatpush.bf16.msra.mxu1 %v414_v10  ;;  %393 = vmatmul.msk.bf16.vlgmr.msra.gmra.mxu2 %vm221_vm0, %v308_v11  ;;  %v395_v33 = vld [vmem:[%s568_s0 + $0x4] sm:$0xf]  ;;  %v301_v34 = vld [vmem:[%s568_s0 + $0xc] sm:$0xf0]  ;;  %v300_v35 = vor.u32 %v396_v29, %v299_v27  ;;  %v312_v36 = vor.u32 %v399_v31, %v311_v30  ;;  %v398_v38 = vld [vmem:[%s568_s0 + $0x1c] sm:$0xf] }
   0xc   :  { %70 = vperm.xlu0 %428, %v60_v19   ;;  %v304_v37 = vor.u32 %v395_v33, %v301_v34  ;;  %v313_v39 = vld [vmem:[%s568_s0 + $0x24] sm:$0xf0] }
   0xd   :  { %v316_v40 = vor.u32 %v398_v38, %v313_v39 }
   0xe   :  { %231 = vmatpush.bf16.msra.mxu0 %v405_v13  ;;  %422 = vmatpush.bf16.msra.mxu3 %v405_v13 }
   0xf   :  { %250 = vmatpush.bf16.msra.mxu1 %v413_v14 }
  0x10   :  { %80 = vperm.xlu1 %429, %v62_v28  }
  0x12   :  { %232 = vmatpush.bf16.msra.mxu0 %v404_v15  ;;  %423 = vmatpush.bf16.msra.mxu3 %v404_v15 }
  0x13   :  { %251 = vmatpush.bf16.msra.mxu1 %v412_v16 }
  0x16   :  { %233 = vmatpush.bf16.msra.mxu0 %v403_v17  ;;  %424 = vmatpush.bf16.msra.mxu3 %v403_v17 }
  0x17   :  { %252 = vmatpush.bf16.msra.mxu1 %v411_v20 }
  0x1a   :  { %234 = vmatpush.bf16.msra.mxu0 %v402_v23  ;;  %425 = vmatpush.bf16.msra.mxu3 %v402_v23 }
  0x1b   :  { %253 = vmatpush.bf16.msra.mxu1 %v410_v24  ;;  %394 = vmatmul.msk.bf16.gmra.mxu2 %vm221_vm0, %v320_v25 }
  0x1e   :  { %235 = vmatpush.bf16.msra.mxu0 %v401_v26  ;;  %426 = vmatpush.bf16.msra.mxu3 %v401_v26 }
  0x1f   :  { %254 = vmatpush.bf16.msra.mxu1 %v409_v32 }
  0x21   :  { %236 = vmatmul.bf16.vlgmr.msra.gmra.mxu0 %v300_v35  ;;  %241 = vmatmul.bf16.vlgmr.msra.gmra.mxu3 %v312_v36 }
  0x22   :  { %255 = vmatmul.bf16.vlgmr.msra.gmra.mxu1 %v304_v37 }
  0x32   :  { %260 = vmatmul.bf16.gmra.mxu1 %v316_v40 }
  0x76   :  { %v66_v41 = vpop.permute.xlu0 %65 }
  0x7a   :  { %v76_v54 = vpop.permute.xlu1 %75 }
  0x7e   :  { %v71_v48 = vpop.permute.xlu0 %70 }
  0x82   :  { %v81_v0 = vpop.permute.xlu1 %80 }
  0x8e   :  { %v275_v42 = vpop.f32.mrf.mxu2 }
  0x96   :  { %v277_v50 = vpop.f32.mrf.mxu2 }
  0x9e   :  { %v237_v43 = vpop.f32.mrf.mxu0  ;;  %v280_v60 = vpop.f32.mrf.mxu2 }
  0x9f   :  { %v238_v44 = vadd.f32 %v237_v43, %v66_v41  ;;  %v256_v45 = vpop.f32.mrf.mxu1 }
  0xa1   :  { %v257_v46 = vadd.f32 %v256_v45, %v238_v44 }
  0xa3   :  { %v276_v47 = vadd.f32 %v275_v42, %v257_v46 }
  0xa4   :  { %v242_v55 = vpop.f32.mrf.mxu3 }
  0xa5   :  { %v285_v49 = vmax.f32 %v276_v47, 0.0  ;;  %v243_v58 = vadd.f32 %v242_v55, %v76_v54 }
  0xa6   :  { %v239_v51 = vpop.f32.mrf.mxu0  ;;  %v282_v6 = vpop.f32.mrf.mxu2 }
  0xa7   :  { %289 = vst [vmem:[%s570_s3] sm:$0xff] %v285_v49  ;;  %v240_v52 = vadd.f32 %v239_v51, %v71_v48  ;;  %v258_v53 = vpop.f32.mrf.mxu1 }
  0xa9   :  { %v259_v56 = vadd.f32 %v258_v53, %v240_v52 }
  0xab   :  { %v278_v57 = vadd.f32 %v277_v50, %v259_v56 }
  0xac   :  { %v244_v1 = vpop.f32.mrf.mxu3 }
  0xad   :  { %v286_v59 = vmax.f32 %v278_v57, 0.0  ;;  %v245_v3 = vadd.f32 %v244_v1, %v81_v0 }
  0xaf   :  { %290 = vst [vmem:[%s570_s3 + $0x8] sm:$0xff] %v286_v59  ;;  %v261_v61 = vpop.f32.mrf.mxu1 }
  0xb0   :  { %v262_v62 = vadd.f32 %v261_v61, %v243_v58 }
  0xb2   :  { %v281_v63 = vadd.f32 %v280_v60, %v262_v62 }
  0xb4   :  { %v287_v2 = vmax.f32 %v281_v63, 0.0 }
  0xb6   :  { %291 = vst [vmem:[%s570_s3 + $0x10] sm:$0xff] %v287_v2 }
  0xb7   :  { %v263_v4 = vpop.f32.mrf.mxu1 }
  0xb8   :  { %v264_v5 = vadd.f32 %v263_v4, %v245_v3 }
  0xba   :  { %v283_v7 = vadd.f32 %v282_v6, %v264_v5 }
  0xbc   :  { %v288_v8 = vmax.f32 %v283_v7, 0.0 }
  0xbe   :  { %292 = vst [vmem:[%s570_s3 + $0x18] sm:$0xff] %v288_v8 }

// kernel: custom-call.35
= control target key start
LH: loop header
LB: loop body
LE: loop exit
PB: predicated region body
PF: predicated region fallthrough
CT: control target
= control target key end

     0   :  { %5 = vsyncpa [#allocation6], 0  ;;  %s911_s0 = inlined_call_operand.vmem [shape: f32[2,4,4], index: 0, kind: input, shape index: {}]   ;;  %s912_s1 = inlined_call_operand.vmem [shape: f32[2,4,4], index: 1, kind: output, shape index: {0}]   ;;  %s913_s2 = inlined_call_operand.hbm [shape: s32[2,4], index: 2, kind: output, shape index: {1}]   ;;  %s914_s3 = inlined_call_operand.vmem [shape: s32[2,4], index: 3, kind: output, shape index: {2}]  }
   0x1   :  { %7 = vsyncpa [#allocation6 + $0x1], 0  ;;  %s735_s12 = smov 0   ;;  %s737_s13 = smov 0  }
   0x2   :  { %s739_s14 = smov 0   ;;  %s741_s15 = smov 0  }
   0x3 LB: > { %s756_s16 = sadd.s32 4294967295, %s708_s15   ;;  %s571_s17 = sadd.s32 4294967294, %s708_s15   ;;  %s708_s15 = sphi %s741_s15, %s920_s15   ;;  %s704_s14 = sphi %s739_s14, %s919_s14   ;;  %s700_s13 = sphi %s737_s13, %s918_s13   ;;  %s696_s12 = sphi %s735_s12, %s917_s12  }
   0x4   : > { %s760_s18 = sadd.s32 1, %s708_s15   ;;  %s17_s19 = sshrl.u32 %s708_s15, 3 }
   0x5   : > { %s18_s20 = sshrl.u32 %s760_s18, 3  ;;  %s22_s21 = sadd.s32 1, %s704_s14 }
   0x6   : > { %s19_s22 = ssub.s32 %s17_s19, %s18_s20  ;;  %p32_p0 = scmp.ne.s32.totalorder %s704_s14, %s700_s13 }
   0x7   : > { %p20_p1 = scmp.eq.s32.totalorder %s19_s22, 0  ;;  %p33_p2 = scmp.eq.s32.totalorder %s756_s16, 1 }
   0x8   : > { %p38_p3 = scmp.ne.s32.totalorder %s700_s13, %s696_s12  ;;  %p39_p4 = scmp.eq.s32.totalorder %s571_s17, 1 }
   0x9   : > { %s771_s23 = scalar_select %p20_p1, %s704_s14, %s22_s21  }
   0xa   : > { %p773_p5 = por %p33_p2, %p32_p0  ;;  %p777_p6 = por %p39_p4, %p38_p3 }
   0xb   : > { %p573_p7 = scmp.ge.s32.totalorder %s708_s15, 2 }
   0xc   : > { %s85_s26 = sand.u32 (!%p573_p7), 1, %s708_s15   ;;  %s575_s27 = sshll.u32 (!%p573_p7), %s708_s15, 2 }
   0xd   : > { %83 = sbr.rel (%p573_p7) target bundleno = 20 (0x14), region = 16  ;;  %s574_s28 = sshll.u32 (!%p573_p7), %s85_s26, 2 }
   0xe   : > { %s89_s4 = scalar_lea.vmem (!%p573_p7), %s911_s0, %s575_s27  ;;  %s87_s5 = scalar_lea.vmem (!%p573_p7), [#allocation1], %s574_s28 }
  0x12   : > { %v106_v0 = vld [vmem:[%s89_s4] sm:$0xf] }
  0x13   : > { %107 = vst [vmem:[%s87_s5] sm:$0xf] %v106_v0 }
  0x14 PF: > { %p576_p8 = scmp.ge.s32.totalorder %s708_s15, 1  ;;  %p124_p9 = scmp.lt.s32.totalorder %s708_s15, 3 }
  0x16   : > { %p125_p10 = pnand %p576_p8, %p124_p9 }
  0x18   : > { %128 = sbr.rel (%p125_p10) target bundleno = 484 (0x1e4), region = 50 }
  0x1d   : > { %s135_s6 = sand.u32 1, %s756_s16   ;;  %s146_s7 = sand.u32 1, %s700_s13   ;;  %v168_v1 = vlaneseq  ;;  %v714_v4 = vmov 0  }
  0x1e   : > { %s793_s8 = sshll.u32 %s135_s6, 2  ;;  %s797_s9 = sshll.u32 %s146_s7, 1 }
  0x1f   : > { %v800_v2 = vshrl.u32 %v168_v1, 7  ;;  %s137_s10 = scalar_lea.vmem [#allocation1], %s793_s8  ;;  %s163_s11 = sand.u32 7, %s756_s16  }
  0x20   : > { %v157_v3 = vld [vmem:[%s137_s10] sm:$0xf]  ;;  %s805_s17 = scalar_lea.vmem [#allocation4], %s163_s11  ;;  %s141_s19 = scalar_lea.vmem [#allocation3], %s793_s8 }
  0x21   : > { %158 = vst [vmem:[#allocation0] sm:$0xf] %v157_v3  ;;  %s148_s20 = scalar_lea.vmem [#allocation5], %s797_s9  ;;  %s154_s21 = scalar_lea.vmem [#allocation8], %s797_s9 }
  0x22   : > { %172 = vst [vmem:[#allocation9] sm:$0xff] %v800_v2  ;;  %s811_s22 = scalar_lea.vmem [#allocation7], %s163_s11  ;;  %s813_s26 = smov 0  }
  0x23   : > { %167 = vst [vmem:[%s805_s17] sm:$0x1] %v714_v4 }
  0x28   : > { %v161_v5 = vld [vmem:[#allocation0] sm:$0xff] }
  0x29   : > { %162 = vst [vmem:[#allocation2] sm:$0xff] %v161_v5 }
  0x2a LB: >> { %vm188_vm0 = vcmp.lt.s32.totalorder %v800_v2, 4  ;;  %v820_v8 = vstv %s712_s26  ;;  %s229_s27 = ssub.s32 128, %s712_s26  ;;  %v235_v39 = vand.u32 127, %v168_v1  ;;  %s241_s28 = scalar_lea.vmem [#allocation2], %s712_s26  ;;  %v238_v42 = vld [vmem:[%s805_s17] ss:$0 sm:$0xff]  ;;  %s712_s26 = sphi %s813_s26, %s178_s26  }
  0x2b   : >> { %vm187_vm1 = vcmp.ge.s32.totalorder %v800_v2, %v820_v8  ;;  %s247_s4 = scalar_lea.vmem [#allocation9], %s712_s26  ;;  %vm267_vm14 = vcmp.gt.s32.totalorder %v800_v2, %v820_v8  ;;  %s178_s26 = sadd.s32 1, %s712_s26  }
  0x2c   : >> { %vm189_vm3 = vmand %vm187_vm1, %vm188_vm0  ;;  %vm236_vm12 = vcmp.eq.s32.totalorder %v235_v39, %v820_v8  ;;  %v249_v44 = vld [vmem:[%s247_s4] ss:$0 sm:$0xff]  ;;  %p175_p11 = scmp.ge.s32.totalorder %s178_s26, 4  }
  0x2d   : > { %s409_s6 = sshrl.u32 (%p175_p11), %s756_s16, 3  ;;  %s415_s26 = sshll.u32 (%p175_p11), %s148_s20, 4  ;;  %s416_s26 = int_to_ptr.vmem [resolvable:$true] %s415_s26 }
  0x2e   : > { %s852_s10 = sshll.u32 (%p175_p11), %s409_s6, 1  ;;  %s363_s6 = scalar_lea.sflag (%p175_p11), [#allocation6], %s146_s7 }
  0x30   : >> { %v183_v6 = vld [vmem:[#allocation2] sm:$0xff]  ;;  %v243_v40 = vld [vmem:[%s241_s28] ss:$0 sm:$0xff] }
  0x31   : >> { %v184_v7 = vand.u32 2147483647, %v183_v6 }
  0x33   : >> { %vm581_vm2 = vcmp.gt.f32.partialorder %v184_v7, -inf }
  0x34   : >> { %vm191_vm4 = vmand %vm189_vm3, %vm581_vm2 }
  0x35   : >> { %v192_v9 = vsel %vm191_vm4, %v800_v2, %v820_v8  ;;  %v193_v10 = vsel %vm191_vm4, %v184_v7, -inf  ;;  %vm284_vm4 = vmand %vm267_vm14, %vm236_vm12 }
  0x36   : >> { %v194_v11 = vrot.slane %v193_v10, 1  ;;  %v195_v12 = vrot.slane %v192_v9, 1 }
  0x38   : >> { %vm196_vm5 = vcmp.ge.f32.partialorder %v194_v11, %v193_v10  ;;  %v199_v13 = vrot.slane %v194_v11, 1  ;;  %v200_v14 = vrot.slane %v195_v12, 1 }
  0x39   : >> { %v197_v15 = vsel %vm196_vm5, %v194_v11, %v193_v10  ;;  %v198_v16 = vsel %vm196_vm5, %v195_v12, %v192_v9  ;;  %vm259_vm5 = vcmp.gt.s32.totalorder %v235_v39, %v820_v8 }
  0x3a   : >> { %vm201_vm6 = vcmp.ge.f32.partialorder %v199_v13, %v197_v15  ;;  %v204_v17 = vrot.slane %v199_v13, 1  ;;  %v205_v18 = vrot.slane %v200_v14, 1 }
  0x3b   : >> { %v202_v19 = vsel %vm201_vm6, %v199_v13, %v197_v15  ;;  %v203_v20 = vsel %vm201_vm6, %v200_v14, %v198_v16 }
  0x3c   : >> { %vm206_vm7 = vcmp.ge.f32.partialorder %v204_v17, %v202_v19  ;;  %v209_v21 = vrot.slane %v204_v17, 1  ;;  %v210_v22 = vrot.slane %v205_v18, 1 }
  0x3d   : >> { %v207_v23 = vsel %vm206_vm7, %v204_v17, %v202_v19  ;;  %v208_v24 = vsel %vm206_vm7, %v205_v18, %v203_v20 }
  0x3e   : >> { %vm211_vm8 = vcmp.ge.f32.partialorder %v209_v21, %v207_v23  ;;  %v214_v25 = vrot.slane %v209_v21, 1  ;;  %v215_v26 = vrot.slane %v210_v22, 1 }
  0x3f   : >> { %v212_v27 = vsel %vm211_vm8, %v209_v21, %v207_v23  ;;  %v213_v28 = vsel %vm211_vm8, %v210_v22, %v208_v24 }
  0x40   : >> { %vm216_vm9 = vcmp.ge.f32.partialorder %v214_v25, %v212_v27  ;;  %v219_v29 = vrot.slane %v214_v25, 1  ;;  %v220_v30 = vrot.slane %v215_v26, 1 }
  0x41   : >> { %v217_v31 = vsel %vm216_vm9, %v214_v25, %v212_v27  ;;  %v218_v32 = vsel %vm216_vm9, %v215_v26, %v213_v28 }
  0x42   : >> { %vm221_vm10 = vcmp.ge.f32.partialorder %v219_v29, %v217_v31  ;;  %v224_v33 = vrot.slane %v219_v29, 1  ;;  %v225_v34 = vrot.slane %v220_v30, 1 }
  0x43   : >> { %v222_v35 = vsel %vm221_vm10, %v219_v29, %v217_v31  ;;  %v223_v36 = vsel %vm221_vm10, %v220_v30, %v218_v32 }
  0x44   : >> { %vm226_vm11 = vcmp.ge.f32.partialorder %v224_v33, %v222_v35 }
  0x45   : >> { %v228_v37 = vsel %vm226_vm11, %v225_v34, %v223_v36 }
  0x46   : >> { %230 = vrot.lane.b32.xlu0 %v228_v37, %s229_s27 }
  0xb8   : >> { %v231_v38 = vpop.permute.xlu0 %230 }
  0xb9   : >> { %590 = vpush %v231_v38 }
  0xea   : >> { %s591_s29 = spop %590 }
  0xeb   : >> { %v237_v41 = vstv %s591_s29  ;;  %s242_s30 = scalar_lea.vmem [#allocation2], %s591_s29  ;;  %s248_s5 = scalar_lea.vmem [#allocation9], %s591_s29 }
  0xec   : >> { %v244_v43 = vld [vmem:[%s242_s30] ss:$0 sm:$0xff]  ;;  %v239_v46 = vsel %vm236_vm12, %v237_v41, %v238_v42 }
  0xed   : >> { %v250_v45 = vld [vmem:[%s248_s5] ss:$0 sm:$0xff]  ;;  %245 = vst [vmem:[%s242_s30] sm:$0x1] %v243_v40  ;;  %vm253_vm13 = vcmp.ne.f32.partialorder %v244_v43, 0.0  ;;  %v260_v62 = vsel %vm259_vm5, %v244_v43, 0.0 }
  0xee   : >> { %246 = vst [vmem:[%s241_s28] sm:$0x1] %v244_v43  ;;  %vm254_vm15 = vmand %vm236_vm12, %vm253_vm13  ;;  %s413_s28 = scalar_lea.hbm (%p175_p11), %s913_s2, %s852_s10 }
  0xef   : >> { %251 = vst [vmem:[%s248_s5] sm:$0x1] %v249_v44  ;;  %v255_v47 = vsel %vm254_vm15, %v244_v43, 1.0  ;;  %s417_s29 = sshll.u32 (%p175_p11), %s413_s28, 4  ;;  %s418_s29 = int_to_ptr.hbm [resolvable:$true] %s417_s29 }
  0xf0   : >> { %252 = vst [vmem:[%s247_s4] sm:$0x1] %v250_v45  ;;  %v268_v48 = vsel %vm267_vm14, %v255_v47, 1.0  ;;  %s656_s11 = sshra.s32 (%p175_p11), %s418_s29, 4  ;;  %s657_s11 = int_to_ptr.hbm [resolvable:$true] %s656_s11 }
  0xf1   : >> { %640 = vrcp.f32 %v268_v48  ;;  %240 = vst [vmem:[%s805_s17] sm:$0x1] %v239_v46  ;;  %v280_v52 = vand.u32 2147483648, %v268_v48  ;;  %v278_v54 = vand.u32 2147483647, %v268_v48  ;;  %vm274_vm1 = vweird.f32 %v268_v48  ;;  %s585_s17 = sshll.u32 (%p175_p11), %s756_s16, 2  ;;  %s658_s16 = scalar_lea.hbm (%p175_p11), %s657_s11, 2 }
  0xf2   : > { %s372_s5 = scalar_lea.vmem (%p175_p11), %s912_s1, %s585_s17  ;;  %p659_p12 = scmp.ne.s32.totalorder (%p175_p11), %s657_s11, %s658_s16 }
  0xf3   : >> { %v281_v56 = vor.u32 1.1754944e-38, %v280_v52  ;;  %vm279_vm3 = vcmp.eq.f32.partialorder %v278_v54, 8.507059e+37  ;;  %s662_s17 = scalar_lea.hbm (%p175_p11), %s913_s2, 2  ;;  %p663_p1 = scmp.lt.s32.totalorder (%p175_p11), %s657_s11, %s913_s2 }
  0xf4   : > { %p660_p13 = pnand (%p175_p11), %p659_p12, %p773_p5  ;;  %p664_p2 = scmp.lt.s32.totalorder (%p175_p11), %s662_s17, %s658_s16 }
  0xf5   : >> { %v264_v58 = vld [vmem:[#allocation2] sm:$0xff] }
  0xf6   : > { %p661_p0 = pneg (%p175_p11), %p660_p13  ;;  %p665_p3 = por (%p175_p11), %p664_p2, %p663_p1 }
  0xf7   : >> { %v641_v49 = vpop.eup %640  ;;  %v291_v4 = vld [vmem:[#allocation9] sm:$0xff] (%p175_p11) }
  0xf8   : >> { %v270_v50 = vmul.f32 %v641_v49, %v268_v48  ;;  %vm275_vm0 = vweird.f32 %v641_v49  ;;  %v348_v1 = vld [vmem:[#allocation4] sm:$0x3] (%p175_p11)  ;;  %p666_p4 = pnand (%p175_p11), %p665_p3, %p661_p0 }
  0xf9   : >> { %vm276_vm2 = vmor %vm274_vm1, %vm275_vm0  ;;  %351 = vst [vmem:[%s148_s20] sm:$0x3] (%p175_p11), %v348_v1 }
  0xfa   : >> { %v271_v51 = vsub.f32 1.0, %v270_v50 }
  0xfc   : >> { %v272_v53 = vmul.f32 %v641_v49, %v271_v51 }
  0xfe   : >> { %v273_v55 = vadd.f32 %v641_v49, %v272_v53 }
 0x100   : >> { %v277_v57 = vsel %vm276_vm2, %v641_v49, %v273_v55 }
 0x101   : >> { %v282_v59 = vsel %vm279_vm3, %v281_v56, %v277_v57 }
 0x102   : >> { %v283_v60 = vmul.f32 %v282_v59, %v264_v58 }
 0x104   : >> { %v285_v61 = vsel %vm284_vm4, %v283_v60, 0.0 }
 0x105   : >> { %286 = vadd.xlane.f32.xlu0 %v285_v61 }
 0x12e   : > { %307 = vxpose.xlu0.b32.start.end [1/1] (short) (narrow) (%p175_p11), %v291_v4, 8 }
 0x178   : >> { %v287_v63 = vpop.xlane.xlu0 %286 }
 0x179   : >> { %v288_v0 = vmul.f32 %v287_v63, %v260_v62  ;;  %177 = sbr.rel (!%p175_p11) target bundleno = 42 (0x2a), region = 202 }
 0x17b   : >> { %v289_v3 = vsub.f32 %v283_v60, %v288_v0 }
 0x17d   : >> { %290 = vst [vmem:[#allocation2] sm:$0xff] %v289_v3 }
 0x184   : > { %v342_v5 = vld [vmem:[#allocation2] sm:$0xf] }
 0x185   : > { %345 = vst [vmem:[%s141_s19] sm:$0xf] %v342_v5 }
 0x18c   : > { %v389_v2 = vld [vmem:[%s141_s19] sm:$0xf] }
 0x18d   : > { %390 = vst [vmem:[%s372_s5] sm:$0xf] %v389_v2 }
 0x18e   : > { %669 = shalt.err (!%p666_p4)
}
 0x18f   : > { %592 = dma.vmem_to_hbm [thread:$0]  (%p773_p5), %s416_s26, 32, %s418_s29, %s363_s6  }
 0x190   : > { %s426_s19 = scalar_lea.vmem (%p773_p5), %s914_s3, %s852_s10 }
 0x1d2   : > { %v323_v6 = vpop.trf.xlu0 }
 0x1d3   : > { %339 = vst [vmem:[%s811_s22] sm:$0x1] %v323_v6 }
 0x1d7   : > { %423 = sbr.rel (!%p773_p5) target bundleno = 484 (0x1e4), region = 96 }
 0x1da   : > { %v354_v7 = vld [vmem:[#allocation7] sm:$0x3] }
 0x1db   : > { %357 = vst [vmem:[%s154_s21] sm:$0x3] %v354_v7 }
 0x1e2   : > { %v443_v8 = vld [vmem:[%s154_s21] sm:$0x3] }
 0x1e3   : > { %444 = vst [vmem:[%s426_s19] sm:$0x3] %v443_v8 }
 0x1e4 PF: > { %s472_s20 = sand.u32 1, %s696_s12   ;;  %p595_p8 = pnand %p573_p7, %p777_p6 }
 0x1e5   : > { %s473_s24 = scalar_lea.sflag [#allocation6], %s472_s20 }
 0x1e6   : > { %p596_p9 = pneg %p595_p8 }
 0x1e8   : > { %691 = dma.done.wait (%p596_p9), %s473_s24, 32  }
 0x1e9   : > { %693 = vsyncadd (%p596_p9), %s473_s24, 4294967264  ;;  %p10_p5 = scmp.ge.s32.totalorder %s760_s18, 4   ;;  %s917_s12 = smov %s700_s13 }
 0x1ea   : > { %s918_s13 = smov %s704_s14  ;;  %s919_s14 = smov %s771_s23 }
 0x1eb   : > { %s920_s15 = smov %s760_s18  ;;  %12 = sbr.rel (!%p10_p5) target bundleno = 3 (0x3), region = 213 }
 0x1f0   :  { %486 = vsyncpa [#allocation6], 1 }
 0x1f1   :  { %488 = vsyncpa [#allocation6 + $0x1], 1 }

// kernel: net_forward.47
= control target key start
LH: loop header
LB: loop body
LE: loop exit
PB: predicated region body
PF: predicated region fallthrough
CT: control target
= control target key end

     0   :  { %v426_v5 = vmov 0   ;;  %vm221_vm0 = vcmask 261120   ;;  %s563_s1 = inlined_call_operand.vmem [shape: bf16[288,128], index: 1, kind: input, shape index: {}]   ;;  %s564_s0 = inlined_call_operand.vmem [shape: bf16[32,288], index: 0, kind: input, shape index: {}]   ;;  %s565_s2 = inlined_call_operand.vmem [shape: f32[32,1], index: 2, kind: input, shape index: {}]   ;;  %s566_s3 = inlined_call_operand.vmem [shape: f32[32,128], index: 3, kind: output, shape index: {}]  }
   0x1   :  { %v404_v0 = vld [vmem:[%s563_s1 + $0x38] sm:$0xff]  ;;  %v403_v2 = vld [vmem:[%s563_s1 + $0x30] sm:$0xff]  ;;  %v414_v3 = vld [vmem:[%s563_s1 + $0x88] sm:$0xff]  ;;  %424 = vset.pattern.permute.xlu0 %v426_v5  ;;  %425 = vset.pattern.permute.xlu1 %v426_v5 }
   0x2   :  { %v412_v1 = vld [vmem:[%s563_s1 + $0x78] sm:$0xff]  ;;  %228 = vmatpush.bf16.msra.mxu0 %v404_v0  ;;  %415 = vmatpush.bf16.msra.mxu3 %v404_v0  ;;  %v411_v4 = vld [vmem:[%s563_s1 + $0x70] sm:$0xff]  ;;  %v413_v6 = vld [vmem:[%s563_s1 + $0x80] sm:$0xff] }
   0x3   :  { %247 = vmatpush.bf16.msra.mxu1 %v412_v1  ;;  %272 = vmatpush.bf16.msra.mxu2 %v414_v3  ;;  %v303_v7 = vld [vmem:[%s564_s0 + $0x8] sm:$0xf]  ;;  %v393_v8 = vld [vmem:[%s564_s0 + $0x10] sm:$0xf0]  ;;  %v59_v12 = vld [vmem:[%s565_s2] sm:$0xff] }
   0x4   :  { %v402_v9 = vld [vmem:[%s563_s1 + $0x28] sm:$0xff]  ;;  %v304_v11 = vor.u32 %v393_v8, %v303_v7  ;;  %v401_v13 = vld [vmem:[%s563_s1 + $0x20] sm:$0xff]  ;;  %65 = vperm.xlu0 %424, %v59_v12   ;;  %v400_v15 = vld [vmem:[%s563_s1 + $0x18] sm:$0xff] }
   0x5   :  { %v410_v10 = vld [vmem:[%s563_s1 + $0x68] sm:$0xff]  ;;  %v409_v14 = vld [vmem:[%s563_s1 + $0x60] sm:$0xff]  ;;  %v408_v16 = vld [vmem:[%s563_s1 + $0x58] sm:$0xff] }
   0x6   :  { %229 = vmatpush.bf16.msra.mxu0 %v403_v2  ;;  %416 = vmatpush.bf16.msra.mxu3 %v403_v2  ;;  %v399_v17 = vld [vmem:[%s563_s1 + $0x10] sm:$0xff]  ;;  %v60_v19 = vld [vmem:[%s565_s2 + $0x8] sm:$0xff]  ;;  %v315_v21 = vld [vmem:[%s564_s0 + $0x20] sm:$0xf] }
   0x7   :  { %248 = vmatpush.bf16.msra.mxu1 %v411_v4  ;;  %273 = vmatpush.bf16.msra.mxu2 %v413_v6  ;;  %v61_v18 = vld [vmem:[%s565_s2 + $0x10] sm:$0xff]  ;;  %v396_v22 = vld [vmem:[%s564_s0 + $0x28] sm:$0xf0]  ;;  %v397_v26 = vld [vmem:[%s563_s1] sm:$0xff] }
   0x8   :  { %v407_v20 = vld [vmem:[%s563_s1 + $0x50] sm:$0xff]  ;;  %75 = vperm.xlu1 %425, %v61_v18   ;;  %v398_v23 = vld [vmem:[%s563_s1 + $0x8] sm:$0xff]  ;;  %v316_v25 = vor.u32 %v396_v22, %v315_v21  ;;  %v295_v27 = vld [vmem:[%s564_s0] sm:$0xf] }
   0x9   :  { %v406_v24 = vld [vmem:[%s563_s1 + $0x48] sm:$0xff]  ;;  %v62_v28 = vld [vmem:[%s565_s2 + $0x18] sm:$0xff]  ;;  %v395_v31 = vld [vmem:[%s564_s0 + $0x20] sm:$0xf0] }
   0xa   :  { %230 = vmatpush.bf16.msra.mxu0 %v402_v9  ;;  %417 = vmatpush.bf16.msra.mxu3 %v402_v9  ;;  %v392_v29 = vld [vmem:[%s564_s0 + $0x8] sm:$0xf0]  ;;  %v307_v30 = vld [vmem:[%s564_s0 + $0x18] sm:$0xf]  ;;  %v405_v32 = vld [vmem:[%s563_s1 + $0x40] sm:$0xff] }
   0xb   :  { %249 = vmatpush.bf16.msra.mxu1 %v410_v10  ;;  %389 = vmatmul.msk.bf16.vlgmr.msra.gmra.mxu2 %vm221_vm0, %v304_v11  ;;  %v391_v33 = vld [vmem:[%s564_s0 + $0x4] sm:$0xf]  ;;  %v297_v34 = vld [vmem:[%s564_s0 + $0xc] sm:$0xf0]  ;;  %v296_v35 = vor.u32 %v392_v29, %v295_v27  ;;  %v308_v36 = vor.u32 %v395_v31, %v307_v30  ;;  %v394_v38 = vld [vmem:[%s564_s0 + $0x1c] sm:$0xf] }
   0xc   :  { %70 = vperm.xlu0 %424, %v60_v19   ;;  %v300_v37 = vor.u32 %v391_v33, %v297_v34  ;;  %v309_v39 = vld [vmem:[%s564_s0 + $0x24] sm:$0xf0] }
   0xd   :  { %v312_v40 = vor.u32 %v394_v38, %v309_v39 }
   0xe   :  { %231 = vmatpush.bf16.msra.mxu0 %v401_v13  ;;  %418 = vmatpush.bf16.msra.mxu3 %v401_v13 }
   0xf   :  { %250 = vmatpush.bf16.msra.mxu1 %v409_v14 }
  0x10   :  { %80 = vperm.xlu1 %425, %v62_v28  }
  0x12   :  { %232 = vmatpush.bf16.msra.mxu0 %v400_v15  ;;  %419 = vmatpush.bf16.msra.mxu3 %v400_v15 }
  0x13   :  { %251 = vmatpush.bf16.msra.mxu1 %v408_v16 }
  0x16   :  { %233 = vmatpush.bf16.msra.mxu0 %v399_v17  ;;  %420 = vmatpush.bf16.msra.mxu3 %v399_v17 }
  0x17   :  { %252 = vmatpush.bf16.msra.mxu1 %v407_v20 }
  0x1a   :  { %234 = vmatpush.bf16.msra.mxu0 %v398_v23  ;;  %421 = vmatpush.bf16.msra.mxu3 %v398_v23 }
  0x1b   :  { %253 = vmatpush.bf16.msra.mxu1 %v406_v24  ;;  %390 = vmatmul.msk.bf16.gmra.mxu2 %vm221_vm0, %v316_v25 }
  0x1e   :  { %235 = vmatpush.bf16.msra.mxu0 %v397_v26  ;;  %422 = vmatpush.bf16.msra.mxu3 %v397_v26 }
  0x1f   :  { %254 = vmatpush.bf16.msra.mxu1 %v405_v32 }
  0x21   :  { %236 = vmatmul.bf16.vlgmr.msra.gmra.mxu0 %v296_v35  ;;  %241 = vmatmul.bf16.vlgmr.msra.gmra.mxu3 %v308_v36 }
  0x22   :  { %255 = vmatmul.bf16.vlgmr.msra.gmra.mxu1 %v300_v37 }
  0x32   :  { %260 = vmatmul.bf16.gmra.mxu1 %v312_v40 }
  0x76   :  { %v66_v41 = vpop.permute.xlu0 %65 }
  0x7a   :  { %v76_v53 = vpop.permute.xlu1 %75 }
  0x7e   :  { %v71_v48 = vpop.permute.xlu0 %70 }
  0x82   :  { %v81_v62 = vpop.permute.xlu1 %80 }
  0x8e   :  { %v275_v42 = vpop.f32.mrf.mxu2 }
  0x96   :  { %v277_v49 = vpop.f32.mrf.mxu2 }
  0x9e   :  { %v237_v43 = vpop.f32.mrf.mxu0  ;;  %v280_v58 = vpop.f32.mrf.mxu2 }
  0x9f   :  { %v238_v44 = vadd.f32 %v237_v43, %v66_v41  ;;  %v256_v45 = vpop.f32.mrf.mxu1 }
  0xa1   :  { %v257_v46 = vadd.f32 %v256_v45, %v238_v44 }
  0xa3   :  { %v276_v47 = vadd.f32 %v275_v42, %v257_v46 }
  0xa4   :  { %v242_v54 = vpop.f32.mrf.mxu3 }
  0xa5   :  { %285 = vst [vmem:[%s566_s3] sm:$0xff] %v276_v47  ;;  %v243_v57 = vadd.f32 %v242_v54, %v76_v53 }
  0xa6   :  { %v239_v50 = vpop.f32.mrf.mxu0  ;;  %v282_v3 = vpop.f32.mrf.mxu2 }
  0xa7   :  { %v240_v51 = vadd.f32 %v239_v50, %v71_v48  ;;  %v258_v52 = vpop.f32.mrf.mxu1 }
  0xa9   :  { %v259_v55 = vadd.f32 %v258_v52, %v240_v51 }
  0xab   :  { %v278_v56 = vadd.f32 %v277_v49, %v259_v55 }
  0xac   :  { %v244_v63 = vpop.f32.mrf.mxu3 }
  0xad   :  { %286 = vst [vmem:[%s566_s3 + $0x8] sm:$0xff] %v278_v56  ;;  %v245_v0 = vadd.f32 %v244_v63, %v81_v62 }
  0xaf   :  { %v261_v59 = vpop.f32.mrf.mxu1 }
  0xb0   :  { %v262_v60 = vadd.f32 %v261_v59, %v243_v57 }
  0xb2   :  { %v281_v61 = vadd.f32 %v280_v58, %v262_v60 }
  0xb4   :  { %287 = vst [vmem:[%s566_s3 + $0x10] sm:$0xff] %v281_v61 }
  0xb7   :  { %v263_v1 = vpop.f32.mrf.mxu1 }
  0xb8   :  { %v264_v2 = vadd.f32 %v263_v1, %v245_v0 }
  0xba   :  { %v283_v4 = vadd.f32 %v282_v3, %v264_v2 }
  0xbc   :  { %288 = vst [vmem:[%s566_s3 + $0x18] sm:$0xff] %v283_v4 }

// kernel: custom-call.37
= control target key start
LH: loop header
LB: loop body
LE: loop exit
PB: predicated region body
PF: predicated region fallthrough
CT: control target
= control target key end

     0   :  { %s383_s6 = smov 0   ;;  %s385_s7 = smov 0   ;;  %s432_s0 = inlined_call_operand.vmem [shape: f32[2,1,4,4], index: 0, kind: input, shape index: {}]   ;;  %s433_s1 = inlined_call_operand.vmem [shape: f32[2,1,4,4], index: 1, kind: output, shape index: {}]  }
   0x1   :  { %s387_s8 = smov 0  }
   0x2 LB: > { %s309_s9 = sadd.s32 4294967295, %s370_s8   ;;  %s33_s10 = sadd.s32 1, %s366_s7  ;;  %s370_s8 = sphi %s387_s8, %s7_s8   ;;  %s366_s7 = sphi %s385_s7, %s435_s7   ;;  %s362_s6 = sphi %s383_s6, %s434_s6  }
   0x3   : > { %p35_p0 = scmp.ge.s32.totalorder %s33_s10, 2  ;;  %p311_p1 = scmp.ge.s32.totalorder %s370_s8, 2 }
   0x4   : > { %s49_s11 = sand.u32 (!%p311_p1), 1, %s370_s8   ;;  %s313_s12 = sshll.u32 (!%p311_p1), %s366_s7, 2 }
   0x5   : > { %s437_s10 = smov (%p35_p0, %s33_s10), 0  ;;  %47 = sbr.rel (%p311_p1) target bundleno = 12 (0xc), region = 16 }
   0x6   : > { %s312_s13 = sshll.u32 (!%p311_p1), %s49_s11, 2  ;;  %s56_s16 = scalar_lea.vmem (!%p311_p1), %s432_s0, %s313_s12 }
   0x7   : > { %s51_s17 = scalar_lea.vmem (!%p311_p1), [#allocation1], %s312_s13 }
   0xa   : > { %v73_v0 = vld [vmem:[%s56_s16] sm:$0xf] }
   0xb   : > { %74 = vst [vmem:[%s51_s17] sm:$0xf] %v73_v0 }
   0xc PF: > { %p314_p2 = scmp.ge.s32.totalorder %s370_s8, 1  ;;  %p91_p3 = scmp.lt.s32.totalorder %s370_s8, 3 }
   0xe   : > { %p92_p4 = pnand %p314_p2, %p91_p3 }
  0x10   : > { %95 = sbr.rel (%p92_p4) target bundleno = 556 (0x22c), region = 50 }
  0x15   : > { %s410_s18 = sand.u32 1, %s309_s9   ;;  %v113_v1 = vlaneseq  ;;  %v372_v20 = vmov -1.0   ;;  %s318_s22 = sshll.u32 %s362_s6, 2 }
  0x16   : > { %s315_s19 = sshll.u32 %s410_s18, 2  ;;  %s216_s25 = scalar_lea.vmem %s433_s1, %s318_s22 }
  0x17   : > { %s104_s20 = scalar_lea.vmem [#allocation1], %s315_s19  ;;  %v114_v3 = vand.u32 127, %v113_v1  ;;  %v117_v4 = vshrl.u32 %v113_v1, 7  ;;  %s108_s21 = scalar_lea.vmem [#allocation3], %s315_s19 }
  0x18   : > { %v111_v2 = vld [vmem:[%s104_s20] sm:$0xf] }
  0x19   : > { %112 = vst [vmem:[#allocation0] sm:$0xf] %v111_v2  ;;  %vm119_vm0 = vcmp.eq.s32.totalorder %v117_v4, %v114_v3  ;;  %vm115_vm1 = vcmp.lt.s32.totalorder %v114_v3, 4  ;;  %vm124_vm2 = vcmp.ge.s32.totalorder %v117_v4, %v114_v3  ;;  %vm151_vm8 = vcmp.eq.s32.totalorder %v114_v3, 0 }
  0x1a   : > { %vm125_vm3 = vmand %vm124_vm2, %vm115_vm1  ;;  %vm148_vm9 = vcmp.eq.s32.totalorder %v114_v3, %v117_v4  ;;  %v152_v21 = vsel %vm151_vm8, 1.0, %v372_v20  ;;  %vm159_vm10 = vcmp.eq.s32.totalorder %v114_v3, 1  ;;  %vm169_vm11 = vcmp.eq.s32.totalorder %v114_v3, 2 }
  0x1b   : > { %v153_v22 = vsel %vm148_vm9, %v152_v21, 0.0  ;;  %vm179_vm12 = vcmp.eq.s32.totalorder %v114_v3, 3 }
  0x20   : > { %v120_v5 = vld [vmem:[#allocation0] sm:$0xff] }
  0x21   : > { %v121_v6 = vsel %vm119_vm0, %v120_v5, 0.0  ;;  %v126_v15 = vsel %vm125_vm3, %v120_v5, 0.0 }
  0x22   : > { %122 = vadd.xlane.f32.xlu0 %v121_v6 }
  0x95   : > { %v123_v7 = vpop.xlane.xlu0 %122 }
  0x96   : > { %346 = vrcp.f32 %v123_v7  ;;  %v138_v11 = vand.u32 2147483648, %v123_v7  ;;  %v136_v13 = vand.u32 2147483647, %v123_v7  ;;  %vm132_vm5 = vweird.f32 %v123_v7 }
  0x98   : > { %v139_v16 = vor.u32 1.1754944e-38, %v138_v11  ;;  %vm137_vm7 = vcmp.eq.f32.partialorder %v136_v13, 8.507059e+37 }
  0x9c   : > { %v347_v8 = vpop.eup %346 }
  0x9d   : > { %v128_v9 = vmul.f32 %v347_v8, %v123_v7  ;;  %vm133_vm4 = vweird.f32 %v347_v8 }
  0x9e   : > { %vm134_vm6 = vmor %vm132_vm5, %vm133_vm4 }
  0x9f   : > { %v129_v10 = vsub.f32 1.0, %v128_v9 }
  0xa1   : > { %v130_v12 = vmul.f32 %v347_v8, %v129_v10 }
  0xa3   : > { %v131_v14 = vadd.f32 %v347_v8, %v130_v12 }
  0xa5   : > { %v135_v17 = vsel %vm134_vm6, %v347_v8, %v131_v14 }
  0xa6   : > { %v140_v18 = vsel %vm137_vm7, %v139_v16, %v135_v17 }
  0xa7   : > { %v141_v19 = vmul.f32 %v140_v18, %v126_v15 }
  0xa9   : > { %142 = vst [vmem:[#allocation4] sm:$0xff] %v141_v19 }
  0xb0   : > { %v155_v23 = vld [vmem:[#allocation4 + $0x1] ss:$0 sm:$0xff]  ;;  %v165_v26 = vld [vmem:[#allocation4 + $0x2] ss:$0 sm:$0xff]  ;;  %v175_v31 = vld [vmem:[#allocation4 + $0x3] ss:$0 sm:$0xff] }
  0xb1   : > { %v156_v24 = vxor.u32 2147483648, %v155_v23  ;;  %v166_v28 = vxor.u32 2147483648, %v165_v26  ;;  %v176_v33 = vxor.u32 2147483648, %v175_v31 }
  0xb3   : > { %v160_v25 = vmul.f32 %v156_v24, %v153_v22 }
  0xb5   : > { %161 = vadd.xlane.f32.xlu0 %v160_v25 }
 0x128   : > { %v162_v27 = vpop.xlane.xlu0 %161 }
 0x129   : > { %v163_v29 = vsel %vm159_vm10, %v162_v27, %v153_v22 }
 0x12a   : > { %v170_v30 = vmul.f32 %v166_v28, %v163_v29 }
 0x12c   : > { %171 = vadd.xlane.f32.xlu1 %v170_v30 }
 0x19f   : > { %v172_v32 = vpop.xlane.xlu1 %171 }
 0x1a0   : > { %v173_v34 = vsel %vm169_vm11, %v172_v32, %v163_v29 }
 0x1a1   : > { %v180_v35 = vmul.f32 %v176_v33, %v173_v34 }
 0x1a3   : > { %181 = vadd.xlane.f32.xlu1 %v180_v35 }
 0x216   : > { %v182_v36 = vpop.xlane.xlu1 %181 }
 0x217   : > { %v183_v37 = vsel %vm179_vm12, %v182_v36, %v173_v34 }
 0x218   : > { %v198_v38 = vmul.f32 %v183_v37, %v140_v18 }
 0x21a   : > { %v200_v39 = vsel %vm132_vm5, %v183_v37, %v198_v38 }
 0x21b   : > { %201 = vst [vmem:[#allocation2] sm:$0xff] %v200_v39 }
 0x222   : > { %v204_v40 = vld [vmem:[#allocation2] sm:$0xf] }
 0x223   : > { %207 = vst [vmem:[%s108_s21] sm:$0xf] %v204_v40 }
 0x22a   : > { %v233_v41 = vld [vmem:[%s108_s21] sm:$0xf] }
 0x22b   : > { %234 = vst [vmem:[%s216_s25] sm:$0xf] %v233_v41 }
 0x22c PF: > { %s7_s8 = sadd.s32 1, %s370_s8   ;;  %s434_s6 = smov %s366_s7 }
 0x22d   : > { %p4_p5 = scmp.ge.s32.totalorder %s7_s8, 4   ;;  %s435_s7 = smov %s437_s10 }
 0x22f   :  { %6 = sbr.rel (!%p4_p5) target bundleno = 2 (0x2), region = 113 }

// kernel: custom-call.36
= control target key start
LH: loop header
LB: loop body
LE: loop exit
PB: predicated region body
PF: predicated region fallthrough
CT: control target
= control target key end

     0   :  { %s382_s6 = smov 0   ;;  %s384_s7 = smov 0   ;;  %s431_s0 = inlined_call_operand.vmem [shape: f32[2,1,4,4], index: 0, kind: input, shape index: {}]   ;;  %s432_s1 = inlined_call_operand.vmem [shape: f32[2,1,4,4], index: 1, kind: output, shape index: {}]  }
   0x1   :  { %s386_s8 = smov 0  }
   0x2 LB: > { %s308_s9 = sadd.s32 4294967295, %s369_s8   ;;  %s33_s10 = sadd.s32 1, %s365_s7  ;;  %s369_s8 = sphi %s386_s8, %s7_s8   ;;  %s365_s7 = sphi %s384_s7, %s434_s7   ;;  %s361_s6 = sphi %s382_s6, %s433_s6  }
   0x3   : > { %p35_p0 = scmp.ge.s32.totalorder %s33_s10, 2  ;;  %p310_p1 = scmp.ge.s32.totalorder %s369_s8, 2 }
   0x4   : > { %s49_s11 = sand.u32 (!%p310_p1), 1, %s369_s8   ;;  %s312_s12 = sshll.u32 (!%p310_p1), %s365_s7, 2 }
   0x5   : > { %s436_s10 = smov (%p35_p0, %s33_s10), 0  ;;  %47 = sbr.rel (%p310_p1) target bundleno = 12 (0xc), region = 16 }
   0x6   : > { %s311_s13 = sshll.u32 (!%p310_p1), %s49_s11, 2  ;;  %s56_s16 = scalar_lea.vmem (!%p310_p1), %s431_s0, %s312_s12 }
   0x7   : > { %s51_s17 = scalar_lea.vmem (!%p310_p1), [#allocation1], %s311_s13 }
   0xa   : > { %v73_v0 = vld [vmem:[%s56_s16] sm:$0xf] }
   0xb   : > { %74 = vst [vmem:[%s51_s17] sm:$0xf] %v73_v0 }
   0xc PF: > { %p313_p2 = scmp.ge.s32.totalorder %s369_s8, 1  ;;  %p91_p3 = scmp.lt.s32.totalorder %s369_s8, 3 }
   0xe   : > { %p92_p4 = pnand %p313_p2, %p91_p3 }
  0x10   : > { %95 = sbr.rel (%p92_p4) target bundleno = 556 (0x22c), region = 50 }
  0x15   : > { %s409_s18 = sand.u32 1, %s308_s9   ;;  %v113_v1 = vlaneseq  ;;  %v371_v20 = vmov -1.0   ;;  %s317_s22 = sshll.u32 %s361_s6, 2 }
  0x16   : > { %s314_s19 = sshll.u32 %s409_s18, 2  ;;  %s215_s25 = scalar_lea.vmem %s432_s1, %s317_s22 }
  0x17   : > { %s104_s20 = scalar_lea.vmem [#allocation1], %s314_s19  ;;  %v114_v3 = vand.u32 127, %v113_v1  ;;  %v117_v4 = vshrl.u32 %v113_v1, 7  ;;  %s108_s21 = scalar_lea.vmem [#allocation3], %s314_s19 }
  0x18   : > { %v111_v2 = vld [vmem:[%s104_s20] sm:$0xf] }
  0x19   : > { %112 = vst [vmem:[#allocation0] sm:$0xf] %v111_v2  ;;  %vm119_vm0 = vcmp.eq.s32.totalorder %v117_v4, %v114_v3  ;;  %vm115_vm1 = vcmp.lt.s32.totalorder %v114_v3, 4  ;;  %vm124_vm2 = vcmp.le.s32.totalorder %v117_v4, %v114_v3  ;;  %vm151_vm8 = vcmp.eq.s32.totalorder %v114_v3, 3 }
  0x1a   : > { %vm125_vm3 = vmand %vm124_vm2, %vm115_vm1  ;;  %vm148_vm9 = vcmp.eq.s32.totalorder %v114_v3, %v117_v4  ;;  %v152_v21 = vsel %vm151_vm8, 1.0, %v371_v20  ;;  %vm159_vm10 = vcmp.eq.s32.totalorder %v114_v3, 2  ;;  %vm169_vm11 = vcmp.eq.s32.totalorder %v114_v3, 1 }
  0x1b   : > { %v153_v22 = vsel %vm148_vm9, %v152_v21, 0.0  ;;  %vm178_vm12 = vcmp.eq.s32.totalorder %v114_v3, 0 }
  0x20   : > { %v120_v5 = vld [vmem:[#allocation0] sm:$0xff] }
  0x21   : > { %v121_v6 = vsel %vm119_vm0, %v120_v5, 0.0  ;;  %v126_v15 = vsel %vm125_vm3, %v120_v5, 0.0 }
  0x22   : > { %122 = vadd.xlane.f32.xlu0 %v121_v6 }
  0x95   : > { %v123_v7 = vpop.xlane.xlu0 %122 }
  0x96   : > { %345 = vrcp.f32 %v123_v7  ;;  %v138_v11 = vand.u32 2147483648, %v123_v7  ;;  %v136_v13 = vand.u32 2147483647, %v123_v7  ;;  %vm132_vm5 = vweird.f32 %v123_v7 }
  0x98   : > { %v139_v16 = vor.u32 1.1754944e-38, %v138_v11  ;;  %vm137_vm7 = vcmp.eq.f32.partialorder %v136_v13, 8.507059e+37 }
  0x9c   : > { %v346_v8 = vpop.eup %345 }
  0x9d   : > { %v128_v9 = vmul.f32 %v346_v8, %v123_v7  ;;  %vm133_vm4 = vweird.f32 %v346_v8 }
  0x9e   : > { %vm134_vm6 = vmor %vm132_vm5, %vm133_vm4 }
  0x9f   : > { %v129_v10 = vsub.f32 1.0, %v128_v9 }
  0xa1   : > { %v130_v12 = vmul.f32 %v346_v8, %v129_v10 }
  0xa3   : > { %v131_v14 = vadd.f32 %v346_v8, %v130_v12 }
  0xa5   : > { %v135_v17 = vsel %vm134_vm6, %v346_v8, %v131_v14 }
  0xa6   : > { %v140_v18 = vsel %vm137_vm7, %v139_v16, %v135_v17 }
  0xa7   : > { %v141_v19 = vmul.f32 %v140_v18, %v126_v15 }
  0xa9   : > { %142 = vst [vmem:[#allocation4] sm:$0xff] %v141_v19 }
  0xb0   : > { %v155_v23 = vld [vmem:[#allocation4 + $0x2] ss:$0 sm:$0xff]  ;;  %v165_v26 = vld [vmem:[#allocation4 + $0x1] ss:$0 sm:$0xff]  ;;  %v174_v31 = vld [vmem:[#allocation4] ss:$0 sm:$0xff] }
  0xb1   : > { %v156_v24 = vxor.u32 2147483648, %v155_v23  ;;  %v166_v28 = vxor.u32 2147483648, %v165_v26  ;;  %v175_v33 = vxor.u32 2147483648, %v174_v31 }
  0xb3   : > { %v160_v25 = vmul.f32 %v156_v24, %v153_v22 }
  0xb5   : > { %161 = vadd.xlane.f32.xlu0 %v160_v25 }
 0x128   : > { %v162_v27 = vpop.xlane.xlu0 %161 }
 0x129   : > { %v163_v29 = vsel %vm159_vm10, %v162_v27, %v153_v22 }
 0x12a   : > { %v170_v30 = vmul.f32 %v166_v28, %v163_v29 }
 0x12c   : > { %171 = vadd.xlane.f32.xlu1 %v170_v30 }
 0x19f   : > { %v172_v32 = vpop.xlane.xlu1 %171 }
 0x1a0   : > { %v173_v34 = vsel %vm169_vm11, %v172_v32, %v163_v29 }
 0x1a1   : > { %v179_v35 = vmul.f32 %v175_v33, %v173_v34 }
 0x1a3   : > { %180 = vadd.xlane.f32.xlu1 %v179_v35 }
 0x216   : > { %v181_v36 = vpop.xlane.xlu1 %180 }
 0x217   : > { %v182_v37 = vsel %vm178_vm12, %v181_v36, %v173_v34 }
 0x218   : > { %v197_v38 = vmul.f32 %v182_v37, %v140_v18 }
 0x21a   : > { %v199_v39 = vsel %vm132_vm5, %v182_v37, %v197_v38 }
 0x21b   : > { %200 = vst [vmem:[#allocation2] sm:$0xff] %v199_v39 }
 0x222   : > { %v203_v40 = vld [vmem:[#allocation2] sm:$0xf] }
 0x223   : > { %206 = vst [vmem:[%s108_s21] sm:$0xf] %v203_v40 }
 0x22a   : > { %v232_v41 = vld [vmem:[%s108_s21] sm:$0xf] }
 0x22b   : > { %233 = vst [vmem:[%s215_s25] sm:$0xf] %v232_v41 }
 0x22c PF: > { %s7_s8 = sadd.s32 1, %s369_s8   ;;  %s433_s6 = smov %s365_s7 }
 0x22d   : > { %p4_p5 = scmp.ge.s32.totalorder %s7_s8, 4   ;;  %s434_s7 = smov %s436_s10 }
 0x22f   :  { %6 = sbr.rel (!%p4_p5) target bundleno = 2 (0x2), region = 112 }

// kernel: net_forward.56
= control target key start
LH: loop header
LB: loop body
LE: loop exit
PB: predicated region body
PF: predicated region fallthrough
CT: control target
= control target key end

     0   :  { %s512_s9 = smov 0   ;;  %s514_s10 = smov 0   ;;  %s570_s0 = inlined_call_operand.vmem [shape: f32[2,8,4,64], index: 0, kind: input, shape index: {}]   ;;  %s571_s1 = inlined_call_operand.vmem [shape: f32[2,8,4,8,64], index: 1, kind: input, shape index: {}]   ;;  %s572_s2 = inlined_call_operand.vmem [shape: f32[2,8,8,64], index: 2, kind: output, shape index: {}]  }
   0x1   :  { %s516_s11 = smov 0   ;;  %s518_s12 = smov 0  }
   0x2   :  { %s520_s13 = smov 0  }
   0x3 LB: > { %s27_s14 = sadd.s32 1, %s487_s11  ;;  %s31_s15 = sadd.s32 1, %s491_s12  ;;  %s495_s13 = sphi %s520_s13, %s12_s13   ;;  %s491_s12 = sphi %s518_s12, %s576_s12   ;;  %s487_s11 = sphi %s516_s11, %s575_s11   ;;  %s483_s10 = sphi %s514_s10, %s574_s10   ;;  %s479_s9 = sphi %s512_s9, %s573_s9  }
   0x4   : > { %p29_p0 = scmp.ge.s32.totalorder %s27_s14, 8  ;;  %p407_p1 = scmp.ge.s32.totalorder %s495_s13, 1 }
   0x5   : > { %p166_p2 = scmp.lt.s32.totalorder %s495_s13, 17 }
   0x6   : > { %s578_s14 = smov (%p29_p0, %s27_s14), 0  ;;  %s580_s15 = smov (!%p29_p0, %s31_s15), %s491_s12 }
   0x7   : > { %p167_p3 = pnand %p407_p1, %p166_p2  ;;  %p33_p4 = scmp.ge.s32.totalorder %s580_s15, 2 }
   0x8   : > { %p212_p5 = scmp.lt.s32.totalorder (!%p167_p3), %s483_s10, 1  ;;  %p214_p6 = scmp.lt.s32.totalorder (!%p167_p3), %s479_s9, 7 }
   0x9   : > { %s582_s15 = smov (%p33_p4, %s580_s15), 0  ;;  %170 = sbr.rel (%p167_p3) target bundleno = 36 (0x24), region = 28 }
   0xe   : > { %s584_s10 = smov (!%p212_p5, %s483_s10), 1  ;;  %s586_s9 = smov (!%p214_p6, %s479_s9), 7  ;;  %vm267_vm0 = vcmask 523264  }
   0xf   : > { %s408_s16 = sshll.u32 %s584_s10, 3  ;;  %s411_s17 = sshll.u32 %s584_s10, 5 }
  0x10   : > { %s542_s18 = sadd.s32 %s408_s16, %s586_s9  ;;  %s410_s19 = sshll.u32 %s586_s9, 2 }
  0x11   : > { %s409_s20 = sshll.u32 %s542_s18, 2  ;;  %s232_s21 = sadd.s32 %s411_s17, %s410_s19 }
  0x12   : > { %s222_s24 = scalar_lea.vmem %s570_s0, %s409_s20  ;;  %s412_s25 = sshll.u32 %s232_s21, 3 }
  0x13   : > { %s234_s28 = scalar_lea.vmem %s571_s1, %s412_s25  ;;  %v246_v0 = vld [vmem:[%s222_s24] sm:$0xf]  ;;  %s414_s29 = sshll.u32 %s542_s18, 3 }
  0x14   : > { %v247_v1 = vld [vmem:[%s234_s28] sm:$0xff]  ;;  %v252_v2 = vrot.slane %v246_v0, 1  ;;  %v253_v3 = vrot.slane %v246_v0, 2  ;;  %v254_v4 = vrot.slane %v246_v0, 3  ;;  %v248_v5 = vld [vmem:[%s234_s28 + $0x8] sm:$0xff]  ;;  %v249_v6 = vld [vmem:[%s234_s28 + $0x10] sm:$0xff]  ;;  %s245_s4 = scalar_lea.vmem %s572_s2, %s414_s29 }
  0x15   : > { %v250_v7 = vld [vmem:[%s234_s28 + $0x18] sm:$0xff]  ;;  %v255_v8 = vperm.slane %v246_v0, 0 }
  0x16   : > { %v256_v9 = vperm.slane %v252_v2, 0  ;;  %v257_v10 = vperm.slane %v253_v3, 0  ;;  %v258_v11 = vperm.slane %v254_v4, 0 }
  0x17   : > { %v263_v12 = vmul.f32 %v255_v8, %v247_v1 }
  0x18   : > { %v264_v13 = vmul.f32 %v256_v9, %v248_v5  ;;  %v265_v14 = vmul.f32 %v257_v10, %v249_v6  ;;  %v266_v15 = vmul.f32 %v258_v11, %v250_v7 }
  0x19   : > { %v268_v16 = vsel %vm267_vm0, %v263_v12, 0.0 }
  0x1a   : > { %v269_v17 = vsel %vm267_vm0, %v264_v13, 0.0  ;;  %v271_v18 = vsel %vm267_vm0, %v265_v14, 0.0  ;;  %v273_v20 = vsel %vm267_vm0, %v266_v15, 0.0 }
  0x1b   : > { %v270_v19 = vadd.f32 %v269_v17, %v268_v16 }
  0x1d   : > { %v272_v21 = vadd.f32 %v271_v18, %v270_v19 }
  0x1f   : > { %v274_v22 = vadd.f32 %v273_v20, %v272_v21 }
  0x21   : > { %v275_v23 = vmul.f32 0.083333336, %v274_v22 }
  0x23   : > { %276 = vst.msk [vmem:[%s245_s4] sm:$0xff] %vm267_vm0, %v275_v23 }
  0x24 PF: > { %s12_s13 = sadd.s32 1, %s495_s13   ;;  %s573_s9 = smov %s487_s11 }
  0x25   : > { %p9_p7 = scmp.ge.s32.totalorder %s12_s13, 18   ;;  %s574_s10 = smov %s491_s12 }
  0x26   : > { %s575_s11 = smov %s578_s14  ;;  %s576_s12 = smov %s582_s15 }
  0x27   :  { %11 = sbr.rel (!%p9_p7) target bundleno = 3 (0x3), region = 61 }

// kernel: net_forward.57
= control target key start
LH: loop header
LB: loop body
LE: loop exit
PB: predicated region body
PF: predicated region fallthrough
CT: control target
= control target key end

     0   :  { %s674_s12 = smov 0   ;;  %s676_s13 = smov 0   ;;  %s818_s0 = inlined_call_operand.vmem [shape: bf16[8,80], index: 0, kind: input, shape index: {}]   ;;  %s819_s1 = inlined_call_operand.vmem [shape: bf16[80,1024], index: 1, kind: input, shape index: {}]   ;;  %s820_s2 = inlined_call_operand.vmem [shape: f32[8,1], index: 2, kind: input, shape index: {}]   ;;  %s821_s3 = inlined_call_operand.vmem [shape: f32[8,1024], index: 3, kind: output, shape index: {}]  }
   0x1   :  { %s678_s14 = smov 0  }
   0x2 LB: > { %s485_s15 = sadd.s32 4294967295, %s651_s14   ;;  %s691_s16 = sadd.s32 1, %s651_s14   ;;  %s651_s14 = sphi %s678_s14, %s824_s14   ;;  %s647_s13 = sphi %s676_s13, %s823_s13   ;;  %s643_s12 = sphi %s674_s12, %s822_s12  }
   0x3   : > { %s38_s17 = ssub.s32 %s651_s14, %s691_s16  ;;  %s41_s18 = sadd.s32 1, %s647_s13 }
   0x4   : > { %p39_p0 = scmp.eq.s32.totalorder %s38_s17, 0  ;;  %p48_p1 = scmp.ne.s32.totalorder %s647_s13, %s643_s12 }
   0x5   : > { %p49_p2 = scmp.eq.s32.totalorder %s651_s14, 0  ;;  %p488_p4 = scmp.ge.s32.totalorder %s651_s14, 2 }
   0x6   : > { %s700_s19 = scalar_select %p39_p0, %s647_s13, %s41_s18  }
   0x7   : > { %p50_p3 = por %p49_p2, %p48_p1  ;;  %127 = sbr.rel (%p488_p4) target bundleno = 36 (0x24), region = 24 }
   0xc   : > { %130 = sbr.rel (!%p50_p3) target bundleno = 36 (0x24), region = 28  ;;  %s132_s20 = sand.u32 (%p50_p3), 1, %s647_s13  }
   0xd   : > { %s580_s21 = sshll.u32 (%p50_p3), %s651_s14, 4  ;;  %s601_s22 = smul.u32 (%p50_p3), 160, %s132_s20 }
   0xe   : > { %s708_s25 = scalar_lea.vmem (%p50_p3), %s819_s1, %s580_s21 }
   0xf   : > { %v150_v0 = vld [vmem:[%s708_s25] sm:$0xff] (%p50_p3)  ;;  %v152_v1 = vld [vmem:[%s708_s25 + $0x8] sm:$0xff] (%p50_p3)  ;;  %s713_s26 = scalar_lea.vmem (%p50_p3), [#allocation2], %s601_s22 }
  0x10   : > { %v154_v2 = vld [vmem:[%s708_s25 + $0x20] sm:$0xff] (%p50_p3)  ;;  %151 = vst [vmem:[%s713_s26] sm:$0xff] (%p50_p3), %v150_v0  ;;  %v156_v3 = vld [vmem:[%s708_s25 + $0x28] sm:$0xff] (%p50_p3) }
  0x11   : > { %153 = vst [vmem:[%s713_s26 + $0x8] sm:$0xff] %v152_v1  ;;  %v158_v4 = vld [vmem:[%s708_s25 + $0x40] sm:$0xff]  ;;  %v160_v5 = vld [vmem:[%s708_s25 + $0x48] sm:$0xff] }
  0x12   : > { %155 = vst [vmem:[%s713_s26 + $0x10] sm:$0xff] %v154_v2  ;;  %v162_v6 = vld [vmem:[%s708_s25 + $0x60] sm:$0xff]  ;;  %v164_v7 = vld [vmem:[%s708_s25 + $0x68] sm:$0xff] }
  0x13   : > { %157 = vst [vmem:[%s713_s26 + $0x18] sm:$0xff] %v156_v3  ;;  %v166_v8 = vld [vmem:[%s708_s25 + $0x80] sm:$0xff]  ;;  %v168_v9 = vld [vmem:[%s708_s25 + $0x88] sm:$0xff] }
  0x14   : > { %159 = vst [vmem:[%s713_s26 + $0x20] sm:$0xff] %v158_v4  ;;  %v170_v10 = vld [vmem:[%s708_s25 + $0xa0] sm:$0xff]  ;;  %v172_v11 = vld [vmem:[%s708_s25 + $0xa8] sm:$0xff] }
  0x15   : > { %161 = vst [vmem:[%s713_s26 + $0x28] sm:$0xff] %v160_v5  ;;  %v174_v12 = vld [vmem:[%s708_s25 + $0xc0] sm:$0xff]  ;;  %v176_v13 = vld [vmem:[%s708_s25 + $0xc8] sm:$0xff] }
  0x16   : > { %163 = vst [vmem:[%s713_s26 + $0x30] sm:$0xff] %v162_v6  ;;  %v178_v14 = vld [vmem:[%s708_s25 + $0xe0] sm:$0xff]  ;;  %v180_v15 = vld [vmem:[%s708_s25 + $0xe8] sm:$0xff] }
  0x17   : > { %165 = vst [vmem:[%s713_s26 + $0x38] sm:$0xff] %v164_v7  ;;  %v182_v16 = vld [vmem:[%s708_s25 + $0x100] sm:$0xff]  ;;  %v184_v17 = vld [vmem:[%s708_s25 + $0x108] sm:$0xff] }
  0x18   : > { %167 = vst [vmem:[%s713_s26 + $0x40] sm:$0xff] %v166_v8  ;;  %v186_v18 = vld [vmem:[%s708_s25 + $0x120] sm:$0xff]  ;;  %v188_v19 = vld [vmem:[%s708_s25 + $0x128] sm:$0xff] }
  0x19   : > { %169 = vst [vmem:[%s713_s26 + $0x48] sm:$0xff] %v168_v9 }
  0x1a   : > { %171 = vst [vmem:[%s713_s26 + $0x50] sm:$0xff] %v170_v10 }
  0x1b   : > { %173 = vst [vmem:[%s713_s26 + $0x58] sm:$0xff] %v172_v11 }
  0x1c   : > { %175 = vst [vmem:[%s713_s26 + $0x60] sm:$0xff] %v174_v12 }
  0x1d   : > { %177 = vst [vmem:[%s713_s26 + $0x68] sm:$0xff] %v176_v13 }
  0x1e   : > { %179 = vst [vmem:[%s713_s26 + $0x70] sm:$0xff] %v178_v14 }
  0x1f   : > { %181 = vst [vmem:[%s713_s26 + $0x78] sm:$0xff] %v180_v15 }
  0x20   : > { %183 = vst [vmem:[%s713_s26 + $0x80] sm:$0xff] %v182_v16 }
  0x21   : > { %185 = vst [vmem:[%s713_s26 + $0x88] sm:$0xff] %v184_v17 }
  0x22   : > { %187 = vst [vmem:[%s713_s26 + $0x90] sm:$0xff] %v186_v18 }
  0x23   : > { %189 = vst [vmem:[%s713_s26 + $0x98] sm:$0xff] %v188_v19 }
  0x24 PF: > { %p491_p5 = scmp.ge.s32.totalorder %s651_s14, 1  ;;  %p194_p6 = scmp.lt.s32.totalorder %s651_s14, 3 }
  0x26   : > { %p195_p7 = pnand %p491_p5, %p194_p6 }
  0x27   : > { %s201_s27 = sand.u32 (!%p195_p7), 1, %s643_s12   ;;  %s492_s7 = sshll.u32 (!%p195_p7), %s485_s15, 2 }
  0x28   : > { %198 = sbr.rel (%p195_p7) target bundleno = 209 (0xd1), region = 51  ;;  %p226_p8 = scmp.lt.s32.totalorder (!%p195_p7), %s492_s7, 7 }
  0x29   : > { %s602_s30 = smul.u32 (!%p195_p7), 160, %s201_s27 }
  0x2b   : > { %s758_s4 = scalar_lea.vmem (!%p195_p7), [#allocation2], %s602_s30 }
  0x2d   : > { %v253_v20 = vld [vmem:[%s820_s2] sm:$0xff]  ;;  %v653_v21 = vmov 0   ;;  %v599_v23 = vld [vmem:[%s758_s4 + $0x8c] sm:$0xf0]  ;;  %v562_v26 = vld [vmem:[%s758_s4 + $0x90] sm:$0xf0] }
  0x2e   : > { %628 = vset.pattern.permute.xlu0 %v653_v21  ;;  %v560_v22 = vld [vmem:[%s758_s4 + $0x80] sm:$0xf]  ;;  %v597_v24 = vld [vmem:[%s758_s4 + $0x84] sm:$0xf]  ;;  %v568_v27 = vld [vmem:[%s758_s4 + $0x88] sm:$0xf] }
  0x2f   : > { %256 = vperm.xlu0 %628, %v253_v20   ;;  %v561_v25 = vor.u32 %v599_v23, %v560_v22  ;;  %v600_v28 = vld [vmem:[%s758_s4 + $0x94] sm:$0xf0]  ;;  %v565_v29 = vor.u32 %v597_v24, %v562_v26  ;;  %v598_v31 = vld [vmem:[%s758_s4 + $0x8c] sm:$0xf]  ;;  %v570_v32 = vld [vmem:[%s758_s4 + $0x98] sm:$0xf0] }
  0x30   : > { %v569_v30 = vor.u32 %v600_v28, %v568_v27  ;;  %v544_v33 = vld [vmem:[%s758_s4 + $0x60] sm:$0xf]  ;;  %v573_v34 = vor.u32 %v598_v31, %v570_v32  ;;  %v595_v35 = vld [vmem:[%s758_s4 + $0x6c] sm:$0xf0]  ;;  %v593_v36 = vld [vmem:[%s758_s4 + $0x64] sm:$0xf] }
  0x31   : > { %366 = vmatpush.bf16.msra.mxu0 %v561_v25  ;;  %v546_v37 = vld [vmem:[%s758_s4 + $0x70] sm:$0xf0]  ;;  %379 = vmatpush.bf16.msra.mxu1 %v565_v29  ;;  %v545_v38 = vor.u32 %v595_v35, %v544_v33  ;;  %v552_v40 = vld [vmem:[%s758_s4 + $0x68] sm:$0xf]  ;;  %v596_v41 = vld [vmem:[%s758_s4 + $0x74] sm:$0xf0] }
  0x32   : > { %392 = vmatpush.bf16.msra.mxu2 %v569_v30  ;;  %v549_v39 = vor.u32 %v593_v36, %v546_v37  ;;  %v594_v42 = vld [vmem:[%s758_s4 + $0x6c] sm:$0xf]  ;;  %405 = vmatpush.bf16.msra.mxu3 %v573_v34  ;;  %v553_v43 = vor.u32 %v596_v41, %v552_v40  ;;  %v554_v44 = vld [vmem:[%s758_s4 + $0x78] sm:$0xf0]  ;;  %v528_v45 = vld [vmem:[%s758_s4 + $0x40] sm:$0xf] }
  0x33   : > { %v591_v46 = vld [vmem:[%s758_s4 + $0x4c] sm:$0xf0]  ;;  %v557_v47 = vor.u32 %v594_v42, %v554_v44  ;;  %v589_v48 = vld [vmem:[%s758_s4 + $0x44] sm:$0xf]  ;;  %v530_v49 = vld [vmem:[%s758_s4 + $0x50] sm:$0xf0] }
  0x34   : > { %v536_v50 = vld [vmem:[%s758_s4 + $0x48] sm:$0xf]  ;;  %v529_v51 = vor.u32 %v591_v46, %v528_v45  ;;  %v592_v52 = vld [vmem:[%s758_s4 + $0x54] sm:$0xf0]  ;;  %v590_v53 = vld [vmem:[%s758_s4 + $0x4c] sm:$0xf]  ;;  %v533_v55 = vor.u32 %v589_v48, %v530_v49 }
  0x35   : > { %367 = vmatpush.bf16.msra.mxu0 %v545_v38  ;;  %v538_v54 = vld [vmem:[%s758_s4 + $0x58] sm:$0xf0]  ;;  %380 = vmatpush.bf16.msra.mxu1 %v549_v39  ;;  %v537_v56 = vor.u32 %v592_v52, %v536_v50  ;;  %v512_v57 = vld [vmem:[%s758_s4 + $0x20] sm:$0xf]  ;;  %v587_v58 = vld [vmem:[%s758_s4 + $0x2c] sm:$0xf0] }
  0x36   : > { %393 = vmatpush.bf16.msra.mxu2 %v553_v43  ;;  %v585_v59 = vld [vmem:[%s758_s4 + $0x24] sm:$0xf]  ;;  %406 = vmatpush.bf16.msra.mxu3 %v557_v47  ;;  %v541_v60 = vor.u32 %v590_v53, %v538_v54  ;;  %v514_v61 = vld [vmem:[%s758_s4 + $0x30] sm:$0xf0]  ;;  %v520_v62 = vld [vmem:[%s758_s4 + $0x28] sm:$0xf]  ;;  %v513_v2 = vor.u32 %v587_v58, %v512_v57 }
  0x37   : > { %v588_v63 = vld [vmem:[%s758_s4 + $0x34] sm:$0xf0]  ;;  %v586_v0 = vld [vmem:[%s758_s4 + $0x2c] sm:$0xf]  ;;  %v522_v1 = vld [vmem:[%s758_s4 + $0x38] sm:$0xf0]  ;;  %v517_v3 = vor.u32 %v585_v59, %v514_v61 }
  0x38   : > { %v521_v4 = vor.u32 %v588_v63, %v520_v62  ;;  %v496_v5 = vld [vmem:[%s758_s4] sm:$0xf]  ;;  %v583_v6 = vld [vmem:[%s758_s4 + $0xc] sm:$0xf0]  ;;  %v581_v7 = vld [vmem:[%s758_s4 + $0x4] sm:$0xf]  ;;  %v525_v8 = vor.u32 %v586_v0, %v522_v1 }
  0x39   : > { %368 = vmatpush.bf16.msra.mxu0 %v529_v51  ;;  %381 = vmatpush.bf16.msra.mxu1 %v533_v55  ;;  %v498_v9 = vld [vmem:[%s758_s4 + $0x10] sm:$0xf0]  ;;  %v504_v10 = vld [vmem:[%s758_s4 + $0x8] sm:$0xf]  ;;  %v584_v11 = vld [vmem:[%s758_s4 + $0x14] sm:$0xf0]  ;;  %v497_v14 = vor.u32 %v583_v6, %v496_v5 }
  0x3a   : > { %394 = vmatpush.bf16.msra.mxu2 %v537_v56  ;;  %407 = vmatpush.bf16.msra.mxu3 %v541_v60  ;;  %v582_v12 = vld [vmem:[%s758_s4 + $0xc] sm:$0xf]  ;;  %v506_v13 = vld [vmem:[%s758_s4 + $0x18] sm:$0xf0]  ;;  %v501_v15 = vor.u32 %v581_v7, %v498_v9  ;;  %v505_v16 = vor.u32 %v584_v11, %v504_v10  ;;  %v232_v18 = vld [vmem:[%s818_s0] sm:$0xf] }
  0x3b   : > { %v509_v17 = vor.u32 %v582_v12, %v506_v13  ;;  %vm359_vm0 = vcmask 654336   ;;  %s826_s7 = smov (!%p226_p8, %s492_s7), 7 }
  0x3c   : > { %s493_s8 = sshll.u32 %s826_s7, 3 }
  0x3d   : > { %369 = vmatpush.bf16.msra.mxu0 %v513_v2  ;;  %382 = vmatpush.bf16.msra.mxu1 %v517_v3  ;;  %s229_s11 = scalar_lea.vmem %s821_s3, %s493_s8 }
  0x3e   : > { %395 = vmatpush.bf16.msra.mxu2 %v521_v4  ;;  %408 = vmatpush.bf16.msra.mxu3 %v525_v8 }
  0x41   : > { %370 = vmatpush.bf16.msra.mxu0 %v497_v14  ;;  %383 = vmatpush.bf16.msra.mxu1 %v501_v15 }
  0x42   : > { %396 = vmatpush.bf16.msra.mxu2 %v505_v16  ;;  %409 = vmatpush.bf16.msra.mxu3 %v509_v17 }
  0x44   : > { %574 = vmatmul.msk.bf16.vlgmr.msra.gmra.mxu0 %vm359_vm0, %v232_v18  ;;  %575 = vmatmul.msk.bf16.vlgmr.msra.gmra.mxu1 %vm359_vm0, %v232_v18 }
  0x45   : > { %576 = vmatmul.msk.bf16.vlgmr.msra.gmra.mxu2 %vm359_vm0, %v232_v18  ;;  %577 = vmatmul.msk.bf16.vlgmr.msra.gmra.mxu3 %vm359_vm0, %v232_v18 }
  0xa1   : > { %v257_v19 = vpop.permute.xlu0 %256 }
  0xc1   : > { %v372_v20 = vpop.f32.mrf.mxu0  ;;  %v385_v21 = vpop.f32.mrf.mxu1 }
  0xc2   : > { %v373_v22 = vadd.f32 %v372_v20, %v257_v19  ;;  %v386_v23 = vadd.f32 %v385_v21, %v257_v19 }
  0xc4   : > { %v415_v24 = vmax.f32 %v373_v22, 0.0  ;;  %v416_v25 = vmax.f32 %v386_v23, 0.0 }
  0xc6   : > { %419 = vst [vmem:[%s229_s11] sm:$0xff] %v415_v24 }
  0xc7   : > { %420 = vst [vmem:[%s229_s11 + $0x8] sm:$0xff] %v416_v25 }
  0xc8   : > { %v398_v26 = vpop.f32.mrf.mxu2  ;;  %v411_v28 = vpop.f32.mrf.mxu3 }
  0xc9   : > { %v399_v27 = vadd.f32 %v398_v26, %v257_v19  ;;  %v374_v29 = vpop.f32.mrf.mxu0  ;;  %v412_v30 = vadd.f32 %v411_v28, %v257_v19  ;;  %v387_v31 = vpop.f32.mrf.mxu1 }
  0xcb   : > { %v417_v32 = vmax.f32 %v399_v27, 0.0  ;;  %v418_v33 = vmax.f32 %v412_v30, 0.0 }
  0xcd   : > { %421 = vst [vmem:[%s229_s11 + $0x10] sm:$0xff] %v417_v32 }
  0xce   : > { %422 = vst [vmem:[%s229_s11 + $0x18] sm:$0xff] %v418_v33 }
  0xd0   : > { %v400_v34 = vpop.f32.mrf.mxu2  ;;  %v413_v35 = vpop.f32.mrf.mxu3 }
  0xd1 PF: > { %p10_p9 = scmp.ge.s32.totalorder %s691_s16, 4   ;;  %s822_s12 = smov %s647_s13 }
  0xd2   : > { %s823_s13 = smov %s700_s19  ;;  %s824_s14 = smov %s691_s16 }
  0xd3   :  { %12 = sbr.rel (!%p10_p9) target bundleno = 2 (0x2), region = 90 }

// kernel: net_forward.58
= control target key start
LH: loop header
LB: loop body
LE: loop exit
PB: predicated region body
PF: predicated region fallthrough
CT: control target
= control target key end

     0   :  { %v197_v3 = vmov 0   ;;  %vm94_vm0 = vcmask 654336   ;;  %s299_s1 = inlined_call_operand.vmem [shape: bf16[80,256], index: 1, kind: input, shape index: {}]   ;;  %s300_s2 = inlined_call_operand.vmem [shape: f32[16,1], index: 2, kind: input, shape index: {}]   ;;  %s301_s0 = inlined_call_operand.vmem [shape: bf16[16,80], index: 0, kind: input, shape index: {}]   ;;  %s302_s3 = inlined_call_operand.vmem [shape: f32[16,256], index: 3, kind: output, shape index: {}]  }
   0x1   :  { %v176_v0 = vld [vmem:[%s299_s1 + $0x40] sm:$0xf]  ;;  %v194_v1 = vld [vmem:[%s299_s1 + $0x44] sm:$0xf0]  ;;  %v193_v2 = vld [vmem:[%s299_s1 + $0x44] sm:$0xf]  ;;  %196 = vset.pattern.permute.xlu0 %v197_v3 }
   0x2   :  { %v177_v4 = vor.u32 %v194_v1, %v176_v0  ;;  %v178_v5 = vld [vmem:[%s299_s1 + $0x48] sm:$0xf0]  ;;  %v168_v6 = vld [vmem:[%s299_s1 + $0x30] sm:$0xf]  ;;  %v192_v7 = vld [vmem:[%s299_s1 + $0x34] sm:$0xf0] }
   0x3   :  { %v181_v8 = vor.u32 %v193_v2, %v178_v5  ;;  %v191_v9 = vld [vmem:[%s299_s1 + $0x34] sm:$0xf]  ;;  %v170_v10 = vld [vmem:[%s299_s1 + $0x38] sm:$0xf0]  ;;  %v169_v11 = vor.u32 %v192_v7, %v168_v6  ;;  %v160_v13 = vld [vmem:[%s299_s1 + $0x20] sm:$0xf] }
   0x4   :  { %101 = vmatpush.bf16.msra.mxu0 %v177_v4  ;;  %v173_v12 = vor.u32 %v191_v9, %v170_v10  ;;  %v190_v14 = vld [vmem:[%s299_s1 + $0x24] sm:$0xf0]  ;;  %v189_v15 = vld [vmem:[%s299_s1 + $0x24] sm:$0xf]  ;;  %v162_v16 = vld [vmem:[%s299_s1 + $0x28] sm:$0xf0] }
   0x5   :  { %115 = vmatpush.bf16.msra.mxu1 %v181_v8  ;;  %v161_v17 = vor.u32 %v190_v14, %v160_v13  ;;  %v27_v18 = vld [vmem:[%s300_s2] sm:$0xff]  ;;  %v165_v19 = vor.u32 %v189_v15, %v162_v16  ;;  %v152_v20 = vld [vmem:[%s299_s1 + $0x10] sm:$0xf]  ;;  %v188_v21 = vld [vmem:[%s299_s1 + $0x14] sm:$0xf0] }
   0x6   :  { %31 = vperm.xlu0 %196, %v27_v18   ;;  %v187_v22 = vld [vmem:[%s299_s1 + $0x14] sm:$0xf]  ;;  %v154_v23 = vld [vmem:[%s299_s1 + $0x18] sm:$0xf0]  ;;  %v153_v24 = vor.u32 %v188_v21, %v152_v20  ;;  %v144_v26 = vld [vmem:[%s299_s1] sm:$0xf] }
   0x7   :  { %v157_v25 = vor.u32 %v187_v22, %v154_v23  ;;  %v186_v27 = vld [vmem:[%s299_s1 + $0x4] sm:$0xf0]  ;;  %v185_v28 = vld [vmem:[%s299_s1 + $0x4] sm:$0xf]  ;;  %v146_v29 = vld [vmem:[%s299_s1 + $0x8] sm:$0xf0] }
   0x8   :  { %102 = vmatpush.bf16.msra.mxu0 %v169_v11  ;;  %v28_v30 = vld [vmem:[%s300_s2 + $0x8] sm:$0xff]  ;;  %v145_v31 = vor.u32 %v186_v27, %v144_v26  ;;  %v149_v32 = vor.u32 %v185_v28, %v146_v29  ;;  %v184_v33 = vld [vmem:[%s301_s0] sm:$0xff] }
   0x9   :  { %116 = vmatpush.bf16.msra.mxu1 %v173_v12 }
   0xc   :  { %103 = vmatpush.bf16.msra.mxu0 %v161_v17 }
   0xd   :  { %117 = vmatpush.bf16.msra.mxu1 %v165_v19 }
   0xe   :  { %36 = vperm.xlu0 %196, %v28_v30  }
  0x10   :  { %104 = vmatpush.bf16.msra.mxu0 %v153_v24 }
  0x11   :  { %118 = vmatpush.bf16.msra.mxu1 %v157_v25 }
  0x14   :  { %105 = vmatpush.bf16.msra.mxu0 %v145_v31 }
  0x15   :  { %119 = vmatpush.bf16.msra.mxu1 %v149_v32 }
  0x17   :  { %182 = vmatmul.msk.bf16.vlgmr.msra.gmra.mxu0 %vm94_vm0, %v184_v33 }
  0x18   :  { %183 = vmatmul.msk.bf16.vlgmr.msra.gmra.mxu1 %vm94_vm0, %v184_v33 }
  0x78   :  { %v32_v34 = vpop.permute.xlu0 %31 }
  0x80   :  { %v37_v41 = vpop.permute.xlu0 %36 }
  0x94   :  { %v107_v35 = vpop.f32.mrf.mxu0 }
  0x95   :  { %v108_v36 = vadd.f32 %v107_v35, %v32_v34  ;;  %v121_v37 = vpop.f32.mrf.mxu1 }
  0x96   :  { %v122_v38 = vadd.f32 %v121_v37, %v32_v34 }
  0x97   :  { %v126_v39 = vmax.f32 %v108_v36, 0.0 }
  0x98   :  { %v127_v40 = vmax.f32 %v122_v38, 0.0 }
  0x99   :  { %130 = vst [vmem:[%s302_s3] sm:$0xff] %v126_v39 }
  0x9a   :  { %131 = vst [vmem:[%s302_s3 + $0x8] sm:$0xff] %v127_v40 }
  0x9c   :  { %v109_v42 = vpop.f32.mrf.mxu0 }
  0x9d   :  { %v110_v43 = vadd.f32 %v109_v42, %v37_v41  ;;  %v123_v44 = vpop.f32.mrf.mxu1 }
  0x9e   :  { %v124_v45 = vadd.f32 %v123_v44, %v37_v41 }
  0x9f   :  { %v128_v46 = vmax.f32 %v110_v43, 0.0 }
  0xa0   :  { %v129_v47 = vmax.f32 %v124_v45, 0.0 }
  0xa1   :  { %132 = vst [vmem:[%s302_s3 + $0x10] sm:$0xff] %v128_v46 }
  0xa2   :  { %133 = vst [vmem:[%s302_s3 + $0x18] sm:$0xff] %v129_v47 }

// kernel: net_forward.59
= control target key start
LH: loop header
LB: loop body
LE: loop exit
PB: predicated region body
PF: predicated region fallthrough
CT: control target
= control target key end

     0   :  { %v269_v6 = vmov 0   ;;  %vm133_vm0 = vcmask 130048   ;;  %vm182_vm1 = vcmask 523264   ;;  %s371_s1 = inlined_call_operand.vmem [shape: bf16[144,64], index: 1, kind: input, shape index: {}]   ;;  %s372_s0 = inlined_call_operand.vmem [shape: bf16[32,144], index: 0, kind: input, shape index: {}]   ;;  %s373_s2 = inlined_call_operand.vmem [shape: f32[32,1], index: 2, kind: input, shape index: {}]   ;;  %s374_s3 = inlined_call_operand.vmem [shape: f32[32,64], index: 3, kind: output, shape index: {}]  }
   0x1   :  { %v256_v0 = vld [vmem:[%s371_s1 + $0x38] sm:$0xff]  ;;  %v257_v1 = vld [vmem:[%s371_s1 + $0x40] sm:$0xff]  ;;  %v255_v3 = vld [vmem:[%s371_s1 + $0x30] sm:$0xff]  ;;  %268 = vset.pattern.permute.xlu1 %v269_v6  ;;  %267 = vset.pattern.permute.xlu0 %v269_v6 }
   0x2   :  { %v245_v2 = vld [vmem:[%s372_s0 + $0x4] sm:$0xf]  ;;  %140 = vmatpush.bf16.msra.mxu0 %v256_v0  ;;  %258 = vmatpush.bf16.msra.mxu2 %v256_v0  ;;  %v195_v4 = vld [vmem:[%s372_s0 + $0x8] sm:$0xf0]  ;;  %v39_v7 = vld [vmem:[%s373_s2 + $0x10] sm:$0xff] }
   0x3   :  { %166 = vmatpush.bf16.msra.mxu1 %v257_v1  ;;  %v198_v5 = vor.u32 %v245_v2, %v195_v4  ;;  %v254_v8 = vld [vmem:[%s371_s1 + $0x28] sm:$0xff]  ;;  %v37_v9 = vld [vmem:[%s373_s2] sm:$0xff]  ;;  %53 = vperm.xlu1 %268, %v39_v7   ;;  %v40_v11 = vld [vmem:[%s373_s2 + $0x18] sm:$0xff] }
   0x4   :  { %43 = vperm.xlu0 %267, %v37_v9   ;;  %v253_v10 = vld [vmem:[%s371_s1 + $0x20] sm:$0xff]  ;;  %v38_v12 = vld [vmem:[%s373_s2 + $0x8] sm:$0xff]  ;;  %v252_v13 = vld [vmem:[%s371_s1 + $0x18] sm:$0xff] }
   0x5   :  { %v247_v14 = vld [vmem:[%s372_s0 + $0x14] sm:$0xf]  ;;  %v203_v15 = vld [vmem:[%s372_s0 + $0x18] sm:$0xf0]  ;;  %v250_v18 = vld [vmem:[%s371_s1 + $0x8] sm:$0xff] }
   0x6   :  { %141 = vmatpush.bf16.msra.mxu0 %v255_v3  ;;  %259 = vmatpush.bf16.msra.mxu2 %v255_v3  ;;  %v251_v16 = vld [vmem:[%s371_s1 + $0x10] sm:$0xff]  ;;  %v206_v17 = vor.u32 %v247_v14, %v203_v15  ;;  %v249_v19 = vld [vmem:[%s371_s1] sm:$0xff]  ;;  %v246_v21 = vld [vmem:[%s372_s0 + $0x4] sm:$0xf0] }
   0x7   :  { %243 = vmatmul.msk.bf16.vlgmr.msra.gmra.mxu1 %vm133_vm0, %v198_v5  ;;  %v193_v20 = vld [vmem:[%s372_s0] sm:$0xf]  ;;  %v201_v22 = vld [vmem:[%s372_s0 + $0x10] sm:$0xf]  ;;  %v248_v23 = vld [vmem:[%s372_s0 + $0x14] sm:$0xf0] }
   0x8   :  { %v194_v24 = vor.u32 %v246_v21, %v193_v20  ;;  %v202_v25 = vor.u32 %v248_v23, %v201_v22 }
   0xa   :  { %142 = vmatpush.bf16.msra.mxu0 %v254_v8  ;;  %260 = vmatpush.bf16.msra.mxu2 %v254_v8 }
   0xb   :  { %58 = vperm.xlu1 %268, %v40_v11  }
   0xc   :  { %48 = vperm.xlu0 %267, %v38_v12  }
   0xe   :  { %143 = vmatpush.bf16.msra.mxu0 %v253_v10  ;;  %261 = vmatpush.bf16.msra.mxu2 %v253_v10 }
  0x12   :  { %144 = vmatpush.bf16.msra.mxu0 %v252_v13  ;;  %262 = vmatpush.bf16.msra.mxu2 %v252_v13 }
  0x16   :  { %145 = vmatpush.bf16.msra.mxu0 %v251_v16  ;;  %263 = vmatpush.bf16.msra.mxu2 %v251_v16 }
  0x17   :  { %244 = vmatmul.msk.bf16.gmra.mxu1 %vm133_vm0, %v206_v17 }
  0x1a   :  { %146 = vmatpush.bf16.msra.mxu0 %v250_v18  ;;  %264 = vmatpush.bf16.msra.mxu2 %v250_v18 }
  0x1e   :  { %147 = vmatpush.bf16.msra.mxu0 %v249_v19  ;;  %265 = vmatpush.bf16.msra.mxu2 %v249_v19 }
  0x21   :  { %148 = vmatmul.bf16.vlgmr.msra.gmra.mxu0 %v194_v24  ;;  %153 = vmatmul.bf16.vlgmr.msra.gmra.mxu2 %v202_v25 }
  0x75   :  { %v54_v32 = vpop.permute.xlu1 %53 }
  0x76   :  { %v44_v28 = vpop.permute.xlu0 %43 }
  0x7d   :  { %v59_v44 = vpop.permute.xlu1 %58 }
  0x7e   :  { %v49_v37 = vpop.permute.xlu0 %48 }
  0x84   :  { %v168_v26 = vpop.f32.mrf.mxu1 }
  0x8c   :  { %v170_v27 = vpop.f32.mrf.mxu1 }
  0x94   :  { %v173_v34 = vpop.f32.mrf.mxu1 }
  0x9c   :  { %v175_v47 = vpop.f32.mrf.mxu1 }
  0x9e   :  { %v149_v29 = vpop.f32.mrf.mxu0 }
  0x9f   :  { %v150_v30 = vadd.f32 %v149_v29, %v44_v28 }
  0xa1   :  { %v169_v31 = vadd.f32 %v168_v26, %v150_v30 }
  0xa3   :  { %v178_v33 = vmax.f32 %v169_v31, 0.0 }
  0xa4   :  { %v154_v35 = vpop.f32.mrf.mxu2 }
  0xa5   :  { %183 = vst.msk [vmem:[%s374_s3] sm:$0xff] %vm182_vm1, %v178_v33  ;;  %v155_v36 = vadd.f32 %v154_v35, %v54_v32 }
  0xa6   :  { %v151_v38 = vpop.f32.mrf.mxu0 }
  0xa7   :  { %v174_v39 = vadd.f32 %v173_v34, %v155_v36  ;;  %v152_v40 = vadd.f32 %v151_v38, %v49_v37 }
  0xa9   :  { %v180_v41 = vmax.f32 %v174_v39, 0.0  ;;  %v171_v42 = vadd.f32 %v170_v27, %v152_v40 }
  0xab   :  { %185 = vst.msk [vmem:[%s374_s3 + $0x10] sm:$0xff] %vm182_vm1, %v180_v41  ;;  %v179_v43 = vmax.f32 %v171_v42, 0.0 }
  0xac   :  { %v156_v45 = vpop.f32.mrf.mxu2 }
  0xad   :  { %184 = vst.msk [vmem:[%s374_s3 + $0x8] sm:$0xff] %vm182_vm1, %v179_v43  ;;  %v157_v46 = vadd.f32 %v156_v45, %v59_v44 }
  0xaf   :  { %v176_v48 = vadd.f32 %v175_v47, %v157_v46 }
  0xb1   :  { %v181_v49 = vmax.f32 %v176_v48, 0.0 }
  0xb3   :  { %186 = vst.msk [vmem:[%s374_s3 + $0x18] sm:$0xff] %vm182_vm1, %v181_v49 }

// kernel: net_forward.60
= control target key start
LH: loop header
LB: loop body
LE: loop exit
PB: predicated region body
PF: predicated region fallthrough
CT: control target
= control target key end

     0   :  { %vm262_vm0 = vcmask 261120   ;;  %s836_s1 = inlined_call_operand.vmem [shape: bf16[288,256], index: 1, kind: input, shape index: {}]   ;;  %s837_s0 = inlined_call_operand.vmem [shape: bf16[16,288], index: 0, kind: input, shape index: {}]   ;;  %s838_s2 = inlined_call_operand.vmem [shape: f32[16,1], index: 2, kind: input, shape index: {}]   ;;  %s839_s3 = inlined_call_operand.vmem [shape: f32[16,256], index: 3, kind: output, shape index: {}]  }
   0x1   :  { %v428_v0 = vld [vmem:[%s836_s1 + $0x70] sm:$0xf]  ;;  %v534_v1 = vld [vmem:[%s836_s1 + $0x74] sm:$0xf0]  ;;  %v533_v5 = vld [vmem:[%s836_s1 + $0x74] sm:$0xf] }
   0x2   :  { %v508_v2 = vld [vmem:[%s836_s1 + $0x110] sm:$0xf]  ;;  %v429_v3 = vor.u32 %v534_v1, %v428_v0  ;;  %v554_v4 = vld [vmem:[%s836_s1 + $0x114] sm:$0xf0]  ;;  %v430_v6 = vld [vmem:[%s836_s1 + $0x78] sm:$0xf0] }
   0x3   :  { %v509_v7 = vor.u32 %v554_v4, %v508_v2  ;;  %v433_v8 = vor.u32 %v533_v5, %v430_v6  ;;  %v492_v9 = vld [vmem:[%s836_s1 + $0xf0] sm:$0xf]  ;;  %v550_v10 = vld [vmem:[%s836_s1 + $0xf4] sm:$0xf0]  ;;  %v420_v11 = vld [vmem:[%s836_s1 + $0x60] sm:$0xf] }
   0x4   :  { %266 = vmatpush.bf16.msra.mxu0 %v429_v3  ;;  %v493_v12 = vor.u32 %v550_v10, %v492_v9  ;;  %v532_v13 = vld [vmem:[%s836_s1 + $0x64] sm:$0xf0]  ;;  %v500_v14 = vld [vmem:[%s836_s1 + $0x100] sm:$0xf]  ;;  %v531_v18 = vld [vmem:[%s836_s1 + $0x64] sm:$0xf] }
   0x5   :  { %v552_v15 = vld [vmem:[%s836_s1 + $0x104] sm:$0xf0]  ;;  %300 = vmatpush.bf16.msra.mxu2 %v509_v7  ;;  %308 = vmatpush.bf16.msra.mxu3 %v433_v8  ;;  %v421_v16 = vor.u32 %v532_v13, %v420_v11  ;;  %v422_v19 = vld [vmem:[%s836_s1 + $0x68] sm:$0xf0]  ;;  %v549_v20 = vld [vmem:[%s836_s1 + $0xf4] sm:$0xf] }
   0x6   :  { %v501_v17 = vor.u32 %v552_v15, %v500_v14  ;;  %280 = vmatpush.bf16.msra.mxu1 %v493_v12  ;;  %v425_v21 = vor.u32 %v531_v18, %v422_v19  ;;  %v494_v22 = vld [vmem:[%s836_s1 + $0xf8] sm:$0xf0]  ;;  %v484_v23 = vld [vmem:[%s836_s1 + $0xe0] sm:$0xf]  ;;  %v548_v24 = vld [vmem:[%s836_s1 + $0xe4] sm:$0xf0] }
   0x7   :  { %v497_v25 = vor.u32 %v549_v20, %v494_v22  ;;  %v485_v26 = vor.u32 %v548_v24, %v484_v23  ;;  %v412_v27 = vld [vmem:[%s836_s1 + $0x50] sm:$0xf]  ;;  %v530_v28 = vld [vmem:[%s836_s1 + $0x54] sm:$0xf0]  ;;  %v529_v29 = vld [vmem:[%s836_s1 + $0x54] sm:$0xf] }
   0x8   :  { %267 = vmatpush.bf16.msra.mxu0 %v421_v16  ;;  %v413_v30 = vor.u32 %v530_v28, %v412_v27  ;;  %v414_v31 = vld [vmem:[%s836_s1 + $0x58] sm:$0xf0]  ;;  %v547_v32 = vld [vmem:[%s836_s1 + $0xe4] sm:$0xf]  ;;  %v486_v33 = vld [vmem:[%s836_s1 + $0xe8] sm:$0xf0] }
   0x9   :  { %301 = vmatpush.bf16.msra.mxu2 %v501_v17  ;;  %309 = vmatpush.bf16.msra.mxu3 %v425_v21  ;;  %v417_v34 = vor.u32 %v529_v29, %v414_v31  ;;  %v476_v35 = vld [vmem:[%s836_s1 + $0xd0] sm:$0xf]  ;;  %v546_v36 = vld [vmem:[%s836_s1 + $0xd4] sm:$0xf0]  ;;  %v404_v37 = vld [vmem:[%s836_s1 + $0x40] sm:$0xf]  ;;  %v489_v38 = vor.u32 %v547_v32, %v486_v33 }
   0xa   :  { %281 = vmatpush.bf16.msra.mxu1 %v485_v26  ;;  %v477_v39 = vor.u32 %v546_v36, %v476_v35  ;;  %v528_v40 = vld [vmem:[%s836_s1 + $0x44] sm:$0xf0]  ;;  %v527_v41 = vld [vmem:[%s836_s1 + $0x44] sm:$0xf]  ;;  %v406_v42 = vld [vmem:[%s836_s1 + $0x48] sm:$0xf0] }
   0xb   :  { %v545_v43 = vld [vmem:[%s836_s1 + $0xd4] sm:$0xf]  ;;  %v478_v44 = vld [vmem:[%s836_s1 + $0xd8] sm:$0xf0]  ;;  %v468_v45 = vld [vmem:[%s836_s1 + $0xc0] sm:$0xf]  ;;  %v405_v46 = vor.u32 %v528_v40, %v404_v37  ;;  %v409_v50 = vor.u32 %v527_v41, %v406_v42 }
   0xc   :  { %268 = vmatpush.bf16.msra.mxu0 %v413_v30  ;;  %v544_v47 = vld [vmem:[%s836_s1 + $0xc4] sm:$0xf0]  ;;  %v518_v49 = vld [vmem:[%s837_s0 + $0x10] sm:$0xf0]  ;;  %v396_v52 = vld [vmem:[%s836_s1 + $0x30] sm:$0xf]  ;;  %v481_v54 = vor.u32 %v545_v43, %v478_v44 }
   0xd   :  { %322 = vmatpush.bf16.msrb.mxu2 %v497_v25  ;;  %v368_v48 = vld [vmem:[%s837_s0 + $0x8] sm:$0xf]  ;;  %310 = vmatpush.bf16.msra.mxu3 %v417_v34  ;;  %v526_v53 = vld [vmem:[%s836_s1 + $0x34] sm:$0xf0]  ;;  %v469_v55 = vor.u32 %v544_v47, %v468_v45  ;;  %v525_v56 = vld [vmem:[%s836_s1 + $0x34] sm:$0xf] }
   0xe   :  { %v686_v51 = vor.u32 %v518_v49, %v368_v48  ;;  %282 = vmatpush.bf16.msra.mxu1 %v477_v39  ;;  %v398_v57 = vld [vmem:[%s836_s1 + $0x38] sm:$0xf0]  ;;  %v543_v58 = vld [vmem:[%s836_s1 + $0xc4] sm:$0xf]  ;;  %v470_v59 = vld [vmem:[%s836_s1 + $0xc8] sm:$0xf0]  ;;  %v397_v62 = vor.u32 %v526_v53, %v396_v52 }
   0xf   :  { %v460_v60 = vld [vmem:[%s836_s1 + $0xb0] sm:$0xf]  ;;  %v542_v61 = vld [vmem:[%s836_s1 + $0xb4] sm:$0xf0]  ;;  %v401_v63 = vor.u32 %v525_v56, %v398_v57  ;;  %v388_v0 = vld [vmem:[%s836_s1 + $0x20] sm:$0xf]  ;;  %v473_v2 = vor.u32 %v543_v58, %v470_v59 }
  0x10   :  { %514 = vmatmul.msk.bf16.vlgmr.msra.gmra.mxu2 %vm262_vm0, %v686_v51  ;;  %269 = vmatpush.bf16.msra.mxu0 %v405_v46  ;;  %v524_v1 = vld [vmem:[%s836_s1 + $0x24] sm:$0xf0]  ;;  %v461_v3 = vor.u32 %v542_v61, %v460_v60  ;;  %v523_v4 = vld [vmem:[%s836_s1 + $0x24] sm:$0xf]  ;;  %v390_v5 = vld [vmem:[%s836_s1 + $0x28] sm:$0xf0] }
  0x11   :  { %323 = vmatpush.bf16.msrb.mxu2 %v489_v38  ;;  %311 = vmatpush.bf16.msra.mxu3 %v409_v50  ;;  %v541_v6 = vld [vmem:[%s836_s1 + $0xb4] sm:$0xf]  ;;  %v462_v7 = vld [vmem:[%s836_s1 + $0xb8] sm:$0xf0]  ;;  %v452_v8 = vld [vmem:[%s836_s1 + $0xa0] sm:$0xf]  ;;  %v389_v10 = vor.u32 %v524_v1, %v388_v0  ;;  %v393_v11 = vor.u32 %v523_v4, %v390_v5 }
  0x12   :  { %283 = vmatpush.bf16.msra.mxu1 %v469_v55  ;;  %v540_v9 = vld [vmem:[%s836_s1 + $0xa4] sm:$0xf0]  ;;  %v380_v12 = vld [vmem:[%s836_s1 + $0x10] sm:$0xf]  ;;  %v522_v13 = vld [vmem:[%s836_s1 + $0x14] sm:$0xf0]  ;;  %v465_v14 = vor.u32 %v541_v6, %v462_v7 }
  0x13   :  { %v453_v15 = vor.u32 %v540_v9, %v452_v8  ;;  %v521_v16 = vld [vmem:[%s836_s1 + $0x14] sm:$0xf]  ;;  %v382_v17 = vld [vmem:[%s836_s1 + $0x18] sm:$0xf0]  ;;  %v539_v18 = vld [vmem:[%s836_s1 + $0xa4] sm:$0xf]  ;;  %v381_v22 = vor.u32 %v522_v13, %v380_v12 }
  0x14   :  { %270 = vmatpush.bf16.msra.mxu0 %v397_v62  ;;  %v454_v19 = vld [vmem:[%s836_s1 + $0xa8] sm:$0xf0]  ;;  %v444_v20 = vld [vmem:[%s836_s1 + $0x90] sm:$0xf]  ;;  %v538_v21 = vld [vmem:[%s836_s1 + $0x94] sm:$0xf0]  ;;  %v385_v25 = vor.u32 %v521_v16, %v382_v17 }
  0x15   :  { %324 = vmatpush.bf16.msrb.mxu2 %v481_v54  ;;  %312 = vmatpush.bf16.msra.mxu3 %v401_v63  ;;  %v372_v23 = vld [vmem:[%s836_s1] sm:$0xf]  ;;  %v520_v24 = vld [vmem:[%s836_s1 + $0x4] sm:$0xf0]  ;;  %v519_v26 = vld [vmem:[%s836_s1 + $0x4] sm:$0xf]  ;;  %v457_v29 = vor.u32 %v539_v18, %v454_v19  ;;  %v445_v30 = vor.u32 %v538_v21, %v444_v20 }
  0x16   :  { %284 = vmatpush.bf16.msra.mxu1 %v461_v3  ;;  %v374_v27 = vld [vmem:[%s836_s1 + $0x8] sm:$0xf0]  ;;  %v537_v28 = vld [vmem:[%s836_s1 + $0x94] sm:$0xf]  ;;  %v446_v31 = vld [vmem:[%s836_s1 + $0x98] sm:$0xf0]  ;;  %v373_v37 = vor.u32 %v520_v24, %v372_v23 }
  0x17   :  { %v553_v32 = vld [vmem:[%s836_s1 + $0x114] sm:$0xf]  ;;  %v510_v33 = vld [vmem:[%s836_s1 + $0x118] sm:$0xf0]  ;;  %v436_v34 = vld [vmem:[%s836_s1 + $0x80] sm:$0xf]  ;;  %v377_v41 = vor.u32 %v519_v26, %v374_v27  ;;  %v449_v44 = vor.u32 %v537_v28, %v446_v31 }
  0x18   :  { %271 = vmatpush.bf16.msra.mxu0 %v389_v10  ;;  %v536_v35 = vld [vmem:[%s836_s1 + $0x84] sm:$0xf0]  ;;  %v55_v36 = vld [vmem:[%s838_s2] sm:$0xff]  ;;  %v517_v39 = vld [vmem:[%s837_s0 + $0x8] sm:$0xf0]  ;;  %v557_v40 = vmov 0   ;;  %v513_v42 = vor.u32 %v553_v32, %v510_v33 }
  0x19   :  { %325 = vmatpush.bf16.msrb.mxu2 %v473_v2  ;;  %313 = vmatpush.bf16.msra.mxu3 %v393_v11  ;;  %v360_v38 = vld [vmem:[%s837_s0] sm:$0xf]  ;;  %v516_v43 = vld [vmem:[%s837_s0 + $0x4] sm:$0xf]  ;;  %v437_v45 = vor.u32 %v536_v35, %v436_v34  ;;  %v362_v46 = vld [vmem:[%s837_s0 + $0xc] sm:$0xf0] }
  0x1a   :  { %285 = vmatpush.bf16.msra.mxu1 %v453_v15  ;;  %556 = vset.pattern.permute.xlu0 %v557_v40  ;;  %v551_v47 = vld [vmem:[%s836_s1 + $0x104] sm:$0xf]  ;;  %v502_v48 = vld [vmem:[%s836_s1 + $0x108] sm:$0xf0]  ;;  %v361_v49 = vor.u32 %v517_v39, %v360_v38  ;;  %v365_v53 = vor.u32 %v516_v43, %v362_v46 }
  0x1b   :  { %59 = vperm.xlu0 %556, %v55_v36   ;;  %v535_v50 = vld [vmem:[%s836_s1 + $0x84] sm:$0xf]  ;;  %v438_v52 = vld [vmem:[%s836_s1 + $0x88] sm:$0xf0]  ;;  %v505_v54 = vor.u32 %v551_v47, %v502_v48 }
  0x1c   :  { %272 = vmatpush.bf16.msra.mxu0 %v381_v22  ;;  %v441_v55 = vor.u32 %v535_v50, %v438_v52  ;;  %v56_v56 = vld [vmem:[%s838_s2 + $0x8] sm:$0xff] }
  0x1d   :  { %326 = vmatpush.bf16.msrb.mxu2 %v465_v14  ;;  %314 = vmatpush.bf16.msra.mxu3 %v385_v25 }
  0x1e   :  { %286 = vmatpush.bf16.msra.mxu1 %v445_v30 }
  0x20   :  { %273 = vmatpush.bf16.msra.mxu0 %v373_v37 }
  0x21   :  { %327 = vmatpush.bf16.msrb.mxu2 %v457_v29  ;;  %315 = vmatpush.bf16.msra.mxu3 %v377_v41 }
  0x22   :  { %287 = vmatpush.bf16.msra.mxu1 %v437_v45 }
  0x23   :  { %274 = vmatmul.bf16.vlgmr.msra.gmra.mxu0 %v361_v49  ;;  %64 = vperm.xlu0 %556, %v56_v56  }
  0x24   :  { %342 = vmatpush.bf16.msrb.mxu0 %v513_v42  ;;  %316 = vmatmul.bf16.vlgmr.msra.gmra.mxu3 %v361_v49 }
  0x25   :  { %328 = vmatpush.bf16.msrb.mxu2 %v449_v44  ;;  %288 = vmatmul.bf16.vlgmr.msra.gmra.mxu1 %v365_v53 }
  0x28   :  { %343 = vmatpush.bf16.msrb.mxu0 %v505_v54 }
  0x29   :  { %329 = vmatpush.bf16.msrb.mxu2 %v441_v55 }
  0x2c   :  { %330 = vmatmul.bf16.vlgmr.msrb.gmra.mxu2 %v365_v53 }
  0x33   :  { %515 = vmatmul.msk.bf16.vlgmr.msrb.gmra.mxu0 %vm262_vm0, %v686_v51 }
  0x8d   :  { %v60_v58 = vpop.permute.xlu0 %59 }
  0x93   :  { %v303_v57 = vpop.f32.mrf.mxu2 }
  0x95   :  { %v65_v1 = vpop.permute.xlu0 %64 }
  0x9b   :  { %v305_v63 = vpop.f32.mrf.mxu2 }
  0xa0   :  { %v275_v59 = vpop.f32.mrf.mxu0 }
  0xa1   :  { %v276_v60 = vadd.f32 %v275_v59, %v60_v58 }
  0xa2   :  { %v289_v61 = vpop.f32.mrf.mxu1 }
  0xa3   :  { %v290_v62 = vadd.f32 %v289_v61, %v276_v60 }
  0xa5   :  { %v304_v0 = vadd.f32 %v303_v57, %v290_v62 }
  0xa7   :  { %350 = vst [vmem:[%s839_s3] sm:$0xff] %v304_v0  ;;  %v317_v2 = vpop.f32.mrf.mxu3 }
  0xa8   :  { %v277_v3 = vpop.f32.mrf.mxu0  ;;  %v318_v4 = vadd.f32 %v317_v2, %v60_v58 }
  0xa9   :  { %v278_v5 = vadd.f32 %v277_v3, %v65_v1 }
  0xaa   :  { %v291_v6 = vpop.f32.mrf.mxu1 }
  0xab   :  { %v292_v7 = vadd.f32 %v291_v6, %v278_v5 }
  0xad   :  { %v306_v8 = vadd.f32 %v305_v63, %v292_v7 }
  0xaf   :  { %v331_v51 = vpop.f32.mrf.mxu2  ;;  %352 = vst [vmem:[%s839_s3 + $0x10] sm:$0xff] %v306_v8  ;;  %v319_v12 = vpop.f32.mrf.mxu3 }
  0xb0   :  { %v332_v9 = vadd.f32 %v331_v51, %v318_v4  ;;  %v345_v10 = vpop.f32.mrf.mxu0  ;;  %v320_v14 = vadd.f32 %v319_v12, %v65_v1 }
  0xb2   :  { %v346_v11 = vadd.f32 %v345_v10, %v332_v9 }
  0xb4   :  { %351 = vst [vmem:[%s839_s3 + $0x8] sm:$0xff] %v346_v11 }
  0xb7   :  { %v333_v13 = vpop.f32.mrf.mxu2 }
  0xb8   :  { %v334_v15 = vadd.f32 %v333_v13, %v320_v14  ;;  %v347_v16 = vpop.f32.mrf.mxu0 }
  0xba   :  { %v348_v17 = vadd.f32 %v347_v16, %v334_v15 }
  0xbc   :  { %353 = vst [vmem:[%s839_s3 + $0x18] sm:$0xff] %v348_v17 }

// kernel: net_forward.61
= control target key start
LH: loop header
LB: loop body
LE: loop exit
PB: predicated region body
PF: predicated region fallthrough
CT: control target
= control target key end

     0   :  { %s936_s12 = smov 0   ;;  %s938_s13 = smov 0   ;;  %s1158_s0 = inlined_call_operand.vmem [shape: bf16[8,144], index: 0, kind: input, shape index: {}]   ;;  %s1159_s1 = inlined_call_operand.vmem [shape: bf16[144,1024], index: 1, kind: input, shape index: {}]   ;;  %s1160_s2 = inlined_call_operand.vmem [shape: f32[8,1], index: 2, kind: input, shape index: {}]   ;;  %s1161_s3 = inlined_call_operand.vmem [shape: f32[8,1024], index: 3, kind: output, shape index: {}]  }
   0x1   :  { %s940_s14 = smov 0  }
   0x2 LB: > { %s667_s15 = sadd.s32 4294967295, %s913_s14   ;;  %s953_s16 = sadd.s32 1, %s913_s14   ;;  %s913_s14 = sphi %s940_s14, %s1164_s14   ;;  %s909_s13 = sphi %s938_s13, %s1163_s13   ;;  %s905_s12 = sphi %s936_s12, %s1162_s12  }
   0x3   : > { %s38_s17 = ssub.s32 %s913_s14, %s953_s16  ;;  %s41_s18 = sadd.s32 1, %s909_s13 }
   0x4   : > { %p39_p0 = scmp.eq.s32.totalorder %s38_s17, 0  ;;  %p48_p1 = scmp.ne.s32.totalorder %s909_s13, %s905_s12 }
   0x5   : > { %p49_p2 = scmp.eq.s32.totalorder %s913_s14, 0  ;;  %p670_p4 = scmp.ge.s32.totalorder %s913_s14, 2 }
   0x6   : > { %s962_s19 = scalar_select %p39_p0, %s909_s13, %s41_s18  }
   0x7   : > { %p50_p3 = por %p49_p2, %p48_p1  ;;  %127 = sbr.rel (%p670_p4) target bundleno = 52 (0x34), region = 24 }
   0xc   : > { %130 = sbr.rel (!%p50_p3) target bundleno = 52 (0x34), region = 28  ;;  %s132_s20 = sand.u32 (%p50_p3), 1, %s909_s13  }
   0xd   : > { %s826_s21 = sshll.u32 (%p50_p3), %s913_s14, 4  ;;  %s863_s22 = smul.u32 (%p50_p3), 288, %s132_s20 }
   0xe   : > { %s970_s25 = scalar_lea.vmem (%p50_p3), %s1159_s1, %s826_s21 }
   0xf   : > { %v150_v0 = vld [vmem:[%s970_s25] sm:$0xff] (%p50_p3)  ;;  %v152_v1 = vld [vmem:[%s970_s25 + $0x8] sm:$0xff] (%p50_p3)  ;;  %s975_s26 = scalar_lea.vmem (%p50_p3), [#allocation2], %s863_s22 }
  0x10   : > { %v154_v2 = vld [vmem:[%s970_s25 + $0x20] sm:$0xff] (%p50_p3)  ;;  %151 = vst [vmem:[%s975_s26] sm:$0xff] (%p50_p3), %v150_v0  ;;  %v156_v3 = vld [vmem:[%s970_s25 + $0x28] sm:$0xff] (%p50_p3) }
  0x11   : > { %153 = vst [vmem:[%s975_s26 + $0x8] sm:$0xff] %v152_v1  ;;  %v158_v4 = vld [vmem:[%s970_s25 + $0x40] sm:$0xff]  ;;  %v160_v5 = vld [vmem:[%s970_s25 + $0x48] sm:$0xff] }
  0x12   : > { %155 = vst [vmem:[%s975_s26 + $0x10] sm:$0xff] %v154_v2  ;;  %v162_v6 = vld [vmem:[%s970_s25 + $0x60] sm:$0xff]  ;;  %v164_v7 = vld [vmem:[%s970_s25 + $0x68] sm:$0xff] }
  0x13   : > { %157 = vst [vmem:[%s975_s26 + $0x18] sm:$0xff] %v156_v3  ;;  %v166_v8 = vld [vmem:[%s970_s25 + $0x80] sm:$0xff]  ;;  %v168_v9 = vld [vmem:[%s970_s25 + $0x88] sm:$0xff] }
  0x14   : > { %159 = vst [vmem:[%s975_s26 + $0x20] sm:$0xff] %v158_v4  ;;  %v170_v10 = vld [vmem:[%s970_s25 + $0xa0] sm:$0xff]  ;;  %v172_v11 = vld [vmem:[%s970_s25 + $0xa8] sm:$0xff] }
  0x15   : > { %161 = vst [vmem:[%s975_s26 + $0x28] sm:$0xff] %v160_v5  ;;  %v174_v12 = vld [vmem:[%s970_s25 + $0xc0] sm:$0xff]  ;;  %v176_v13 = vld [vmem:[%s970_s25 + $0xc8] sm:$0xff] }
  0x16   : > { %163 = vst [vmem:[%s975_s26 + $0x30] sm:$0xff] %v162_v6  ;;  %v178_v14 = vld [vmem:[%s970_s25 + $0xe0] sm:$0xff]  ;;  %v180_v15 = vld [vmem:[%s970_s25 + $0xe8] sm:$0xff] }
  0x17   : > { %165 = vst [vmem:[%s975_s26 + $0x38] sm:$0xff] %v164_v7  ;;  %v182_v16 = vld [vmem:[%s970_s25 + $0x100] sm:$0xff]  ;;  %v184_v17 = vld [vmem:[%s970_s25 + $0x108] sm:$0xff] }
  0x18   : > { %167 = vst [vmem:[%s975_s26 + $0x40] sm:$0xff] %v166_v8  ;;  %v186_v18 = vld [vmem:[%s970_s25 + $0x120] sm:$0xff]  ;;  %v188_v19 = vld [vmem:[%s970_s25 + $0x128] sm:$0xff] }
  0x19   : > { %169 = vst [vmem:[%s975_s26 + $0x48] sm:$0xff] %v168_v9  ;;  %v190_v20 = vld [vmem:[%s970_s25 + $0x140] sm:$0xff]  ;;  %v192_v21 = vld [vmem:[%s970_s25 + $0x148] sm:$0xff] }
  0x1a   : > { %171 = vst [vmem:[%s975_s26 + $0x50] sm:$0xff] %v170_v10  ;;  %v194_v22 = vld [vmem:[%s970_s25 + $0x160] sm:$0xff]  ;;  %v196_v23 = vld [vmem:[%s970_s25 + $0x168] sm:$0xff] }
  0x1b   : > { %173 = vst [vmem:[%s975_s26 + $0x58] sm:$0xff] %v172_v11  ;;  %v198_v24 = vld [vmem:[%s970_s25 + $0x180] sm:$0xff]  ;;  %v200_v25 = vld [vmem:[%s970_s25 + $0x188] sm:$0xff] }
  0x1c   : > { %175 = vst [vmem:[%s975_s26 + $0x60] sm:$0xff] %v174_v12  ;;  %v202_v26 = vld [vmem:[%s970_s25 + $0x1a0] sm:$0xff]  ;;  %v204_v27 = vld [vmem:[%s970_s25 + $0x1a8] sm:$0xff] }
  0x1d   : > { %177 = vst [vmem:[%s975_s26 + $0x68] sm:$0xff] %v176_v13  ;;  %v206_v28 = vld [vmem:[%s970_s25 + $0x1c0] sm:$0xff]  ;;  %v208_v29 = vld [vmem:[%s970_s25 + $0x1c8] sm:$0xff] }
  0x1e   : > { %179 = vst [vmem:[%s975_s26 + $0x70] sm:$0xff] %v178_v14  ;;  %v210_v30 = vld [vmem:[%s970_s25 + $0x1e0] sm:$0xff]  ;;  %v212_v31 = vld [vmem:[%s970_s25 + $0x1e8] sm:$0xff] }
  0x1f   : > { %181 = vst [vmem:[%s975_s26 + $0x78] sm:$0xff] %v180_v15  ;;  %v214_v32 = vld [vmem:[%s970_s25 + $0x200] sm:$0xff]  ;;  %v216_v33 = vld [vmem:[%s970_s25 + $0x208] sm:$0xff] }
  0x20   : > { %183 = vst [vmem:[%s975_s26 + $0x80] sm:$0xff] %v182_v16  ;;  %v218_v34 = vld [vmem:[%s970_s25 + $0x220] sm:$0xff]  ;;  %v220_v35 = vld [vmem:[%s970_s25 + $0x228] sm:$0xff] }
  0x21   : > { %185 = vst [vmem:[%s975_s26 + $0x88] sm:$0xff] %v184_v17 }
  0x22   : > { %187 = vst [vmem:[%s975_s26 + $0x90] sm:$0xff] %v186_v18 }
  0x23   : > { %189 = vst [vmem:[%s975_s26 + $0x98] sm:$0xff] %v188_v19 }
  0x24   : > { %191 = vst [vmem:[%s975_s26 + $0xa0] sm:$0xff] %v190_v20 }
  0x25   : > { %193 = vst [vmem:[%s975_s26 + $0xa8] sm:$0xff] %v192_v21 }
  0x26   : > { %195 = vst [vmem:[%s975_s26 + $0xb0] sm:$0xff] %v194_v22 }
  0x27   : > { %197 = vst [vmem:[%s975_s26 + $0xb8] sm:$0xff] %v196_v23 }
  0x28   : > { %199 = vst [vmem:[%s975_s26 + $0xc0] sm:$0xff] %v198_v24 }
  0x29   : > { %201 = vst [vmem:[%s975_s26 + $0xc8] sm:$0xff] %v200_v25 }
  0x2a   : > { %203 = vst [vmem:[%s975_s26 + $0xd0] sm:$0xff] %v202_v26 }
  0x2b   : > { %205 = vst [vmem:[%s975_s26 + $0xd8] sm:$0xff] %v204_v27 }
  0x2c   : > { %207 = vst [vmem:[%s975_s26 + $0xe0] sm:$0xff] %v206_v28 }
  0x2d   : > { %209 = vst [vmem:[%s975_s26 + $0xe8] sm:$0xff] %v208_v29 }
  0x2e   : > { %211 = vst [vmem:[%s975_s26 + $0xf0] sm:$0xff] %v210_v30 }
  0x2f   : > { %213 = vst [vmem:[%s975_s26 + $0xf8] sm:$0xff] %v212_v31 }
  0x30   : > { %215 = vst [vmem:[%s975_s26 + $0x100] sm:$0xff] %v214_v32 }
  0x31   : > { %217 = vst [vmem:[%s975_s26 + $0x108] sm:$0xff] %v216_v33 }
  0x32   : > { %219 = vst [vmem:[%s975_s26 + $0x110] sm:$0xff] %v218_v34 }
  0x33   : > { %221 = vst [vmem:[%s975_s26 + $0x118] sm:$0xff] %v220_v35 }
  0x34 PF: > { %p673_p5 = scmp.ge.s32.totalorder %s913_s14, 1  ;;  %p226_p6 = scmp.lt.s32.totalorder %s913_s14, 3 }
  0x36   : > { %p227_p7 = pnand %p673_p5, %p226_p6 }
  0x37   : > { %s233_s27 = sand.u32 (!%p227_p7), 1, %s905_s12   ;;  %s674_s7 = sshll.u32 (!%p227_p7), %s667_s15, 2 }
  0x38   : > { %230 = sbr.rel (%p227_p7) target bundleno = 253 (0xfd), region = 51  ;;  %p258_p8 = scmp.lt.s32.totalorder (!%p227_p7), %s674_s7, 7 }
  0x39   : > { %s864_s28 = smul.u32 (!%p227_p7), 288, %s233_s27 }
  0x3b   : > { %s1054_s4 = scalar_lea.vmem (!%p227_p7), [#allocation2], %s864_s28 }
  0x3d   : > { %v1052_v36 = vld [vmem:[%s1158_s0] sm:$0xff]  ;;  %vm493_vm0 = vcmask 130048   ;;  %v857_v38 = vld [vmem:[%s1054_s4 + $0xec] sm:$0xf0]  ;;  %v792_v42 = vld [vmem:[%s1054_s4 + $0xf0] sm:$0xf0] }
  0x3e   : > { %v790_v37 = vld [vmem:[%s1054_s4 + $0xe0] sm:$0xf]  ;;  %v855_v39 = vld [vmem:[%s1054_s4 + $0xe4] sm:$0xf]  ;;  %v309_v40 = vunpack.c.h.b16 %v1052_v36  ;;  %v861_v44 = vld [vmem:[%s1054_s4 + $0x10c] sm:$0xf0] }
  0x3f   : > { %v791_v41 = vor.u32 %v857_v38, %v790_v37  ;;  %v806_v43 = vld [vmem:[%s1054_s4 + $0x100] sm:$0xf]  ;;  %v795_v45 = vor.u32 %v855_v39, %v792_v42  ;;  %v853_v48 = vld [vmem:[%s1054_s4 + $0xcc] sm:$0xf0]  ;;  %v851_v49 = vld [vmem:[%s1054_s4 + $0xc4] sm:$0xf] }
  0x40   : > { %v807_v46 = vor.u32 %v861_v44, %v806_v43  ;;  %v774_v47 = vld [vmem:[%s1054_s4 + $0xc0] sm:$0xf]  ;;  %v776_v51 = vld [vmem:[%s1054_s4 + $0xd0] sm:$0xf0]  ;;  %v798_v52 = vld [vmem:[%s1054_s4 + $0xe8] sm:$0xf]  ;;  %v1072_v59 = vpack.c.b16 %v309_v40, %v309_v40 }
  0x41   : > { %497 = vmatpush.bf16.msra.mxu0 %v791_v41  ;;  %v775_v50 = vor.u32 %v853_v48, %v774_v47  ;;  %v858_v53 = vld [vmem:[%s1054_s4 + $0xf4] sm:$0xf0]  ;;  %523 = vmatpush.bf16.msra.mxu2 %v795_v45  ;;  %v779_v54 = vor.u32 %v851_v49, %v776_v51  ;;  %v814_v56 = vld [vmem:[%s1054_s4 + $0x108] sm:$0xf]  ;;  %v758_v58 = vld [vmem:[%s1054_s4 + $0xa0] sm:$0xf] }
  0x42   : > { %517 = vmatpush.bf16.msra.mxu1 %v807_v46  ;;  %v799_v55 = vor.u32 %v858_v53, %v798_v52  ;;  %v862_v57 = vld [vmem:[%s1054_s4 + $0x114] sm:$0xf0]  ;;  %v849_v61 = vld [vmem:[%s1054_s4 + $0xac] sm:$0xf0]  ;;  %v847_v62 = vld [vmem:[%s1054_s4 + $0xa4] sm:$0xf] }
  0x43   : > { %v815_v60 = vor.u32 %v862_v57, %v814_v56  ;;  %v760_v63 = vld [vmem:[%s1054_s4 + $0xb0] sm:$0xf0]  ;;  %v782_v0 = vld [vmem:[%s1054_s4 + $0xc8] sm:$0xf]  ;;  %v854_v1 = vld [vmem:[%s1054_s4 + $0xd4] sm:$0xf0]  ;;  %v759_v3 = vor.u32 %v849_v61, %v758_v58 }
  0x44   : > { %v856_v2 = vld [vmem:[%s1054_s4 + $0xec] sm:$0xf]  ;;  %v783_v4 = vor.u32 %v854_v1, %v782_v0  ;;  %v800_v5 = vld [vmem:[%s1054_s4 + $0xf8] sm:$0xf0]  ;;  %v742_v6 = vld [vmem:[%s1054_s4 + $0x80] sm:$0xf]  ;;  %v763_v8 = vor.u32 %v847_v62, %v760_v63 }
  0x45   : > { %498 = vmatpush.bf16.msra.mxu0 %v775_v50  ;;  %569 = vmatpush.bf16.msra.mxu3 %v815_v60  ;;  %v845_v7 = vld [vmem:[%s1054_s4 + $0x8c] sm:$0xf0]  ;;  %v803_v9 = vor.u32 %v856_v2, %v800_v5  ;;  %v843_v10 = vld [vmem:[%s1054_s4 + $0x84] sm:$0xf]  ;;  %v744_v11 = vld [vmem:[%s1054_s4 + $0x90] sm:$0xf0] }
  0x46   : > { %549 = vmatpush.bf16.msrb.mxu1 %v799_v55  ;;  %524 = vmatpush.bf16.msra.mxu2 %v779_v54  ;;  %v766_v12 = vld [vmem:[%s1054_s4 + $0xa8] sm:$0xf]  ;;  %v850_v13 = vld [vmem:[%s1054_s4 + $0xb4] sm:$0xf0]  ;;  %v852_v14 = vld [vmem:[%s1054_s4 + $0xcc] sm:$0xf]  ;;  %v743_v18 = vor.u32 %v845_v7, %v742_v6  ;;  %v747_v22 = vor.u32 %v843_v10, %v744_v11 }
  0x47   : > { %820 = vmatmul.msk.bf16.vlgmr.msra.gmra.mxu1 %vm493_vm0, %v1072_v59  ;;  %v784_v15 = vld [vmem:[%s1054_s4 + $0xd8] sm:$0xf0]  ;;  %v767_v16 = vor.u32 %v850_v13, %v766_v12  ;;  %v726_v19 = vld [vmem:[%s1054_s4 + $0x60] sm:$0xf]  ;;  %v750_v20 = vld [vmem:[%s1054_s4 + $0x88] sm:$0xf] }
  0x48   : > { %v787_v17 = vor.u32 %v852_v14, %v784_v15  ;;  %v846_v21 = vld [vmem:[%s1054_s4 + $0x94] sm:$0xf0]  ;;  %822 = vmatmul.msk.bf16.vlgmr.msra.gmra.mxu3 %vm493_vm0, %v1072_v59  ;;  %v841_v23 = vld [vmem:[%s1054_s4 + $0x6c] sm:$0xf0]  ;;  %v848_v24 = vld [vmem:[%s1054_s4 + $0xac] sm:$0xf] }
  0x49   : > { %575 = vmatpush.bf16.msrb.mxu3 %v803_v9  ;;  %499 = vmatpush.bf16.msra.mxu0 %v759_v3  ;;  %v768_v25 = vld [vmem:[%s1054_s4 + $0xb8] sm:$0xf0]  ;;  %v839_v26 = vld [vmem:[%s1054_s4 + $0x64] sm:$0xf]  ;;  %v728_v27 = vld [vmem:[%s1054_s4 + $0x70] sm:$0xf0]  ;;  %v751_v28 = vor.u32 %v846_v21, %v750_v20  ;;  %v727_v31 = vor.u32 %v841_v23, %v726_v19 }
  0x4a   : > { %550 = vmatpush.bf16.msrb.mxu1 %v783_v4  ;;  %525 = vmatpush.bf16.msra.mxu2 %v763_v8  ;;  %v771_v29 = vor.u32 %v848_v24, %v768_v25  ;;  %v734_v30 = vld [vmem:[%s1054_s4 + $0x68] sm:$0xf]  ;;  %v842_v32 = vld [vmem:[%s1054_s4 + $0x74] sm:$0xf0]  ;;  %v844_v33 = vld [vmem:[%s1054_s4 + $0x8c] sm:$0xf]  ;;  %v731_v35 = vor.u32 %v839_v26, %v728_v27  ;;  %v308_v8 = vunpack.c.l.b16 %v1052_v36 }
  0x4b   : > { %v752_v34 = vld [vmem:[%s1054_s4 + $0x98] sm:$0xf0]  ;;  %v710_v37 = vld [vmem:[%s1054_s4 + $0x40] sm:$0xf]  ;;  %v837_v38 = vld [vmem:[%s1054_s4 + $0x4c] sm:$0xf0]  ;;  %v735_v41 = vor.u32 %v842_v32, %v734_v30 }
  0x4c   : > { %v835_v39 = vld [vmem:[%s1054_s4 + $0x44] sm:$0xf]  ;;  %v712_v40 = vld [vmem:[%s1054_s4 + $0x50] sm:$0xf0]  ;;  %v755_v42 = vor.u32 %v844_v33, %v752_v34  ;;  %v718_v43 = vld [vmem:[%s1054_s4 + $0x48] sm:$0xf]  ;;  %v711_v44 = vor.u32 %v837_v38, %v710_v37  ;;  %v310_v19 = vpack.c.b16 %v308_v8, %v308_v8 }
  0x4d   : > { %576 = vmatpush.bf16.msrb.mxu3 %v787_v17  ;;  %500 = vmatpush.bf16.msra.mxu0 %v743_v18  ;;  %v838_v45 = vld [vmem:[%s1054_s4 + $0x54] sm:$0xf0]  ;;  %v840_v46 = vld [vmem:[%s1054_s4 + $0x6c] sm:$0xf]  ;;  %v736_v47 = vld [vmem:[%s1054_s4 + $0x78] sm:$0xf0]  ;;  %v715_v48 = vor.u32 %v835_v39, %v712_v40 }
  0x4e   : > { %551 = vmatpush.bf16.msrb.mxu1 %v767_v16  ;;  %526 = vmatpush.bf16.msra.mxu2 %v747_v22  ;;  %v694_v49 = vld [vmem:[%s1054_s4 + $0x20] sm:$0xf]  ;;  %v833_v50 = vld [vmem:[%s1054_s4 + $0x2c] sm:$0xf0]  ;;  %v831_v51 = vld [vmem:[%s1054_s4 + $0x24] sm:$0xf]  ;;  %v719_v53 = vor.u32 %v838_v45, %v718_v43  ;;  %v739_v54 = vor.u32 %v840_v46, %v736_v47 }
  0x4f   : > { %v696_v52 = vld [vmem:[%s1054_s4 + $0x30] sm:$0xf0]  ;;  %v678_v55 = vld [vmem:[%s1054_s4] sm:$0xf]  ;;  %v702_v56 = vld [vmem:[%s1054_s4 + $0x28] sm:$0xf]  ;;  %v695_v57 = vor.u32 %v833_v50, %v694_v49 }
  0x50   : > { %v834_v58 = vld [vmem:[%s1054_s4 + $0x34] sm:$0xf0]  ;;  %v836_v60 = vld [vmem:[%s1054_s4 + $0x4c] sm:$0xf]  ;;  %v720_v61 = vld [vmem:[%s1054_s4 + $0x58] sm:$0xf0]  ;;  %v699_v62 = vor.u32 %v831_v51, %v696_v52 }
  0x51   : > { %577 = vmatpush.bf16.msrb.mxu3 %v771_v29  ;;  %501 = vmatpush.bf16.msra.mxu0 %v727_v31  ;;  %v829_v63 = vld [vmem:[%s1054_s4 + $0xc] sm:$0xf0]  ;;  %v827_v0 = vld [vmem:[%s1054_s4 + $0x4] sm:$0xf]  ;;  %v680_v2 = vld [vmem:[%s1054_s4 + $0x10] sm:$0xf0]  ;;  %v703_v6 = vor.u32 %v834_v58, %v702_v56  ;;  %v723_v7 = vor.u32 %v836_v60, %v720_v61 }
  0x52   : > { %552 = vmatpush.bf16.msrb.mxu1 %v751_v28  ;;  %527 = vmatpush.bf16.msra.mxu2 %v731_v35  ;;  %v301_v1 = vld [vmem:[%s1160_s2] sm:$0xff]  ;;  %v860_v3 = vld [vmem:[%s1054_s4 + $0x10c] sm:$0xf]  ;;  %v816_v4 = vld [vmem:[%s1054_s4 + $0x118] sm:$0xf0]  ;;  %v915_v5 = vmov 0   ;;  %v679_v11 = vor.u32 %v829_v63, %v678_v55  ;;  %v683_v14 = vor.u32 %v827_v0, %v680_v2 }
  0x53   : > { %890 = vset.pattern.permute.xlu0 %v915_v5  ;;  %v859_v9 = vld [vmem:[%s1054_s4 + $0x104] sm:$0xf]  ;;  %v808_v10 = vld [vmem:[%s1054_s4 + $0x110] sm:$0xf0]  ;;  %v686_v12 = vld [vmem:[%s1054_s4 + $0x8] sm:$0xf]  ;;  %v819_v17 = vor.u32 %v860_v3, %v816_v4 }
  0x54   : > { %v830_v13 = vld [vmem:[%s1054_s4 + $0x14] sm:$0xf0]  ;;  %304 = vperm.xlu0 %890, %v301_v1   ;;  %v832_v15 = vld [vmem:[%s1054_s4 + $0x2c] sm:$0xf]  ;;  %v704_v16 = vld [vmem:[%s1054_s4 + $0x38] sm:$0xf0]  ;;  %v811_v18 = vor.u32 %v859_v9, %v808_v10 }
  0x55   : > { %578 = vmatpush.bf16.msrb.mxu3 %v755_v42  ;;  %502 = vmatpush.bf16.msra.mxu0 %v711_v44  ;;  %v687_v20 = vor.u32 %v830_v13, %v686_v12  ;;  %v707_v36 = vor.u32 %v832_v15, %v704_v16  ;;  %v828_v21 = vld [vmem:[%s1054_s4 + $0xc] sm:$0xf]  ;;  %v688_v22 = vld [vmem:[%s1054_s4 + $0x18] sm:$0xf0]  ;;  %s1166_s7 = smov (!%p258_p8, %s674_s7), 7 }
  0x56   : > { %553 = vmatpush.bf16.msrb.mxu1 %v735_v41  ;;  %528 = vmatpush.bf16.msra.mxu2 %v715_v48  ;;  %v691_v23 = vor.u32 %v828_v21, %v688_v22  ;;  %s675_s8 = sshll.u32 %s1166_s7, 3 }
  0x57   : > { %s261_s11 = scalar_lea.vmem %s1161_s3, %s675_s8 }
  0x59   : > { %579 = vmatpush.bf16.msrb.mxu3 %v739_v54  ;;  %503 = vmatpush.bf16.msra.mxu0 %v695_v57 }
  0x5a   : > { %554 = vmatpush.bf16.msrb.mxu1 %v719_v53  ;;  %529 = vmatpush.bf16.msra.mxu2 %v699_v62 }
  0x5d   : > { %580 = vmatpush.bf16.msrb.mxu3 %v723_v7  ;;  %504 = vmatpush.bf16.msra.mxu0 %v679_v11 }
  0x5e   : > { %555 = vmatpush.bf16.msrb.mxu1 %v703_v6  ;;  %530 = vmatpush.bf16.msra.mxu2 %v683_v14 }
  0x60   : > { %505 = vmatmul.bf16.vlgmr.msra.gmra.mxu0 %v310_v19 }
  0x61   : > { %595 = vmatpush.bf16.msrb.mxu0 %v819_v17  ;;  %531 = vmatmul.bf16.vlgmr.msra.gmra.mxu2 %v310_v19 }
  0x62   : > { %543 = vmatpush.bf16.msrb.mxu2 %v811_v18  ;;  %556 = vmatpush.bf16.msrb.mxu1 %v687_v20 }
  0x63   : > { %581 = vmatpush.bf16.msrb.mxu3 %v707_v36 }
  0x65   : > { %557 = vmatmul.bf16.vlgmr.msrb.gmra.mxu1 %v310_v19 }
  0x67   : > { %582 = vmatpush.bf16.msrb.mxu3 %v691_v23 }
  0x6a   : > { %583 = vmatmul.bf16.vlgmr.msrb.gmra.mxu3 %v310_v19 }
  0x70   : > { %823 = vmatmul.msk.bf16.vlgmr.msrb.gmra.mxu0 %vm493_vm0, %v1072_v59 }
  0x71   : > { %821 = vmatmul.msk.bf16.vlgmr.msrb.gmra.mxu2 %vm493_vm0, %v1072_v59 }
  0xc4   : > { %v519_v24 = vpop.f32.mrf.mxu1 }
  0xc6   : > { %v305_v28 = vpop.permute.xlu0 %304 }
  0xcb   : > { %v571_v26 = vpop.f32.mrf.mxu3 }
  0xcc   : > { %v521_v25 = vpop.f32.mrf.mxu1 }
  0xd3   : > { %v573_v27 = vpop.f32.mrf.mxu3 }
  0xdd   : > { %v506_v29 = vpop.f32.mrf.mxu0 }
  0xde   : > { %v507_v30 = vadd.f32 %v506_v29, %v305_v28 }
  0xe0   : > { %v520_v31 = vadd.f32 %v519_v24, %v507_v30 }
  0xe2   : > { %v558_v32 = vpop.f32.mrf.mxu1  ;;  %601 = vst [vmem:[%s261_s11] sm:$0xff] %v520_v31 }
  0xe3   : > { %v559_v39 = vadd.f32 %v558_v32, %v305_v28 }
  0xe4   : > { %v532_v59 = vpop.f32.mrf.mxu2 }
  0xe5   : > { %v508_v33 = vpop.f32.mrf.mxu0  ;;  %v533_v40 = vadd.f32 %v532_v59, %v305_v28  ;;  %v572_v46 = vadd.f32 %v571_v26, %v559_v39 }
  0xe7   : > { %603 = vst [vmem:[%s261_s11 + $0x10] sm:$0xff] %v572_v46 }
  0xea   : > { %v560_v34 = vpop.f32.mrf.mxu1 }
  0xec   : > { %v534_v37 = vpop.f32.mrf.mxu2 }
  0xed   : > { %v584_v35 = vpop.f32.mrf.mxu3  ;;  %v597_v38 = vpop.f32.mrf.mxu0 }
  0xee   : > { %v585_v41 = vadd.f32 %v584_v35, %v305_v28 }
  0xf0   : > { %v598_v47 = vadd.f32 %v597_v38, %v585_v41 }
  0xf2   : > { %604 = vst [vmem:[%s261_s11 + $0x18] sm:$0xff] %v598_v47 }
  0xf4   : > { %v545_v43 = vpop.f32.mrf.mxu2 }
  0xf5   : > { %v586_v42 = vpop.f32.mrf.mxu3  ;;  %v546_v44 = vadd.f32 %v545_v43, %v533_v40  ;;  %v599_v45 = vpop.f32.mrf.mxu0 }
  0xf7   : > { %602 = vst [vmem:[%s261_s11 + $0x8] sm:$0xff] %v546_v44 }
  0xfc   : > { %v547_v48 = vpop.f32.mrf.mxu2 }
  0xfd PF: > { %p10_p9 = scmp.ge.s32.totalorder %s953_s16, 4   ;;  %s1162_s12 = smov %s909_s13 }
  0xfe   : > { %s1163_s13 = smov %s962_s19  ;;  %s1164_s14 = smov %s953_s16 }
  0xff   :  { %12 = sbr.rel (!%p10_p9) target bundleno = 2 (0x2), region = 90 }

// kernel: net_forward.62
= control target key start
LH: loop header
LB: loop body
LE: loop exit
PB: predicated region body
PF: predicated region fallthrough
CT: control target
= control target key end

     0   :  { %s823_s0 = inlined_call_operand.vmem [shape: bf16[1,80], index: 0, kind: input, shape index: {}]   ;;  %s824_s1 = inlined_call_operand.vmem [shape: bf16[80,1024], index: 1, kind: input, shape index: {}]   ;;  %s825_s2 = inlined_call_operand.<no memory space> [shape: f32[1,1], index: 2, kind: input, shape index: {}]   ;;  %s826_s3 = inlined_call_operand.vmem [shape: f32[1,1024], index: 3, kind: output, shape index: {}]  }
   0x1   :  { %v8_v0 = vstv %s825_s2 }
   0x2   :  { %9 = vst [vmem:[#allocation2] sm:$0x1] %v8_v0 }
   0x3   :  { %s682_s14 = smov 0   ;;  %s684_s15 = smov 0  }
   0x4   :  { %s686_s16 = smov 0  }
   0x5 LB: > { %s491_s2 = sadd.s32 4294967295, %s656_s16   ;;  %s699_s17 = sadd.s32 1, %s656_s16   ;;  %s656_s16 = sphi %s686_s16, %s829_s16   ;;  %s652_s15 = sphi %s684_s15, %s828_s15   ;;  %s648_s14 = sphi %s682_s14, %s827_s14  }
   0x6   : > { %s40_s18 = ssub.s32 %s656_s16, %s699_s17  ;;  %s43_s19 = sadd.s32 1, %s652_s15 }
   0x7   : > { %p41_p0 = scmp.eq.s32.totalorder %s40_s18, 0  ;;  %p50_p1 = scmp.ne.s32.totalorder %s652_s15, %s648_s14 }
   0x8   : > { %p51_p2 = scmp.eq.s32.totalorder %s656_s16, 0  ;;  %p494_p4 = scmp.ge.s32.totalorder %s656_s16, 2 }
   0x9   : > { %s708_s20 = scalar_select %p41_p0, %s652_s15, %s43_s19  }
   0xa   : > { %p52_p3 = por %p51_p2, %p50_p1  ;;  %129 = sbr.rel (%p494_p4) target bundleno = 39 (0x27), region = 24 }
   0xf   : > { %132 = sbr.rel (!%p52_p3) target bundleno = 39 (0x27), region = 28  ;;  %s134_s21 = sand.u32 (%p52_p3), 1, %s652_s15  }
  0x10   : > { %s585_s22 = sshll.u32 (%p52_p3), %s656_s16, 4  ;;  %s606_s23 = smul.u32 (%p52_p3), 160, %s134_s21 }
  0x11   : > { %s716_s26 = scalar_lea.vmem (%p52_p3), %s824_s1, %s585_s22 }
  0x12   : > { %v152_v1 = vld [vmem:[%s716_s26] sm:$0xff] (%p52_p3)  ;;  %v154_v2 = vld [vmem:[%s716_s26 + $0x8] sm:$0xff] (%p52_p3)  ;;  %s721_s27 = scalar_lea.vmem (%p52_p3), [#allocation3], %s606_s23 }
  0x13   : > { %v156_v3 = vld [vmem:[%s716_s26 + $0x20] sm:$0xff] (%p52_p3)  ;;  %153 = vst [vmem:[%s721_s27] sm:$0xff] (%p52_p3), %v152_v1  ;;  %v158_v4 = vld [vmem:[%s716_s26 + $0x28] sm:$0xff] (%p52_p3) }
  0x14   : > { %155 = vst [vmem:[%s721_s27 + $0x8] sm:$0xff] %v154_v2  ;;  %v160_v5 = vld [vmem:[%s716_s26 + $0x40] sm:$0xff]  ;;  %v162_v6 = vld [vmem:[%s716_s26 + $0x48] sm:$0xff] }
  0x15   : > { %157 = vst [vmem:[%s721_s27 + $0x10] sm:$0xff] %v156_v3  ;;  %v164_v7 = vld [vmem:[%s716_s26 + $0x60] sm:$0xff]  ;;  %v166_v8 = vld [vmem:[%s716_s26 + $0x68] sm:$0xff] }
  0x16   : > { %159 = vst [vmem:[%s721_s27 + $0x18] sm:$0xff] %v158_v4  ;;  %v168_v9 = vld [vmem:[%s716_s26 + $0x80] sm:$0xff]  ;;  %v170_v10 = vld [vmem:[%s716_s26 + $0x88] sm:$0xff] }
  0x17   : > { %161 = vst [vmem:[%s721_s27 + $0x20] sm:$0xff] %v160_v5  ;;  %v172_v11 = vld [vmem:[%s716_s26 + $0xa0] sm:$0xff]  ;;  %v174_v12 = vld [vmem:[%s716_s26 + $0xa8] sm:$0xff] }
  0x18   : > { %163 = vst [vmem:[%s721_s27 + $0x28] sm:$0xff] %v162_v6  ;;  %v176_v13 = vld [vmem:[%s716_s26 + $0xc0] sm:$0xff]  ;;  %v178_v14 = vld [vmem:[%s716_s26 + $0xc8] sm:$0xff] }
  0x19   : > { %165 = vst [vmem:[%s721_s27 + $0x30] sm:$0xff] %v164_v7  ;;  %v180_v15 = vld [vmem:[%s716_s26 + $0xe0] sm:$0xff]  ;;  %v182_v16 = vld [vmem:[%s716_s26 + $0xe8] sm:$0xff] }
  0x1a   : > { %167 = vst [vmem:[%s721_s27 + $0x38] sm:$0xff] %v166_v8  ;;  %v184_v17 = vld [vmem:[%s716_s26 + $0x100] sm:$0xff]  ;;  %v186_v18 = vld [vmem:[%s716_s26 + $0x108] sm:$0xff] }
  0x1b   : > { %169 = vst [vmem:[%s721_s27 + $0x40] sm:$0xff] %v168_v9  ;;  %v188_v19 = vld [vmem:[%s716_s26 + $0x120] sm:$0xff]  ;;  %v190_v20 = vld [vmem:[%s716_s26 + $0x128] sm:$0xff] }
  0x1c   : > { %171 = vst [vmem:[%s721_s27 + $0x48] sm:$0xff] %v170_v10 }
  0x1d   : > { %173 = vst [vmem:[%s721_s27 + $0x50] sm:$0xff] %v172_v11 }
  0x1e   : > { %175 = vst [vmem:[%s721_s27 + $0x58] sm:$0xff] %v174_v12 }
  0x1f   : > { %177 = vst [vmem:[%s721_s27 + $0x60] sm:$0xff] %v176_v13 }
  0x20   : > { %179 = vst [vmem:[%s721_s27 + $0x68] sm:$0xff] %v178_v14 }
  0x21   : > { %181 = vst [vmem:[%s721_s27 + $0x70] sm:$0xff] %v180_v15 }
  0x22   : > { %183 = vst [vmem:[%s721_s27 + $0x78] sm:$0xff] %v182_v16 }
  0x23   : > { %185 = vst [vmem:[%s721_s27 + $0x80] sm:$0xff] %v184_v17 }
  0x24   : > { %187 = vst [vmem:[%s721_s27 + $0x88] sm:$0xff] %v186_v18 }
  0x25   : > { %189 = vst [vmem:[%s721_s27 + $0x90] sm:$0xff] %v188_v19 }
  0x26   : > { %191 = vst [vmem:[%s721_s27 + $0x98] sm:$0xff] %v190_v20 }
  0x27 PF: > { %p497_p5 = scmp.ge.s32.totalorder %s656_s16, 1  ;;  %p196_p6 = scmp.lt.s32.totalorder %s656_s16, 3 }
  0x29   : > { %p197_p7 = pnand %p497_p5, %p196_p6 }
  0x2a   : > { %s203_s28 = sand.u32 (!%p197_p7), 1, %s648_s14   ;;  %s498_s6 = sshll.u32 (!%p197_p7), %s491_s2, 2 }
  0x2b   : > { %200 = sbr.rel (%p197_p7) target bundleno = 213 (0xd5), region = 51  ;;  %p227_p8 = scmp.lt.s32.totalorder (!%p197_p7), %s498_s6, 7 }
  0x2c   : > { %s607_s29 = smul.u32 (!%p197_p7), 160, %s203_s28 }
  0x2e   : > { %s763_s30 = scalar_lea.vmem (!%p197_p7), [#allocation3], %s607_s29 }
  0x30   : > { %v658_v21 = vmov 0   ;;  %v253_v22 = vld [vmem:[#allocation2] sm:$0x1]  ;;  %v565_v23 = vld [vmem:[%s763_s30 + $0x80] sm:$0xf]  ;;  %vm360_vm0 = vcmask 654336  }
  0x31   : > { %633 = vset.pattern.permute.xlu0 %v658_v21  ;;  %v604_v24 = vld [vmem:[%s763_s30 + $0x8c] sm:$0xf0]  ;;  %v602_v25 = vld [vmem:[%s763_s30 + $0x84] sm:$0xf]  ;;  %v567_v27 = vld [vmem:[%s763_s30 + $0x90] sm:$0xf0] }
  0x32   : > { %256 = vperm.xlu0 %633, %v253_v22   ;;  %v566_v26 = vor.u32 %v604_v24, %v565_v23  ;;  %v573_v28 = vld [vmem:[%s763_s30 + $0x88] sm:$0xf]  ;;  %v605_v29 = vld [vmem:[%s763_s30 + $0x94] sm:$0xf0]  ;;  %v570_v30 = vor.u32 %v602_v25, %v567_v27  ;;  %v603_v32 = vld [vmem:[%s763_s30 + $0x8c] sm:$0xf] }
  0x33   : > { %v574_v31 = vor.u32 %v605_v29, %v573_v28  ;;  %v575_v33 = vld [vmem:[%s763_s30 + $0x98] sm:$0xf0]  ;;  %v549_v34 = vld [vmem:[%s763_s30 + $0x60] sm:$0xf]  ;;  %v600_v36 = vld [vmem:[%s763_s30 + $0x6c] sm:$0xf0]  ;;  %v430_v28 = vlaneseq }
  0x34   : > { %367 = vmatpush.bf16.msra.mxu0 %v566_v26  ;;  %v578_v35 = vor.u32 %v603_v32, %v575_v33  ;;  %v598_v37 = vld [vmem:[%s763_s30 + $0x64] sm:$0xf]  ;;  %v551_v38 = vld [vmem:[%s763_s30 + $0x70] sm:$0xf0]  ;;  %380 = vmatpush.bf16.msra.mxu1 %v570_v30  ;;  %v550_v39 = vor.u32 %v600_v36, %v549_v34  ;;  %v557_v41 = vld [vmem:[%s763_s30 + $0x68] sm:$0xf] }
  0x35   : > { %393 = vmatpush.bf16.msra.mxu2 %v574_v31  ;;  %v554_v40 = vor.u32 %v598_v37, %v551_v38  ;;  %v601_v42 = vld [vmem:[%s763_s30 + $0x74] sm:$0xf0]  ;;  %v599_v43 = vld [vmem:[%s763_s30 + $0x6c] sm:$0xf]  ;;  %v559_v45 = vld [vmem:[%s763_s30 + $0x78] sm:$0xf0] }
  0x36   : > { %406 = vmatpush.bf16.msra.mxu3 %v578_v35  ;;  %v558_v44 = vor.u32 %v601_v42, %v557_v41  ;;  %v533_v46 = vld [vmem:[%s763_s30 + $0x40] sm:$0xf]  ;;  %v596_v47 = vld [vmem:[%s763_s30 + $0x4c] sm:$0xf0]  ;;  %v562_v48 = vor.u32 %v599_v43, %v559_v45  ;;  %v594_v49 = vld [vmem:[%s763_s30 + $0x44] sm:$0xf] }
  0x37   : > { %v535_v50 = vld [vmem:[%s763_s30 + $0x50] sm:$0xf0]  ;;  %v541_v51 = vld [vmem:[%s763_s30 + $0x48] sm:$0xf]  ;;  %v534_v52 = vor.u32 %v596_v47, %v533_v46  ;;  %v597_v53 = vld [vmem:[%s763_s30 + $0x54] sm:$0xf0] }
  0x38   : > { %368 = vmatpush.bf16.msra.mxu0 %v550_v39  ;;  %v595_v54 = vld [vmem:[%s763_s30 + $0x4c] sm:$0xf]  ;;  %v543_v55 = vld [vmem:[%s763_s30 + $0x58] sm:$0xf0]  ;;  %381 = vmatpush.bf16.msra.mxu1 %v554_v40  ;;  %v538_v56 = vor.u32 %v594_v49, %v535_v50  ;;  %v542_v57 = vor.u32 %v597_v53, %v541_v51  ;;  %v517_v58 = vld [vmem:[%s763_s30 + $0x20] sm:$0xf] }
  0x39   : > { %394 = vmatpush.bf16.msra.mxu2 %v558_v44  ;;  %v592_v59 = vld [vmem:[%s763_s30 + $0x2c] sm:$0xf0]  ;;  %v590_v60 = vld [vmem:[%s763_s30 + $0x24] sm:$0xf]  ;;  %v546_v61 = vor.u32 %v595_v54, %v543_v55  ;;  %v519_v62 = vld [vmem:[%s763_s30 + $0x30] sm:$0xf0] }
  0x3a   : > { %407 = vmatpush.bf16.msra.mxu3 %v562_v48  ;;  %v525_v63 = vld [vmem:[%s763_s30 + $0x28] sm:$0xf]  ;;  %v593_v0 = vld [vmem:[%s763_s30 + $0x34] sm:$0xf0]  ;;  %v591_v1 = vld [vmem:[%s763_s30 + $0x2c] sm:$0xf]  ;;  %v518_v3 = vor.u32 %v592_v59, %v517_v58  ;;  %v522_v4 = vor.u32 %v590_v60, %v519_v62 }
  0x3b   : > { %v527_v2 = vld [vmem:[%s763_s30 + $0x38] sm:$0xf0]  ;;  %v526_v5 = vor.u32 %v593_v0, %v525_v63  ;;  %v501_v6 = vld [vmem:[%s763_s30] sm:$0xf]  ;;  %v588_v7 = vld [vmem:[%s763_s30 + $0xc] sm:$0xf0] }
  0x3c   : > { %369 = vmatpush.bf16.msra.mxu0 %v534_v52  ;;  %382 = vmatpush.bf16.msra.mxu1 %v538_v56  ;;  %v586_v8 = vld [vmem:[%s763_s30 + $0x4] sm:$0xf]  ;;  %v530_v9 = vor.u32 %v591_v1, %v527_v2  ;;  %v503_v10 = vld [vmem:[%s763_s30 + $0x10] sm:$0xf0]  ;;  %v509_v11 = vld [vmem:[%s763_s30 + $0x8] sm:$0xf]  ;;  %v502_v15 = vor.u32 %v588_v7, %v501_v6 }
  0x3d   : > { %395 = vmatpush.bf16.msra.mxu2 %v542_v57  ;;  %v589_v12 = vld [vmem:[%s763_s30 + $0x14] sm:$0xf0]  ;;  %v587_v13 = vld [vmem:[%s763_s30 + $0xc] sm:$0xf]  ;;  %v511_v14 = vld [vmem:[%s763_s30 + $0x18] sm:$0xf0]  ;;  %v506_v16 = vor.u32 %v586_v8, %v503_v10 }
  0x3e   : > { %408 = vmatpush.bf16.msra.mxu3 %v546_v61  ;;  %v510_v17 = vor.u32 %v589_v12, %v509_v11  ;;  %v514_v18 = vor.u32 %v587_v13, %v511_v14  ;;  %v232_v19 = vld [vmem:[%s823_s0] sm:$0x1]  ;;  %s831_s6 = smov (!%p227_p8, %s498_s6), 7  ;;  %vm423_vm1 = vcmask 1040384   ;;  %vm425_vm2 = vcmask 1042434  }
  0x3f   : > { %vm427_vm3 = vcmask 1041408   ;;  %s229_s9 = scalar_lea.vmem %s826_s3, %s831_s6  ;;  %vm432_vm4 = vcmp.lt.s32.totalorder %v430_v28, 512 }
  0x40   : > { %370 = vmatpush.bf16.msra.mxu0 %v518_v3  ;;  %383 = vmatpush.bf16.msra.mxu1 %v522_v4 }
  0x41   : > { %396 = vmatpush.bf16.msra.mxu2 %v526_v5 }
  0x42   : > { %409 = vmatpush.bf16.msra.mxu3 %v530_v9 }
  0x44   : > { %371 = vmatpush.bf16.msra.mxu0 %v502_v15  ;;  %384 = vmatpush.bf16.msra.mxu1 %v506_v16 }
  0x45   : > { %397 = vmatpush.bf16.msra.mxu2 %v510_v17 }
  0x46   : > { %410 = vmatpush.bf16.msra.mxu3 %v514_v18 }
  0x47   : > { %579 = vmatmul.msk.bf16.vlgmr.msra.gmra.mxu0 %vm360_vm0, %v232_v19  ;;  %580 = vmatmul.msk.bf16.vlgmr.msra.gmra.mxu1 %vm360_vm0, %v232_v19 }
  0x48   : > { %581 = vmatmul.msk.bf16.vlgmr.msra.gmra.mxu2 %vm360_vm0, %v232_v19 }
  0x49   : > { %582 = vmatmul.msk.bf16.vlgmr.msra.gmra.mxu3 %vm360_vm0, %v232_v19 }
  0xa4   : > { %v257_v20 = vpop.permute.xlu0 %256 }
  0xa5   : > { %v259_v23 = vperm.slane %v257_v20, 0 }
  0xc4   : > { %v373_v21 = vpop.f32.mrf.mxu0  ;;  %v386_v22 = vpop.f32.mrf.mxu1 }
  0xc5   : > { %v387_v24 = vadd.f32 %v386_v22, %v259_v23  ;;  %v374_v30 = vadd.f32 %v373_v21, %v259_v23 }
  0xc7   : > { %v420_v31 = vrot.slane %v387_v24, 7 }
  0xc9   : > { %v424_v36 = vsel %vm423_vm1, %v374_v30, %v420_v31 }
  0xcb   : > { %v399_v25 = vpop.f32.mrf.mxu2 }
  0xcc   : > { %v400_v26 = vadd.f32 %v399_v25, %v259_v23  ;;  %v412_v27 = vpop.f32.mrf.mxu3  ;;  %v375_v29 = vpop.f32.mrf.mxu0 }
  0xcd   : > { %v413_v32 = vadd.f32 %v412_v27, %v259_v23  ;;  %v388_v33 = vpop.f32.mrf.mxu1 }
  0xce   : > { %v421_v34 = vrot.slane %v400_v26, 6 }
  0xcf   : > { %v422_v35 = vrot.slane %v413_v32, 5 }
  0xd1   : > { %v426_v37 = vsel %vm425_vm2, %v421_v34, %v422_v35 }
  0xd2   : > { %v428_v38 = vsel %vm427_vm3, %v424_v36, %v426_v37 }
  0xd3   : > { %434 = vst.msk [vmem:[%s229_s9] sm:$0xf] %vm432_vm4, %v428_v38  ;;  %v401_v39 = vpop.f32.mrf.mxu2 }
  0xd4   : > { %v414_v40 = vpop.f32.mrf.mxu3 }
  0xd5 PF: > { %p12_p9 = scmp.ge.s32.totalorder %s699_s17, 4   ;;  %s827_s14 = smov %s652_s15 }
  0xd6   : > { %s828_s15 = smov %s708_s20  ;;  %s829_s16 = smov %s699_s17 }
  0xd7   :  { %14 = sbr.rel (!%p12_p9) target bundleno = 5 (0x5), region = 90 }

// kernel: net_forward.63
= control target key start
LH: loop header
LB: loop body
LE: loop exit
PB: predicated region body
PF: predicated region fallthrough
CT: control target
= control target key end

     0   :  { %s517_s12 = smov 0   ;;  %s519_s13 = smov 0   ;;  %s567_s0 = inlined_call_operand.vmem [shape: f32[2,8,64], index: 0, kind: input, shape index: {}]   ;;  %s568_s1 = inlined_call_operand.vmem [shape: f32[2,2,8], index: 1, kind: input, shape index: {}]   ;;  %s569_s2 = inlined_call_operand.vmem [shape: f32[2,1,64], index: 2, kind: output, shape index: {0}]   ;;  %s570_s3 = inlined_call_operand.vmem [shape: f32[2,1,64], index: 3, kind: output, shape index: {1}]  }
   0x1   :  { %s521_s14 = smov 0  }
   0x2 LB: > { %s26_s15 = sadd.s32 1, %s490_s13  ;;  %p430_p0 = scmp.ge.s32.totalorder %s494_s14, 1  ;;  %s494_s14 = sphi %s521_s14, %s14_s14   ;;  %s490_s13 = sphi %s519_s13, %s572_s13   ;;  %s486_s12 = sphi %s517_s12, %s571_s12  }
   0x3   : > { %p28_p1 = scmp.ge.s32.totalorder %s26_s15, 2  ;;  %p169_p2 = scmp.lt.s32.totalorder %s494_s14, 3 }
   0x5   : > { %s574_s15 = smov (%p28_p1, %s26_s15), 0  ;;  %p170_p3 = pnand %p430_p0, %p169_p2 }
   0x6   : > { %p206_p4 = scmp.lt.s32.totalorder (!%p170_p3), %s486_s12, 1 }
   0x7   : > { %173 = sbr.rel (%p170_p3) target bundleno = 227 (0xe3), region = 28 }
   0xc   : > { %s576_s12 = smov (!%p206_p4, %s486_s12), 1  ;;  %vm230_vm0 = vcmask 523264   ;;  %vm264_vm5 = vcmask 64512   ;;  %vm308_vm6 = vcmask 516096   ;;  %v289_v33 = vlaneseq }
   0xd   : > { %s431_s16 = sshll.u32 %s576_s12, 3  ;;  %s432_s20 = sshll.u32 %s576_s12, 1  ;;  %v496_v41 = vmov 0.0  }
   0xe   : > { %s212_s19 = scalar_lea.vmem %s567_s0, %s431_s16  ;;  %s216_s23 = scalar_lea.vmem %s568_s1, %s432_s20  ;;  %v290_v36 = vshrl.u32 %v289_v33, 7 }
   0xf   : > { %v229_v0 = vld [vmem:[%s212_s19] sm:$0xff]  ;;  %s222_s26 = scalar_lea.vmem %s569_s2, %s576_s12  ;;  %s228_s29 = scalar_lea.vmem %s570_s3, %s576_s12 }
  0x10   : > { %v231_v1 = vsel %vm230_vm0, %v229_v0, -inf  ;;  %v263_v29 = vld [vmem:[%s216_s23] sm:$0x3] }
  0x11   : > { %v232_v2 = vrot.slane %v231_v1, 4 }
  0x13   : > { %v233_v3 = vmax.f32 %v231_v1, %v232_v2 }
  0x15   : > { %v234_v4 = vrot.slane %v233_v3, 2 }
  0x17   : > { %v235_v5 = vmax.f32 %v233_v3, %v234_v4 }
  0x19   : > { %v236_v6 = vrot.slane %v235_v5, 1 }
  0x1b   : > { %v237_v7 = vmax.f32 %v235_v5, %v236_v6 }
  0x1d   : > { %v238_v8 = vsub.f32 %v229_v0, %v237_v7 }
  0x1f   : > { %v239_v9 = vmul.f32 1.442695, %v238_v8 }
  0x21   : > { %468 = vpow2.f32 %v239_v9 }
  0x27   : > { %v469_v10 = vpop.eup %468 }
  0x28   : > { %v241_v11 = vsel %vm230_vm0, %v469_v10, 0.0 }
  0x29   : > { %v242_v12 = vrot.slane %v241_v11, 4 }
  0x2b   : > { %v243_v13 = vadd.f32 %v242_v12, %v241_v11 }
  0x2d   : > { %v244_v14 = vrot.slane %v243_v13, 2 }
  0x2f   : > { %v245_v15 = vadd.f32 %v244_v14, %v243_v13 }
  0x31   : > { %v246_v16 = vrot.slane %v245_v15, 1 }
  0x33   : > { %v247_v17 = vadd.f32 %v246_v16, %v245_v15 }
  0x35   : > { %470 = vrcp.f32 %v247_v17  ;;  %v259_v20 = vand.u32 2147483648, %v247_v17  ;;  %vm253_vm1 = vweird.f32 %v247_v17  ;;  %v257_v22 = vand.u32 2147483647, %v247_v17 }
  0x37   : > { %v260_v24 = vor.u32 1.1754944e-38, %v259_v20  ;;  %vm258_vm4 = vcmp.eq.f32.partialorder %v257_v22, 8.507059e+37 }
  0x3b   : > { %v471_v18 = vpop.eup %470 }
  0x3c   : > { %v249_v19 = vmul.f32 %v471_v18, %v247_v17  ;;  %vm254_vm2 = vweird.f32 %v471_v18 }
  0x3d   : > { %vm255_vm3 = vmor %vm253_vm1, %vm254_vm2 }
  0x3e   : > { %v250_v21 = vsub.f32 1.0, %v249_v19 }
  0x40   : > { %v251_v23 = vmul.f32 %v471_v18, %v250_v21 }
  0x42   : > { %v252_v25 = vadd.f32 %v471_v18, %v251_v23 }
  0x44   : > { %v256_v26 = vsel %vm255_vm3, %v471_v18, %v252_v25 }
  0x45   : > { %v261_v27 = vsel %vm258_vm4, %v260_v24, %v256_v26 }
  0x46   : > { %v262_v28 = vmul.f32 %v469_v10, %v261_v27 }
  0x48   : > { %283 = vmatpush.msra.mxu0 %v262_v28 }
  0x49   : > { %433 = vmatmul.msk.f32.vlgmr.msra.gmra.mxu0 %vm264_vm5, %v263_v29 }
  0xc6   : > { %v285_v30 = vpop.f32.mrf.mxu0 }
  0xc7   : > { %vm438_vm7 = vcmp.lt.s32.totalorder %v285_v30, 0  ;;  %v439_v31 = vceil.f32 %v285_v30  ;;  %v440_v32 = vfloor.f32 %v285_v30  ;;  %309 = vst.msk [vmem:[%s222_s26] sm:$0x1] %vm308_vm6, %v285_v30 }
  0xc9   : > { %v441_v34 = vsel %vm438_vm7, %v439_v31, %v440_v32 }
  0xca   : > { %v442_v35 = vcvt.f32.s32 %v441_v34 }
  0xcc   : > { %v434_v37 = vadd.s32 4294967295, %v442_v35  ;;  %v294_v38 = vadd.s32 2, %v442_v35 }
  0xce   : > { %v292_v39 = vperm.slane %v434_v37, 1  ;;  %v295_v40 = vperm.slane %v294_v38, 1 }
  0xd0   : > { %vm293_vm8 = vcmp.ge.s32.totalorder %v290_v36, %v292_v39  ;;  %vm296_vm9 = vcmp.le.s32.totalorder %v290_v36, %v295_v40 }
  0xd1   : > { %vm297_vm10 = vmand %vm293_vm8, %vm296_vm9 }
  0xd2   : > { %v435_v42 = vsel %vm297_vm10, 1.0, %v496_v41 }
  0xd3   : > { %v300_v43 = vmul.f32 %v435_v42, %v262_v28 }
  0xd5   : > { %v301_v44 = vsel %vm230_vm0, %v300_v43, 0.0 }
  0xd6   : > { %v302_v45 = vrot.slane %v301_v44, 4 }
  0xd8   : > { %v303_v46 = vadd.f32 %v302_v45, %v301_v44 }
  0xda   : > { %v304_v47 = vrot.slane %v303_v46, 2 }
  0xdc   : > { %v305_v48 = vadd.f32 %v304_v47, %v303_v46 }
  0xde   : > { %v306_v49 = vrot.slane %v305_v48, 1 }
  0xe0   : > { %v307_v50 = vadd.f32 %v306_v49, %v305_v48 }
  0xe2   : > { %310 = vst.msk [vmem:[%s228_s29] sm:$0x1] %vm308_vm6, %v307_v50 }
  0xe3 PF: > { %s14_s14 = sadd.s32 1, %s494_s14   ;;  %s571_s12 = smov %s490_s13 }
  0xe4   : > { %p11_p5 = scmp.ge.s32.totalorder %s14_s14, 4   ;;  %s572_s13 = smov %s574_s15 }
  0xe6   :  { %13 = sbr.rel (!%p11_p5) target bundleno = 2 (0x2), region = 73 }

</bundles_post_ra>
